<compile_context>
chip_gen: v7x
topology: tpu7x:2x2x1
jax: 0.10.0
libtpu: 0.0.40
codegen_flags: <defaults>
</compile_context>

<pallas_src>
import jax
import jax.numpy as jnp
from jax.experimental import pallas as pl
from jax.experimental.pallas import tpu as pltpu


def prn_kernel(x_ref, w1_ref, b1_ref, w2_ref, b2_ref, w3_hbm, b3_hbm, o_ref,
               w3_vmem, b3_vmem, sem):
    # Kick off the dens2 weight/bias DMA immediately so it overlaps the
    # dens1 + bneck compute (w3+b3 is ~1/3 of the kernel's input bytes).
    w3_cp = pltpu.make_async_copy(w3_hbm, w3_vmem, sem.at[0])
    b3_cp = pltpu.make_async_copy(b3_hbm, b3_vmem, sem.at[1])
    w3_cp.start()
    b3_cp.start()

    res = x_ref[...]                                     # (B, F) f32 residual

    # dens1 + ReLU  (bf16 operands on the MXU, f32 accumulation)
    h = jnp.dot(res.astype(jnp.bfloat16), w1_ref[...],
                preferred_element_type=jnp.float32) + b1_ref[...]
    h = jnp.maximum(h, 0.0)
    # TODO(synk): nn.Dropout is identity in eval mode; training-mode masking not implemented.

    # bneck + ReLU  (tiny 32x32, keep f32)
    h = jnp.dot(h, w2_ref[...], preferred_element_type=jnp.float32) + b2_ref[...]
    h = jnp.maximum(h, 0.0)

    # dens2 needs w3/b3 -> wait for the overlapped DMA only now.
    w3_cp.wait()
    b3_cp.wait()

    # dens2 + ReLU  (bf16 operands, f32 accumulation)
    o = jnp.dot(h.astype(jnp.bfloat16), w3_vmem[...],
                preferred_element_type=jnp.float32) + b3_vmem[...]
    o = jnp.maximum(o, 0.0)

    # residual add (f32)
    o = o + res

    # softmax over the (flattened) feature axis, all in f32
    m = jnp.max(o, axis=1, keepdims=True)
    e = jnp.exp(o - m)
    s = jnp.sum(e, axis=1, keepdims=True)
    inv = pl.reciprocal(s, approx=True)                  # EUP slot (free-ish)
    inv = inv * (2.0 - s * inv)                          # one Newton step -> ~exact
    o_ref[...] = e * inv


def _round_up(n, m):
    return ((n + m - 1) // m) * m


def _padded_bytes(shape, dtype):
    """Layout-aware VMEM footprint: last dim -> 128 lanes, 2nd-last -> sublane tile."""
    itemsize = jnp.dtype(dtype).itemsize
    if len(shape) == 0:
        return 4
    if len(shape) == 1:
        rows, cols = 1, int(shape[0])
    else:
        rows = 1
        for d in shape[:-1]:
            rows *= int(d)
        cols = int(shape[-1])
    sublane = max(8, 32 // itemsize)                     # 8 for f32, 16 for bf16
    return _round_up(rows, sublane) * _round_up(cols, 128) * itemsize


def _vmem_limit_bytes(resident):
    """resident: list of (shape, dtype) that live in VMEM (inputs, output, scratch)."""
    need = sum(_padded_bytes(s, d) for (s, d) in resident)
    req = 2 * need + (8 << 20)                           # double-buffer margin + headroom
    cap = 48 << 20                                       # safe for v7x (64 MiB / TC)
    try:
        phys = int(getattr(pltpu.get_tpu_info(), "vmem_capacity_bytes", 0))
        if phys >= (100 << 20):                          # v5e / v6e: 128 MiB physical
            cap = 96 << 20
    except Exception:
        pass
    return int(min(max(req, 16 << 20), cap))


def prn_forward(x, packed_params, height, width):
    """x: (B, H, W, 17) float32 -> (B, H, W, 17) float32 (softmax over flattened features)."""
    B = x.shape[0]
    F = height * width * 17

    res = x.reshape(B, F)                                # Flatten (metadata only, no pad)
    w1, b1, w2, b2, w3, b3 = packed_params

    vmem = pl.BlockSpec(memory_space=pltpu.MemorySpace.VMEM)
    hbm = pl.BlockSpec(memory_space=pl.ANY)              # w3/b3: manual overlapped DMA

    resident = [
        (res.shape, res.dtype), (w1.shape, w1.dtype), (b1.shape, b1.dtype),
        (w2.shape, w2.dtype), (b2.shape, b2.dtype),
        ((B, F), jnp.float32),                           # output
        ((w3.shape), w3.dtype), ((b3.shape), b3.dtype),  # VMEM scratch copies
    ]

    out = pl.pallas_call(
        prn_kernel,
        out_shape=jax.ShapeDtypeStruct((B, F), jnp.float32),
        in_specs=[vmem, vmem, vmem, vmem, vmem, hbm, hbm],
        out_specs=vmem,
        scratch_shapes=[
            pltpu.VMEM(w3.shape, w3.dtype),              # w3 landing buffer
            pltpu.VMEM(b3.shape, b3.dtype),              # b3 landing buffer
            pltpu.SemaphoreType.DMA((2,)),
        ],
        compiler_params=pltpu.CompilerParams(
            vmem_limit_bytes=_vmem_limit_bytes(resident),
        ),
    )(res, w1, b1, w2, b2, w3, b3)

    return out.reshape(B, height, width, 17)


def init_params(key, in_features, node_count):
    """Deterministic synthetic init matching nn.Linear shapes (stored transposed as (in, out))."""
    ks = jax.random.split(key, 6)
    scale1 = 1.0 / jnp.sqrt(in_features)
    scale2 = 1.0 / jnp.sqrt(node_count)
    # dens1: Linear(F -> N)
    w1 = jax.random.uniform(ks[0], (in_features, node_count), jnp.float32, -scale1, scale1)
    b1 = jax.random.uniform(ks[1], (1, node_count), jnp.float32, -scale1, scale1)
    # bneck: Linear(N -> N)
    w2 = jax.random.uniform(ks[2], (node_count, node_count), jnp.float32, -scale2, scale2)
    b2 = jax.random.uniform(ks[3], (1, node_count), jnp.float32, -scale2, scale2)
    # dens2: Linear(N -> F)
    w3 = jax.random.uniform(ks[4], (node_count, in_features), jnp.float32, -scale2, scale2)
    b3 = jax.random.uniform(ks[5], (1, in_features), jnp.float32, -scale2, scale2)
    return (w1, b1, w2, b2, w3, b3)


def pack_params(params):
    """One-time repack: the two large weights (w1, w3) in bfloat16; everything else f32.
    No padding -- the kernel runs on the true (unpadded) feature axis."""
    w1, b1, w2, b2, w3, b3 = params
    return (w1.astype(jnp.bfloat16), b1, w2, b2, w3.astype(jnp.bfloat16), b3)


def prn_reference(x, packed_params, height, width):
    """Pure-JAX reference using the same dtypes as the kernel (bf16 weights, f32 accum)."""
    B = x.shape[0]
    F = height * width * 17
    w1, b1, w2, b2, w3, b3 = packed_params
    res = x.reshape(B, F)
    h = jnp.dot(res.astype(jnp.bfloat16), w1, preferred_element_type=jnp.float32) + b1
    h = jnp.maximum(h, 0.0)
    h = jnp.dot(h, w2, preferred_element_type=jnp.float32) + b2
    h = jnp.maximum(h, 0.0)
    o = jnp.dot(h.astype(jnp.bfloat16), w3, preferred_element_type=jnp.float32) + b3
    o = jnp.maximum(o, 0.0)
    o = o + res
    o = jax.nn.softmax(o, axis=1)
    return o.reshape(B, height, width, 17)


if __name__ == "__main__":
    # Shapes consistent with the module: coeff=1 -> H=28, W=18, F=28*18*17=8568.
    # batch=8 fills all 8 f32 sublanes and amortizes the weight DMA.
    coeff = 1
    node_count = 32
    batch = 8
    height = coeff * 28
    width = coeff * 18
    feat = height * width * 17

    key = jax.random.PRNGKey(0)
    kx, kp = jax.random.split(key)
    x = jax.random.normal(kx, (batch, height, width, 17), dtype=jnp.float32)
    params = init_params(kp, feat, node_count)
    packed = pack_params(params)

    out = prn_forward(x, packed, height, width)
    out = jax.block_until_ready(out)

    assert out.shape == (batch, height, width, 17), out.shape
    assert bool(jnp.all(jnp.isfinite(out)))
    # softmax over flattened features -> each batch row sums to 1
    row_sums = out.reshape(batch, -1).sum(axis=1)
    assert bool(jnp.allclose(row_sums, 1.0, atol=1e-4)), row_sums
    # per-element check against a dtype-matched pure-JAX reference
    ref = jax.block_until_ready(prn_reference(x, packed, height, width))
    assert bool(jnp.allclose(out, ref, rtol=5e-3, atol=1e-7)), float(jnp.max(jnp.abs(out - ref)))

    print("KERNEL_OK")
</pallas_src>

<mosaic_0001>
module attributes {stable_mosaic.version = 11 : i64} {
  func.func @prn_kernel(%arg0: memref<8x8568xf32, #tpu.memory_space<vmem>>, %arg1: memref<8568x32xbf16, #tpu.memory_space<vmem>>, %arg2: memref<1x32xf32, #tpu.memory_space<vmem>>, %arg3: memref<32x32xf32, #tpu.memory_space<vmem>>, %arg4: memref<1x32xf32, #tpu.memory_space<vmem>>, %arg5: memref<32x8568xbf16, #tpu.memory_space<any>>, %arg6: memref<1x8568xf32, #tpu.memory_space<any>>, %arg7: memref<8x8568xf32, #tpu.memory_space<vmem>>, %arg8: memref<32x8568xbf16, #tpu.memory_space<vmem>>, %arg9: memref<1x8568xf32, #tpu.memory_space<vmem>>, %arg10: memref<2x!tpu.dma_semaphore, #tpu.memory_space<semaphore_mem>>) attributes {dimension_semantics = [], scalar_prefetch = 0 : i64, scratch_operands = 3 : i64, tpu.core_type = #tpu.core_type<tc>} {
    %c0_i32 = arith.constant 0 : i32
    %0 = tpu.memref_slice %arg10[%c0_i32] : memref<2x!tpu.dma_semaphore, #tpu.memory_space<semaphore_mem>> -> memref<1x!tpu.dma_semaphore, #tpu.memory_space<semaphore_mem>>
    %1 = tpu.memref_squeeze %0 : memref<1x!tpu.dma_semaphore, #tpu.memory_space<semaphore_mem>> -> memref<!tpu.dma_semaphore, #tpu.memory_space<semaphore_mem>>
    tpu.enqueue_dma source(%arg5 : memref<32x8568xbf16, #tpu.memory_space<any>>) target(%arg8 : memref<32x8568xbf16, #tpu.memory_space<vmem>>) target_semaphore(%1 : memref<!tpu.dma_semaphore, #tpu.memory_space<semaphore_mem>>)
    %c1_i32 = arith.constant 1 : i32
    %2 = tpu.memref_slice %arg10[%c1_i32] : memref<2x!tpu.dma_semaphore, #tpu.memory_space<semaphore_mem>> -> memref<1x!tpu.dma_semaphore, #tpu.memory_space<semaphore_mem>>
    %3 = tpu.memref_squeeze %2 : memref<1x!tpu.dma_semaphore, #tpu.memory_space<semaphore_mem>> -> memref<!tpu.dma_semaphore, #tpu.memory_space<semaphore_mem>>
    tpu.enqueue_dma source(%arg6 : memref<1x8568xf32, #tpu.memory_space<any>>) target(%arg9 : memref<1x8568xf32, #tpu.memory_space<vmem>>) target_semaphore(%3 : memref<!tpu.dma_semaphore, #tpu.memory_space<semaphore_mem>>)
    %c0 = arith.constant 0 : index
    %c0_0 = arith.constant 0 : index
    %4 = vector.load %arg0[%c0, %c0_0] : memref<8x8568xf32, #tpu.memory_space<vmem>>, vector<8x8568xf32>
    %5 = arith.truncf %4 : vector<8x8568xf32> to vector<8x8568xbf16>
    %c0_1 = arith.constant 0 : index
    %c0_2 = arith.constant 0 : index
    %6 = vector.load %arg1[%c0_1, %c0_2] : memref<8568x32xbf16, #tpu.memory_space<vmem>>, vector<8568x32xbf16>
    %cst = arith.constant dense<0.000000e+00> : vector<8x32xf32>
    %7 = tpu.matmul %5, %6, %cst {dimension_numbers = #tpu.dot_dimension_numbers<[1], [0], [0], [1], [0, 0, 1, 1], [], []>} : vector<8x8568xbf16>, vector<8568x32xbf16>, vector<8x32xf32> -> vector<8x32xf32>
    %c0_3 = arith.constant 0 : index
    %c0_4 = arith.constant 0 : index
    %8 = vector.load %arg2[%c0_3, %c0_4] : memref<1x32xf32, #tpu.memory_space<vmem>>, vector<1x32xf32>
    %9 = vector.broadcast %8 : vector<1x32xf32> to vector<8x32xf32>
    %10 = arith.addf %7, %9 : vector<8x32xf32>
    %cst_5 = arith.constant 0.000000e+00 : f32
    %11 = vector.broadcast %cst_5 : f32 to vector<8x32xf32>
    %12 = arith.maximumf %10, %11 : vector<8x32xf32>
    %c0_6 = arith.constant 0 : index
    %c0_7 = arith.constant 0 : index
    %13 = vector.load %arg3[%c0_6, %c0_7] : memref<32x32xf32, #tpu.memory_space<vmem>>, vector<32x32xf32>
    %cst_8 = arith.constant dense<0.000000e+00> : vector<8x32xf32>
    %14 = tpu.matmul %12, %13, %cst_8 {dimension_numbers = #tpu.dot_dimension_numbers<[1], [0], [0], [1], [0, 0, 1, 1], [], []>} : vector<8x32xf32>, vector<32x32xf32>, vector<8x32xf32> -> vector<8x32xf32>
    %c0_9 = arith.constant 0 : index
    %c0_10 = arith.constant 0 : index
    %15 = vector.load %arg4[%c0_9, %c0_10] : memref<1x32xf32, #tpu.memory_space<vmem>>, vector<1x32xf32>
    %16 = vector.broadcast %15 : vector<1x32xf32> to vector<8x32xf32>
    %17 = arith.addf %14, %16 : vector<8x32xf32>
    %cst_11 = arith.constant 0.000000e+00 : f32
    %18 = vector.broadcast %cst_11 : f32 to vector<8x32xf32>
    %19 = arith.maximumf %17, %18 : vector<8x32xf32>
    %c0_i32_12 = arith.constant 0 : i32
    %20 = tpu.memref_slice %arg10[%c0_i32_12] : memref<2x!tpu.dma_semaphore, #tpu.memory_space<semaphore_mem>> -> memref<1x!tpu.dma_semaphore, #tpu.memory_space<semaphore_mem>>
    %21 = tpu.memref_squeeze %20 : memref<1x!tpu.dma_semaphore, #tpu.memory_space<semaphore_mem>> -> memref<!tpu.dma_semaphore, #tpu.memory_space<semaphore_mem>>
    tpu.wait_dma2 semaphore(%21 : memref<!tpu.dma_semaphore, #tpu.memory_space<semaphore_mem>>) src(%arg5 : memref<32x8568xbf16, #tpu.memory_space<any>>) dst(%arg8 : memref<32x8568xbf16, #tpu.memory_space<vmem>>)
    %c1_i32_13 = arith.constant 1 : i32
    %22 = tpu.memref_slice %arg10[%c1_i32_13] : memref<2x!tpu.dma_semaphore, #tpu.memory_space<semaphore_mem>> -> memref<1x!tpu.dma_semaphore, #tpu.memory_space<semaphore_mem>>
    %23 = tpu.memref_squeeze %22 : memref<1x!tpu.dma_semaphore, #tpu.memory_space<semaphore_mem>> -> memref<!tpu.dma_semaphore, #tpu.memory_space<semaphore_mem>>
    tpu.wait_dma2 semaphore(%23 : memref<!tpu.dma_semaphore, #tpu.memory_space<semaphore_mem>>) src(%arg6 : memref<1x8568xf32, #tpu.memory_space<any>>) dst(%arg9 : memref<1x8568xf32, #tpu.memory_space<vmem>>)
    %24 = arith.truncf %19 : vector<8x32xf32> to vector<8x32xbf16>
    %c0_14 = arith.constant 0 : index
    %c0_15 = arith.constant 0 : index
    %25 = vector.load %arg8[%c0_14, %c0_15] : memref<32x8568xbf16, #tpu.memory_space<vmem>>, vector<32x8568xbf16>
    %cst_16 = arith.constant dense<0.000000e+00> : vector<8x8568xf32>
    %26 = tpu.matmul %24, %25, %cst_16 {dimension_numbers = #tpu.dot_dimension_numbers<[1], [0], [0], [1], [0, 0, 1, 1], [], []>} : vector<8x32xbf16>, vector<32x8568xbf16>, vector<8x8568xf32> -> vector<8x8568xf32>
    %c0_17 = arith.constant 0 : index
    %c0_18 = arith.constant 0 : index
    %27 = vector.load %arg9[%c0_17, %c0_18] : memref<1x8568xf32, #tpu.memory_space<vmem>>, vector<1x8568xf32>
    %28 = vector.broadcast %27 : vector<1x8568xf32> to vector<8x8568xf32>
    %29 = arith.addf %26, %28 : vector<8x8568xf32>
    %cst_19 = arith.constant 0.000000e+00 : f32
    %30 = vector.broadcast %cst_19 : f32 to vector<8x8568xf32>
    %31 = arith.maximumf %29, %30 : vector<8x8568xf32>
    %32 = arith.addf %31, %4 : vector<8x8568xf32>
    %cst_20 = arith.constant dense<0xFF800000> : vector<8xf32>
    %33 = vector.multi_reduction <maximumf>, %32, %cst_20 [1] : vector<8x8568xf32> to vector<8xf32>
    %34 = vector.shape_cast %33 : vector<8xf32> to vector<8x1xf32>
    %35 = vector.broadcast %34 : vector<8x1xf32> to vector<8x8568xf32>
    %36 = arith.subf %32, %35 : vector<8x8568xf32>
    %37 = math.exp %36 : vector<8x8568xf32>
    %cst_21 = arith.constant dense<0.000000e+00> : vector<8xf32>
    %38 = vector.multi_reduction <add>, %37, %cst_21 [1] : vector<8x8568xf32> to vector<8xf32>
    %39 = vector.shape_cast %38 : vector<8xf32> to vector<8x1xf32>
    %40 = tpu.reciprocal %39 {approx = true} : vector<8x1xf32> -> vector<8x1xf32>
    %41 = arith.mulf %39, %40 : vector<8x1xf32>
    %cst_22 = arith.constant 2.000000e+00 : f32
    %42 = vector.broadcast %cst_22 : f32 to vector<8x1xf32>
    %43 = arith.subf %42, %41 : vector<8x1xf32>
    %44 = arith.mulf %40, %43 : vector<8x1xf32>
    %45 = vector.broadcast %44 : vector<8x1xf32> to vector<8x8568xf32>
    %46 = arith.mulf %37, %45 : vector<8x8568xf32>
    %c0_23 = arith.constant 0 : index
    %c0_24 = arith.constant 0 : index
    %47 = vector.load %arg7[%c0_23, %c0_24] : memref<8x8568xf32, #tpu.memory_space<vmem>>, vector<8x8568xf32>
    tpu.vector_store %arg7[%c0_23, %c0_24], %46 {strides = array<i32>} : memref<8x8568xf32, #tpu.memory_space<vmem>>, vector<8x8568xf32>,
    return
  }
}

</mosaic_0001>

<bundles_post_ra>
// kernel: tpu_custom_call.1
= control target key start
LH: loop header
LB: loop body
LE: loop exit
PB: predicated region body
PF: predicated region fallthrough
CT: control target
= control target key end

     0   :  { %12 = vsyncpa [#allocation6], 0  ;;  %s16120_s0 = inlined_call_operand.vmem [shape: f32[8,8568], index: 0, kind: input, shape index: {}]   ;;  %s16121_s1 = inlined_call_operand.vmem [shape: bf16[8568,32], index: 1, kind: input, shape index: {}]   ;;  %s16122_s2 = inlined_call_operand.vmem [shape: f32[1,32], index: 2, kind: input, shape index: {}]   ;;  %s16123_s3 = inlined_call_operand.vmem [shape: f32[32,32], index: 3, kind: input, shape index: {}]   ;;  %s16124_s4 = inlined_call_operand.vmem [shape: f32[1,32], index: 4, kind: input, shape index: {}]   ;;  %s16125_s5 = inlined_call_operand.vmem [shape: bf16[32,8568], index: 5, kind: input, shape index: {}]   ;;  %s16126_s6 = inlined_call_operand.vmem [shape: f32[1,8568], index: 6, kind: input, shape index: {}]   ;;  %s16127_s7 = inlined_call_operand.hbm [shape: f32[8,8568], index: 7, kind: output, shape index: {}]  }
   0x1   :  { %v41_v0 = vld [vmem:[%s16125_s5] sm:$0xf]  ;;  %v43_v1 = vld [vmem:[%s16125_s5 + $0x10c] sm:$0xf]  ;;  %v45_v2 = vld [vmem:[%s16125_s5 + $0x4] sm:$0xf] }
   0x2   :  { %42 = vst [vmem:[#allocation2] sm:$0xf] %v41_v0  ;;  %44 = vst [vmem:[#allocation2 + $0x4] sm:$0xf] %v43_v1  ;;  %v47_v3 = vld [vmem:[%s16125_s5 + $0x110] sm:$0xf] }
   0x3   :  { %v49_v4 = vld [vmem:[%s16125_s5 + $0x8] sm:$0xf]  ;;  %46 = vst [vmem:[#allocation2 + $0x8] sm:$0xf] %v45_v2  ;;  %48 = vst [vmem:[#allocation2 + $0xc] sm:$0xf] %v47_v3 }
   0x4   :  { %50 = vst [vmem:[#allocation2 + $0x10] sm:$0xf] %v49_v4  ;;  %v51_v5 = vld [vmem:[%s16125_s5 + $0x114] sm:$0xf]  ;;  %v53_v6 = vld [vmem:[%s16125_s5 + $0xc] sm:$0xf] }
   0x5   :  { %v55_v7 = vld [vmem:[%s16125_s5 + $0x118] sm:$0xf]  ;;  %52 = vst [vmem:[#allocation2 + $0x14] sm:$0xf] %v51_v5  ;;  %54 = vst [vmem:[#allocation2 + $0x18] sm:$0xf] %v53_v6 }
   0x6   :  { %56 = vst [vmem:[#allocation2 + $0x1c] sm:$0xf] %v55_v7  ;;  %v57_v8 = vld [vmem:[%s16125_s5 + $0x10] sm:$0xf]  ;;  %v59_v9 = vld [vmem:[%s16125_s5 + $0x11c] sm:$0xf] }
   0x7   :  { %v61_v10 = vld [vmem:[%s16125_s5 + $0x14] sm:$0xf]  ;;  %58 = vst [vmem:[#allocation2 + $0x20] sm:$0xf] %v57_v8  ;;  %60 = vst [vmem:[#allocation2 + $0x24] sm:$0xf] %v59_v9 }
   0x8   :  { %62 = vst [vmem:[#allocation2 + $0x28] sm:$0xf] %v61_v10  ;;  %v63_v11 = vld [vmem:[%s16125_s5 + $0x120] sm:$0xf]  ;;  %v65_v12 = vld [vmem:[%s16125_s5 + $0x18] sm:$0xf] }
   0x9   :  { %v67_v13 = vld [vmem:[%s16125_s5 + $0x124] sm:$0xf]  ;;  %64 = vst [vmem:[#allocation2 + $0x2c] sm:$0xf] %v63_v11  ;;  %66 = vst [vmem:[#allocation2 + $0x30] sm:$0xf] %v65_v12 }
   0xa   :  { %68 = vst [vmem:[#allocation2 + $0x34] sm:$0xf] %v67_v13  ;;  %v69_v14 = vld [vmem:[%s16125_s5 + $0x1c] sm:$0xf]  ;;  %v71_v15 = vld [vmem:[%s16125_s5 + $0x128] sm:$0xf] }
   0xb   :  { %v73_v16 = vld [vmem:[%s16125_s5 + $0x20] sm:$0xf]  ;;  %70 = vst [vmem:[#allocation2 + $0x38] sm:$0xf] %v69_v14  ;;  %72 = vst [vmem:[#allocation2 + $0x3c] sm:$0xf] %v71_v15 }
   0xc   :  { %74 = vst [vmem:[#allocation2 + $0x40] sm:$0xf] %v73_v16  ;;  %v75_v17 = vld [vmem:[%s16125_s5 + $0x12c] sm:$0xf]  ;;  %v77_v18 = vld [vmem:[%s16125_s5 + $0x24] sm:$0xf] }
   0xd   :  { %v79_v19 = vld [vmem:[%s16125_s5 + $0x130] sm:$0xf]  ;;  %76 = vst [vmem:[#allocation2 + $0x44] sm:$0xf] %v75_v17  ;;  %78 = vst [vmem:[#allocation2 + $0x48] sm:$0xf] %v77_v18 }
   0xe   :  { %80 = vst [vmem:[#allocation2 + $0x4c] sm:$0xf] %v79_v19  ;;  %v81_v20 = vld [vmem:[%s16125_s5 + $0x28] sm:$0xf]  ;;  %v83_v21 = vld [vmem:[%s16125_s5 + $0x134] sm:$0xf] }
   0xf   :  { %v85_v22 = vld [vmem:[%s16125_s5 + $0x2c] sm:$0xf]  ;;  %82 = vst [vmem:[#allocation2 + $0x50] sm:$0xf] %v81_v20  ;;  %84 = vst [vmem:[#allocation2 + $0x54] sm:$0xf] %v83_v21 }
  0x10   :  { %86 = vst [vmem:[#allocation2 + $0x58] sm:$0xf] %v85_v22  ;;  %v87_v23 = vld [vmem:[%s16125_s5 + $0x138] sm:$0xf]  ;;  %v89_v24 = vld [vmem:[%s16125_s5 + $0x30] sm:$0xf] }
  0x11   :  { %v91_v25 = vld [vmem:[%s16125_s5 + $0x13c] sm:$0xf]  ;;  %88 = vst [vmem:[#allocation2 + $0x5c] sm:$0xf] %v87_v23  ;;  %90 = vst [vmem:[#allocation2 + $0x60] sm:$0xf] %v89_v24 }
  0x12   :  { %92 = vst [vmem:[#allocation2 + $0x64] sm:$0xf] %v91_v25  ;;  %v93_v26 = vld [vmem:[%s16125_s5 + $0x34] sm:$0xf]  ;;  %v95_v27 = vld [vmem:[%s16125_s5 + $0x140] sm:$0xf] }
  0x13   :  { %v97_v28 = vld [vmem:[%s16125_s5 + $0x38] sm:$0xf]  ;;  %94 = vst [vmem:[#allocation2 + $0x68] sm:$0xf] %v93_v26  ;;  %96 = vst [vmem:[#allocation2 + $0x6c] sm:$0xf] %v95_v27 }
  0x14   :  { %98 = vst [vmem:[#allocation2 + $0x70] sm:$0xf] %v97_v28  ;;  %v99_v29 = vld [vmem:[%s16125_s5 + $0x144] sm:$0xf]  ;;  %v101_v30 = vld [vmem:[%s16125_s5 + $0x3c] sm:$0xf] }
  0x15   :  { %v103_v31 = vld [vmem:[%s16125_s5 + $0x148] sm:$0xf]  ;;  %100 = vst [vmem:[#allocation2 + $0x74] sm:$0xf] %v99_v29  ;;  %102 = vst [vmem:[#allocation2 + $0x78] sm:$0xf] %v101_v30 }
  0x16   :  { %104 = vst [vmem:[#allocation2 + $0x7c] sm:$0xf] %v103_v31  ;;  %v105_v32 = vld [vmem:[%s16125_s5 + $0x40] sm:$0xf]  ;;  %v107_v33 = vld [vmem:[%s16125_s5 + $0x14c] sm:$0xf] }
  0x17   :  { %v109_v34 = vld [vmem:[%s16125_s5 + $0x44] sm:$0xf]  ;;  %106 = vst [vmem:[#allocation2 + $0x80] sm:$0xf] %v105_v32  ;;  %108 = vst [vmem:[#allocation2 + $0x84] sm:$0xf] %v107_v33 }
  0x18   :  { %110 = vst [vmem:[#allocation2 + $0x88] sm:$0xf] %v109_v34  ;;  %v111_v35 = vld [vmem:[%s16125_s5 + $0x150] sm:$0xf]  ;;  %v113_v36 = vld [vmem:[%s16125_s5 + $0x48] sm:$0xf] }
  0x19   :  { %v115_v37 = vld [vmem:[%s16125_s5 + $0x154] sm:$0xf]  ;;  %112 = vst [vmem:[#allocation2 + $0x8c] sm:$0xf] %v111_v35  ;;  %114 = vst [vmem:[#allocation2 + $0x90] sm:$0xf] %v113_v36 }
  0x1a   :  { %116 = vst [vmem:[#allocation2 + $0x94] sm:$0xf] %v115_v37  ;;  %v117_v38 = vld [vmem:[%s16125_s5 + $0x4c] sm:$0xf]  ;;  %v119_v39 = vld [vmem:[%s16125_s5 + $0x158] sm:$0xf] }
  0x1b   :  { %v121_v40 = vld [vmem:[%s16125_s5 + $0x50] sm:$0xf]  ;;  %118 = vst [vmem:[#allocation2 + $0x98] sm:$0xf] %v117_v38  ;;  %120 = vst [vmem:[#allocation2 + $0x9c] sm:$0xf] %v119_v39 }
  0x1c   :  { %122 = vst [vmem:[#allocation2 + $0xa0] sm:$0xf] %v121_v40  ;;  %v123_v41 = vld [vmem:[%s16125_s5 + $0x15c] sm:$0xf]  ;;  %v125_v42 = vld [vmem:[%s16125_s5 + $0x54] sm:$0xf] }
  0x1d   :  { %v127_v43 = vld [vmem:[%s16125_s5 + $0x160] sm:$0xf]  ;;  %124 = vst [vmem:[#allocation2 + $0xa4] sm:$0xf] %v123_v41  ;;  %126 = vst [vmem:[#allocation2 + $0xa8] sm:$0xf] %v125_v42 }
  0x1e   :  { %128 = vst [vmem:[#allocation2 + $0xac] sm:$0xf] %v127_v43  ;;  %v129_v44 = vld [vmem:[%s16125_s5 + $0x58] sm:$0xf]  ;;  %v131_v45 = vld [vmem:[%s16125_s5 + $0x164] sm:$0xf] }
  0x1f   :  { %v133_v46 = vld [vmem:[%s16125_s5 + $0x5c] sm:$0xf]  ;;  %130 = vst [vmem:[#allocation2 + $0xb0] sm:$0xf] %v129_v44  ;;  %132 = vst [vmem:[#allocation2 + $0xb4] sm:$0xf] %v131_v45 }
  0x20   :  { %134 = vst [vmem:[#allocation2 + $0xb8] sm:$0xf] %v133_v46  ;;  %v135_v47 = vld [vmem:[%s16125_s5 + $0x168] sm:$0xf]  ;;  %v137_v48 = vld [vmem:[%s16125_s5 + $0x60] sm:$0xf] }
  0x21   :  { %v139_v49 = vld [vmem:[%s16125_s5 + $0x16c] sm:$0xf]  ;;  %136 = vst [vmem:[#allocation2 + $0xbc] sm:$0xf] %v135_v47  ;;  %138 = vst [vmem:[#allocation2 + $0xc0] sm:$0xf] %v137_v48 }
  0x22   :  { %140 = vst [vmem:[#allocation2 + $0xc4] sm:$0xf] %v139_v49  ;;  %v141_v50 = vld [vmem:[%s16125_s5 + $0x64] sm:$0xf]  ;;  %v143_v51 = vld [vmem:[%s16125_s5 + $0x170] sm:$0xf] }
  0x23   :  { %v145_v52 = vld [vmem:[%s16125_s5 + $0x68] sm:$0xf]  ;;  %142 = vst [vmem:[#allocation2 + $0xc8] sm:$0xf] %v141_v50  ;;  %144 = vst [vmem:[#allocation2 + $0xcc] sm:$0xf] %v143_v51 }
  0x24   :  { %146 = vst [vmem:[#allocation2 + $0xd0] sm:$0xf] %v145_v52  ;;  %v147_v53 = vld [vmem:[%s16125_s5 + $0x174] sm:$0xf]  ;;  %v149_v54 = vld [vmem:[%s16125_s5 + $0x6c] sm:$0xf] }
  0x25   :  { %v151_v55 = vld [vmem:[%s16125_s5 + $0x178] sm:$0xf]  ;;  %148 = vst [vmem:[#allocation2 + $0xd4] sm:$0xf] %v147_v53  ;;  %150 = vst [vmem:[#allocation2 + $0xd8] sm:$0xf] %v149_v54 }
  0x26   :  { %152 = vst [vmem:[#allocation2 + $0xdc] sm:$0xf] %v151_v55  ;;  %v153_v56 = vld [vmem:[%s16125_s5 + $0x70] sm:$0xf]  ;;  %v155_v57 = vld [vmem:[%s16125_s5 + $0x17c] sm:$0xf] }
  0x27   :  { %v157_v58 = vld [vmem:[%s16125_s5 + $0x74] sm:$0xf]  ;;  %154 = vst [vmem:[#allocation2 + $0xe0] sm:$0xf] %v153_v56  ;;  %156 = vst [vmem:[#allocation2 + $0xe4] sm:$0xf] %v155_v57 }
  0x28   :  { %158 = vst [vmem:[#allocation2 + $0xe8] sm:$0xf] %v157_v58  ;;  %v159_v59 = vld [vmem:[%s16125_s5 + $0x180] sm:$0xf]  ;;  %v161_v60 = vld [vmem:[%s16125_s5 + $0x78] sm:$0xf] }
  0x29   :  { %v163_v61 = vld [vmem:[%s16125_s5 + $0x184] sm:$0xf]  ;;  %160 = vst [vmem:[#allocation2 + $0xec] sm:$0xf] %v159_v59  ;;  %162 = vst [vmem:[#allocation2 + $0xf0] sm:$0xf] %v161_v60 }
  0x2a   :  { %164 = vst [vmem:[#allocation2 + $0xf4] sm:$0xf] %v163_v61  ;;  %v165_v62 = vld [vmem:[%s16125_s5 + $0x7c] sm:$0xf]  ;;  %v167_v63 = vld [vmem:[%s16125_s5 + $0x188] sm:$0xf] }
  0x2b   :  { %v169_v0 = vld [vmem:[%s16125_s5 + $0x80] sm:$0xf]  ;;  %166 = vst [vmem:[#allocation2 + $0xf8] sm:$0xf] %v165_v62  ;;  %168 = vst [vmem:[#allocation2 + $0xfc] sm:$0xf] %v167_v63 }
  0x2c   :  { %170 = vst [vmem:[#allocation2 + $0x100] sm:$0xf] %v169_v0  ;;  %v171_v1 = vld [vmem:[%s16125_s5 + $0x18c] sm:$0xf]  ;;  %v173_v2 = vld [vmem:[%s16125_s5 + $0x84] sm:$0xf] }
  0x2d   :  { %v175_v3 = vld [vmem:[%s16125_s5 + $0x190] sm:$0xf]  ;;  %172 = vst [vmem:[#allocation2 + $0x104] sm:$0xf] %v171_v1  ;;  %174 = vst [vmem:[#allocation2 + $0x108] sm:$0xf] %v173_v2 }
  0x2e   :  { %176 = vst [vmem:[#allocation2 + $0x10c] sm:$0xf] %v175_v3  ;;  %v177_v4 = vld [vmem:[%s16125_s5 + $0x88] sm:$0xf]  ;;  %v179_v5 = vld [vmem:[%s16125_s5 + $0x194] sm:$0xf] }
  0x2f   :  { %v181_v6 = vld [vmem:[%s16125_s5 + $0x8c] sm:$0xf]  ;;  %178 = vst [vmem:[#allocation2 + $0x110] sm:$0xf] %v177_v4  ;;  %180 = vst [vmem:[#allocation2 + $0x114] sm:$0xf] %v179_v5 }
  0x30   :  { %182 = vst [vmem:[#allocation2 + $0x118] sm:$0xf] %v181_v6  ;;  %v183_v7 = vld [vmem:[%s16125_s5 + $0x198] sm:$0xf]  ;;  %v185_v8 = vld [vmem:[%s16125_s5 + $0x90] sm:$0xf] }
  0x31   :  { %v187_v9 = vld [vmem:[%s16125_s5 + $0x19c] sm:$0xf]  ;;  %184 = vst [vmem:[#allocation2 + $0x11c] sm:$0xf] %v183_v7  ;;  %186 = vst [vmem:[#allocation2 + $0x120] sm:$0xf] %v185_v8 }
  0x32   :  { %188 = vst [vmem:[#allocation2 + $0x124] sm:$0xf] %v187_v9  ;;  %v189_v10 = vld [vmem:[%s16125_s5 + $0x94] sm:$0xf]  ;;  %v191_v11 = vld [vmem:[%s16125_s5 + $0x1a0] sm:$0xf] }
  0x33   :  { %v193_v12 = vld [vmem:[%s16125_s5 + $0x98] sm:$0xf]  ;;  %190 = vst [vmem:[#allocation2 + $0x128] sm:$0xf] %v189_v10  ;;  %192 = vst [vmem:[#allocation2 + $0x12c] sm:$0xf] %v191_v11 }
  0x34   :  { %194 = vst [vmem:[#allocation2 + $0x130] sm:$0xf] %v193_v12  ;;  %v195_v13 = vld [vmem:[%s16125_s5 + $0x1a4] sm:$0xf]  ;;  %v197_v14 = vld [vmem:[%s16125_s5 + $0x9c] sm:$0xf] }
  0x35   :  { %v199_v15 = vld [vmem:[%s16125_s5 + $0x1a8] sm:$0xf]  ;;  %196 = vst [vmem:[#allocation2 + $0x134] sm:$0xf] %v195_v13  ;;  %198 = vst [vmem:[#allocation2 + $0x138] sm:$0xf] %v197_v14 }
  0x36   :  { %200 = vst [vmem:[#allocation2 + $0x13c] sm:$0xf] %v199_v15  ;;  %v201_v16 = vld [vmem:[%s16125_s5 + $0xa0] sm:$0xf]  ;;  %v203_v17 = vld [vmem:[%s16125_s5 + $0x1ac] sm:$0xf] }
  0x37   :  { %v205_v18 = vld [vmem:[%s16125_s5 + $0xa4] sm:$0xf]  ;;  %202 = vst [vmem:[#allocation2 + $0x140] sm:$0xf] %v201_v16  ;;  %204 = vst [vmem:[#allocation2 + $0x144] sm:$0xf] %v203_v17 }
  0x38   :  { %206 = vst [vmem:[#allocation2 + $0x148] sm:$0xf] %v205_v18  ;;  %v207_v19 = vld [vmem:[%s16125_s5 + $0x1b0] sm:$0xf]  ;;  %v209_v20 = vld [vmem:[%s16125_s5 + $0xa8] sm:$0xf] }
  0x39   :  { %v211_v21 = vld [vmem:[%s16125_s5 + $0x1b4] sm:$0xf]  ;;  %208 = vst [vmem:[#allocation2 + $0x14c] sm:$0xf] %v207_v19  ;;  %210 = vst [vmem:[#allocation2 + $0x150] sm:$0xf] %v209_v20 }
  0x3a   :  { %212 = vst [vmem:[#allocation2 + $0x154] sm:$0xf] %v211_v21  ;;  %v213_v22 = vld [vmem:[%s16125_s5 + $0xac] sm:$0xf]  ;;  %v215_v23 = vld [vmem:[%s16125_s5 + $0x1b8] sm:$0xf] }
  0x3b   :  { %v217_v24 = vld [vmem:[%s16125_s5 + $0xb0] sm:$0xf]  ;;  %214 = vst [vmem:[#allocation2 + $0x158] sm:$0xf] %v213_v22  ;;  %216 = vst [vmem:[#allocation2 + $0x15c] sm:$0xf] %v215_v23 }
  0x3c   :  { %218 = vst [vmem:[#allocation2 + $0x160] sm:$0xf] %v217_v24  ;;  %v219_v25 = vld [vmem:[%s16125_s5 + $0x1bc] sm:$0xf]  ;;  %v221_v26 = vld [vmem:[%s16125_s5 + $0xb4] sm:$0xf] }
  0x3d   :  { %v223_v27 = vld [vmem:[%s16125_s5 + $0x1c0] sm:$0xf]  ;;  %220 = vst [vmem:[#allocation2 + $0x164] sm:$0xf] %v219_v25  ;;  %222 = vst [vmem:[#allocation2 + $0x168] sm:$0xf] %v221_v26 }
  0x3e   :  { %224 = vst [vmem:[#allocation2 + $0x16c] sm:$0xf] %v223_v27  ;;  %v225_v28 = vld [vmem:[%s16125_s5 + $0xb8] sm:$0xf]  ;;  %v227_v29 = vld [vmem:[%s16125_s5 + $0x1c4] sm:$0xf] }
  0x3f   :  { %v229_v30 = vld [vmem:[%s16125_s5 + $0xbc] sm:$0xf]  ;;  %226 = vst [vmem:[#allocation2 + $0x170] sm:$0xf] %v225_v28  ;;  %228 = vst [vmem:[#allocation2 + $0x174] sm:$0xf] %v227_v29 }
  0x40   :  { %230 = vst [vmem:[#allocation2 + $0x178] sm:$0xf] %v229_v30  ;;  %v231_v31 = vld [vmem:[%s16125_s5 + $0x1c8] sm:$0xf]  ;;  %v233_v32 = vld [vmem:[%s16125_s5 + $0xc0] sm:$0xf] }
  0x41   :  { %v235_v33 = vld [vmem:[%s16125_s5 + $0x1cc] sm:$0xf]  ;;  %232 = vst [vmem:[#allocation2 + $0x17c] sm:$0xf] %v231_v31  ;;  %234 = vst [vmem:[#allocation2 + $0x180] sm:$0xf] %v233_v32 }
  0x42   :  { %236 = vst [vmem:[#allocation2 + $0x184] sm:$0xf] %v235_v33  ;;  %v237_v34 = vld [vmem:[%s16125_s5 + $0xc4] sm:$0xf]  ;;  %v239_v35 = vld [vmem:[%s16125_s5 + $0x1d0] sm:$0xf] }
  0x43   :  { %v241_v36 = vld [vmem:[%s16125_s5 + $0xc8] sm:$0xf]  ;;  %238 = vst [vmem:[#allocation2 + $0x188] sm:$0xf] %v237_v34  ;;  %240 = vst [vmem:[#allocation2 + $0x18c] sm:$0xf] %v239_v35 }
  0x44   :  { %242 = vst [vmem:[#allocation2 + $0x190] sm:$0xf] %v241_v36  ;;  %v243_v37 = vld [vmem:[%s16125_s5 + $0x1d4] sm:$0xf]  ;;  %v245_v38 = vld [vmem:[%s16125_s5 + $0xcc] sm:$0xf] }
  0x45   :  { %v247_v39 = vld [vmem:[%s16125_s5 + $0x1d8] sm:$0xf]  ;;  %244 = vst [vmem:[#allocation2 + $0x194] sm:$0xf] %v243_v37  ;;  %246 = vst [vmem:[#allocation2 + $0x198] sm:$0xf] %v245_v38 }
  0x46   :  { %248 = vst [vmem:[#allocation2 + $0x19c] sm:$0xf] %v247_v39  ;;  %v249_v40 = vld [vmem:[%s16125_s5 + $0xd0] sm:$0xf]  ;;  %v251_v41 = vld [vmem:[%s16125_s5 + $0x1dc] sm:$0xf] }
  0x47   :  { %v253_v42 = vld [vmem:[%s16125_s5 + $0xd4] sm:$0xf]  ;;  %250 = vst [vmem:[#allocation2 + $0x1a0] sm:$0xf] %v249_v40  ;;  %252 = vst [vmem:[#allocation2 + $0x1a4] sm:$0xf] %v251_v41 }
  0x48   :  { %254 = vst [vmem:[#allocation2 + $0x1a8] sm:$0xf] %v253_v42  ;;  %v255_v43 = vld [vmem:[%s16125_s5 + $0x1e0] sm:$0xf]  ;;  %v257_v44 = vld [vmem:[%s16125_s5 + $0xd8] sm:$0xf] }
  0x49   :  { %v259_v45 = vld [vmem:[%s16125_s5 + $0x1e4] sm:$0xf]  ;;  %256 = vst [vmem:[#allocation2 + $0x1ac] sm:$0xf] %v255_v43  ;;  %258 = vst [vmem:[#allocation2 + $0x1b0] sm:$0xf] %v257_v44 }
  0x4a   :  { %260 = vst [vmem:[#allocation2 + $0x1b4] sm:$0xf] %v259_v45  ;;  %v261_v46 = vld [vmem:[%s16125_s5 + $0xdc] sm:$0xf]  ;;  %v263_v47 = vld [vmem:[%s16125_s5 + $0x1e8] sm:$0xf] }
  0x4b   :  { %v265_v48 = vld [vmem:[%s16125_s5 + $0xe0] sm:$0xf]  ;;  %262 = vst [vmem:[#allocation2 + $0x1b8] sm:$0xf] %v261_v46  ;;  %264 = vst [vmem:[#allocation2 + $0x1bc] sm:$0xf] %v263_v47 }
  0x4c   :  { %266 = vst [vmem:[#allocation2 + $0x1c0] sm:$0xf] %v265_v48  ;;  %v267_v49 = vld [vmem:[%s16125_s5 + $0x1ec] sm:$0xf]  ;;  %v269_v50 = vld [vmem:[%s16125_s5 + $0xe4] sm:$0xf] }
  0x4d   :  { %v271_v51 = vld [vmem:[%s16125_s5 + $0x1f0] sm:$0xf]  ;;  %268 = vst [vmem:[#allocation2 + $0x1c4] sm:$0xf] %v267_v49  ;;  %270 = vst [vmem:[#allocation2 + $0x1c8] sm:$0xf] %v269_v50 }
  0x4e   :  { %272 = vst [vmem:[#allocation2 + $0x1cc] sm:$0xf] %v271_v51  ;;  %v273_v52 = vld [vmem:[%s16125_s5 + $0xe8] sm:$0xf]  ;;  %v275_v53 = vld [vmem:[%s16125_s5 + $0x1f4] sm:$0xf] }
  0x4f   :  { %v277_v54 = vld [vmem:[%s16125_s5 + $0xec] sm:$0xf]  ;;  %274 = vst [vmem:[#allocation2 + $0x1d0] sm:$0xf] %v273_v52  ;;  %276 = vst [vmem:[#allocation2 + $0x1d4] sm:$0xf] %v275_v53 }
  0x50   :  { %278 = vst [vmem:[#allocation2 + $0x1d8] sm:$0xf] %v277_v54  ;;  %v279_v55 = vld [vmem:[%s16125_s5 + $0x1f8] sm:$0xf]  ;;  %v281_v56 = vld [vmem:[%s16125_s5 + $0xf0] sm:$0xf] }
  0x51   :  { %v283_v57 = vld [vmem:[%s16125_s5 + $0x1fc] sm:$0xf]  ;;  %280 = vst [vmem:[#allocation2 + $0x1dc] sm:$0xf] %v279_v55  ;;  %282 = vst [vmem:[#allocation2 + $0x1e0] sm:$0xf] %v281_v56 }
  0x52   :  { %284 = vst [vmem:[#allocation2 + $0x1e4] sm:$0xf] %v283_v57  ;;  %v285_v58 = vld [vmem:[%s16125_s5 + $0xf4] sm:$0xf]  ;;  %v287_v59 = vld [vmem:[%s16125_s5 + $0x200] sm:$0xf] }
  0x53   :  { %v289_v60 = vld [vmem:[%s16125_s5 + $0xf8] sm:$0xf]  ;;  %286 = vst [vmem:[#allocation2 + $0x1e8] sm:$0xf] %v285_v58  ;;  %288 = vst [vmem:[#allocation2 + $0x1ec] sm:$0xf] %v287_v59 }
  0x54   :  { %290 = vst [vmem:[#allocation2 + $0x1f0] sm:$0xf] %v289_v60  ;;  %v291_v61 = vld [vmem:[%s16125_s5 + $0x204] sm:$0xf]  ;;  %v293_v62 = vld [vmem:[%s16125_s5 + $0xfc] sm:$0xf] }
  0x55   :  { %v295_v63 = vld [vmem:[%s16125_s5 + $0x208] sm:$0xf]  ;;  %292 = vst [vmem:[#allocation2 + $0x1f4] sm:$0xf] %v291_v61  ;;  %294 = vst [vmem:[#allocation2 + $0x1f8] sm:$0xf] %v293_v62 }
  0x56   :  { %296 = vst [vmem:[#allocation2 + $0x1fc] sm:$0xf] %v295_v63  ;;  %v297_v0 = vld [vmem:[%s16125_s5 + $0x100] sm:$0xf]  ;;  %v299_v1 = vld [vmem:[%s16125_s5 + $0x20c] sm:$0xf] }
  0x57   :  { %v301_v2 = vld [vmem:[%s16125_s5 + $0x104] sm:$0xf]  ;;  %298 = vst [vmem:[#allocation2 + $0x200] sm:$0xf] %v297_v0  ;;  %300 = vst [vmem:[#allocation2 + $0x204] sm:$0xf] %v299_v1 }
  0x58   :  { %302 = vst [vmem:[#allocation2 + $0x208] sm:$0xf] %v301_v2  ;;  %v303_v3 = vld [vmem:[%s16125_s5 + $0x210] sm:$0xf]  ;;  %v305_v4 = vld [vmem:[%s16125_s5 + $0x108] sm:$0xf] }
  0x59   :  { %v307_v5 = vld [vmem:[%s16125_s5 + $0x214] sm:$0xff]   ;;  %304 = vst [vmem:[#allocation2 + $0x20c] sm:$0xf] %v303_v3  ;;  %306 = vst [vmem:[#allocation2 + $0x210] sm:$0xf] %v305_v4 }
  0x5a   :  { %308 = vst [vmem:[#allocation2 + $0x214] sm:$0xff] %v307_v5   ;;  %v311_v6 = vld [vmem:[%s16125_s5 + $0x324] sm:$0xf]  ;;  %v313_v7 = vld [vmem:[%s16125_s5 + $0x21c] sm:$0xf] }
  0x5b   :  { %v315_v8 = vld [vmem:[%s16125_s5 + $0x328] sm:$0xf]  ;;  %312 = vst [vmem:[#allocation2 + $0x21c] sm:$0xf] %v311_v6  ;;  %314 = vst [vmem:[#allocation2 + $0x220] sm:$0xf] %v313_v7 }
  0x5c   :  { %316 = vst [vmem:[#allocation2 + $0x224] sm:$0xf] %v315_v8  ;;  %v317_v9 = vld [vmem:[%s16125_s5 + $0x220] sm:$0xf]  ;;  %v319_v10 = vld [vmem:[%s16125_s5 + $0x32c] sm:$0xf] }
  0x5d   :  { %v321_v11 = vld [vmem:[%s16125_s5 + $0x224] sm:$0xf]  ;;  %318 = vst [vmem:[#allocation2 + $0x228] sm:$0xf] %v317_v9  ;;  %320 = vst [vmem:[#allocation2 + $0x22c] sm:$0xf] %v319_v10 }
  0x5e   :  { %322 = vst [vmem:[#allocation2 + $0x230] sm:$0xf] %v321_v11  ;;  %v323_v12 = vld [vmem:[%s16125_s5 + $0x330] sm:$0xf]  ;;  %v325_v13 = vld [vmem:[%s16125_s5 + $0x228] sm:$0xf] }
  0x5f   :  { %v327_v14 = vld [vmem:[%s16125_s5 + $0x334] sm:$0xf]  ;;  %324 = vst [vmem:[#allocation2 + $0x234] sm:$0xf] %v323_v12  ;;  %326 = vst [vmem:[#allocation2 + $0x238] sm:$0xf] %v325_v13 }
  0x60   :  { %328 = vst [vmem:[#allocation2 + $0x23c] sm:$0xf] %v327_v14  ;;  %v329_v15 = vld [vmem:[%s16125_s5 + $0x22c] sm:$0xf]  ;;  %v331_v16 = vld [vmem:[%s16125_s5 + $0x338] sm:$0xf] }
  0x61   :  { %v333_v17 = vld [vmem:[%s16125_s5 + $0x230] sm:$0xf]  ;;  %330 = vst [vmem:[#allocation2 + $0x240] sm:$0xf] %v329_v15  ;;  %332 = vst [vmem:[#allocation2 + $0x244] sm:$0xf] %v331_v16 }
  0x62   :  { %334 = vst [vmem:[#allocation2 + $0x248] sm:$0xf] %v333_v17  ;;  %v335_v18 = vld [vmem:[%s16125_s5 + $0x33c] sm:$0xf]  ;;  %v337_v19 = vld [vmem:[%s16125_s5 + $0x234] sm:$0xf] }
  0x63   :  { %v339_v20 = vld [vmem:[%s16125_s5 + $0x340] sm:$0xf]  ;;  %336 = vst [vmem:[#allocation2 + $0x24c] sm:$0xf] %v335_v18  ;;  %338 = vst [vmem:[#allocation2 + $0x250] sm:$0xf] %v337_v19 }
  0x64   :  { %340 = vst [vmem:[#allocation2 + $0x254] sm:$0xf] %v339_v20  ;;  %v341_v21 = vld [vmem:[%s16125_s5 + $0x238] sm:$0xf]  ;;  %v343_v22 = vld [vmem:[%s16125_s5 + $0x344] sm:$0xf] }
  0x65   :  { %v345_v23 = vld [vmem:[%s16125_s5 + $0x23c] sm:$0xf]  ;;  %342 = vst [vmem:[#allocation2 + $0x258] sm:$0xf] %v341_v21  ;;  %344 = vst [vmem:[#allocation2 + $0x25c] sm:$0xf] %v343_v22 }
  0x66   :  { %346 = vst [vmem:[#allocation2 + $0x260] sm:$0xf] %v345_v23  ;;  %v347_v24 = vld [vmem:[%s16125_s5 + $0x348] sm:$0xf]  ;;  %v349_v25 = vld [vmem:[%s16125_s5 + $0x240] sm:$0xf] }
  0x67   :  { %v351_v26 = vld [vmem:[%s16125_s5 + $0x34c] sm:$0xf]  ;;  %348 = vst [vmem:[#allocation2 + $0x264] sm:$0xf] %v347_v24  ;;  %350 = vst [vmem:[#allocation2 + $0x268] sm:$0xf] %v349_v25 }
  0x68   :  { %352 = vst [vmem:[#allocation2 + $0x26c] sm:$0xf] %v351_v26  ;;  %v353_v27 = vld [vmem:[%s16125_s5 + $0x244] sm:$0xf]  ;;  %v355_v28 = vld [vmem:[%s16125_s5 + $0x350] sm:$0xf] }
  0x69   :  { %v357_v29 = vld [vmem:[%s16125_s5 + $0x248] sm:$0xf]  ;;  %354 = vst [vmem:[#allocation2 + $0x270] sm:$0xf] %v353_v27  ;;  %356 = vst [vmem:[#allocation2 + $0x274] sm:$0xf] %v355_v28 }
  0x6a   :  { %358 = vst [vmem:[#allocation2 + $0x278] sm:$0xf] %v357_v29  ;;  %v359_v30 = vld [vmem:[%s16125_s5 + $0x354] sm:$0xf]  ;;  %v361_v31 = vld [vmem:[%s16125_s5 + $0x24c] sm:$0xf] }
  0x6b   :  { %v363_v32 = vld [vmem:[%s16125_s5 + $0x358] sm:$0xf]  ;;  %360 = vst [vmem:[#allocation2 + $0x27c] sm:$0xf] %v359_v30  ;;  %362 = vst [vmem:[#allocation2 + $0x280] sm:$0xf] %v361_v31 }
  0x6c   :  { %364 = vst [vmem:[#allocation2 + $0x284] sm:$0xf] %v363_v32  ;;  %v365_v33 = vld [vmem:[%s16125_s5 + $0x250] sm:$0xf]  ;;  %v367_v34 = vld [vmem:[%s16125_s5 + $0x35c] sm:$0xf] }
  0x6d   :  { %v369_v35 = vld [vmem:[%s16125_s5 + $0x254] sm:$0xf]  ;;  %366 = vst [vmem:[#allocation2 + $0x288] sm:$0xf] %v365_v33  ;;  %368 = vst [vmem:[#allocation2 + $0x28c] sm:$0xf] %v367_v34 }
  0x6e   :  { %370 = vst [vmem:[#allocation2 + $0x290] sm:$0xf] %v369_v35  ;;  %v371_v36 = vld [vmem:[%s16125_s5 + $0x360] sm:$0xf]  ;;  %v373_v37 = vld [vmem:[%s16125_s5 + $0x258] sm:$0xf] }
  0x6f   :  { %v375_v38 = vld [vmem:[%s16125_s5 + $0x364] sm:$0xf]  ;;  %372 = vst [vmem:[#allocation2 + $0x294] sm:$0xf] %v371_v36  ;;  %374 = vst [vmem:[#allocation2 + $0x298] sm:$0xf] %v373_v37 }
  0x70   :  { %376 = vst [vmem:[#allocation2 + $0x29c] sm:$0xf] %v375_v38  ;;  %v377_v39 = vld [vmem:[%s16125_s5 + $0x25c] sm:$0xf]  ;;  %v379_v40 = vld [vmem:[%s16125_s5 + $0x368] sm:$0xf] }
  0x71   :  { %v381_v41 = vld [vmem:[%s16125_s5 + $0x260] sm:$0xf]  ;;  %378 = vst [vmem:[#allocation2 + $0x2a0] sm:$0xf] %v377_v39  ;;  %380 = vst [vmem:[#allocation2 + $0x2a4] sm:$0xf] %v379_v40 }
  0x72   :  { %382 = vst [vmem:[#allocation2 + $0x2a8] sm:$0xf] %v381_v41  ;;  %v383_v42 = vld [vmem:[%s16125_s5 + $0x36c] sm:$0xf]  ;;  %v385_v43 = vld [vmem:[%s16125_s5 + $0x264] sm:$0xf] }
  0x73   :  { %v387_v44 = vld [vmem:[%s16125_s5 + $0x370] sm:$0xf]  ;;  %384 = vst [vmem:[#allocation2 + $0x2ac] sm:$0xf] %v383_v42  ;;  %386 = vst [vmem:[#allocation2 + $0x2b0] sm:$0xf] %v385_v43 }
  0x74   :  { %388 = vst [vmem:[#allocation2 + $0x2b4] sm:$0xf] %v387_v44  ;;  %v389_v45 = vld [vmem:[%s16125_s5 + $0x268] sm:$0xf]  ;;  %v391_v46 = vld [vmem:[%s16125_s5 + $0x374] sm:$0xf] }
  0x75   :  { %v393_v47 = vld [vmem:[%s16125_s5 + $0x26c] sm:$0xf]  ;;  %390 = vst [vmem:[#allocation2 + $0x2b8] sm:$0xf] %v389_v45  ;;  %392 = vst [vmem:[#allocation2 + $0x2bc] sm:$0xf] %v391_v46 }
  0x76   :  { %394 = vst [vmem:[#allocation2 + $0x2c0] sm:$0xf] %v393_v47  ;;  %v395_v48 = vld [vmem:[%s16125_s5 + $0x378] sm:$0xf]  ;;  %v397_v49 = vld [vmem:[%s16125_s5 + $0x270] sm:$0xf] }
  0x77   :  { %v399_v50 = vld [vmem:[%s16125_s5 + $0x37c] sm:$0xf]  ;;  %396 = vst [vmem:[#allocation2 + $0x2c4] sm:$0xf] %v395_v48  ;;  %398 = vst [vmem:[#allocation2 + $0x2c8] sm:$0xf] %v397_v49 }
  0x78   :  { %400 = vst [vmem:[#allocation2 + $0x2cc] sm:$0xf] %v399_v50  ;;  %v401_v51 = vld [vmem:[%s16125_s5 + $0x274] sm:$0xf]  ;;  %v403_v52 = vld [vmem:[%s16125_s5 + $0x380] sm:$0xf] }
  0x79   :  { %v405_v53 = vld [vmem:[%s16125_s5 + $0x278] sm:$0xf]  ;;  %402 = vst [vmem:[#allocation2 + $0x2d0] sm:$0xf] %v401_v51  ;;  %404 = vst [vmem:[#allocation2 + $0x2d4] sm:$0xf] %v403_v52 }
  0x7a   :  { %406 = vst [vmem:[#allocation2 + $0x2d8] sm:$0xf] %v405_v53  ;;  %v407_v54 = vld [vmem:[%s16125_s5 + $0x384] sm:$0xf]  ;;  %v409_v55 = vld [vmem:[%s16125_s5 + $0x27c] sm:$0xf] }
  0x7b   :  { %v411_v56 = vld [vmem:[%s16125_s5 + $0x388] sm:$0xf]  ;;  %408 = vst [vmem:[#allocation2 + $0x2dc] sm:$0xf] %v407_v54  ;;  %410 = vst [vmem:[#allocation2 + $0x2e0] sm:$0xf] %v409_v55 }
  0x7c   :  { %412 = vst [vmem:[#allocation2 + $0x2e4] sm:$0xf] %v411_v56  ;;  %v413_v57 = vld [vmem:[%s16125_s5 + $0x280] sm:$0xf]  ;;  %v415_v58 = vld [vmem:[%s16125_s5 + $0x38c] sm:$0xf] }
  0x7d   :  { %v417_v59 = vld [vmem:[%s16125_s5 + $0x284] sm:$0xf]  ;;  %414 = vst [vmem:[#allocation2 + $0x2e8] sm:$0xf] %v413_v57  ;;  %416 = vst [vmem:[#allocation2 + $0x2ec] sm:$0xf] %v415_v58 }
  0x7e   :  { %418 = vst [vmem:[#allocation2 + $0x2f0] sm:$0xf] %v417_v59  ;;  %v419_v60 = vld [vmem:[%s16125_s5 + $0x390] sm:$0xf]  ;;  %v421_v61 = vld [vmem:[%s16125_s5 + $0x288] sm:$0xf] }
  0x7f   :  { %v423_v62 = vld [vmem:[%s16125_s5 + $0x394] sm:$0xf]  ;;  %420 = vst [vmem:[#allocation2 + $0x2f4] sm:$0xf] %v419_v60  ;;  %422 = vst [vmem:[#allocation2 + $0x2f8] sm:$0xf] %v421_v61 }
  0x80   :  { %424 = vst [vmem:[#allocation2 + $0x2fc] sm:$0xf] %v423_v62  ;;  %v425_v63 = vld [vmem:[%s16125_s5 + $0x28c] sm:$0xf]  ;;  %v427_v0 = vld [vmem:[%s16125_s5 + $0x398] sm:$0xf] }
  0x81   :  { %v429_v1 = vld [vmem:[%s16125_s5 + $0x290] sm:$0xf]  ;;  %426 = vst [vmem:[#allocation2 + $0x300] sm:$0xf] %v425_v63  ;;  %428 = vst [vmem:[#allocation2 + $0x304] sm:$0xf] %v427_v0 }
  0x82   :  { %430 = vst [vmem:[#allocation2 + $0x308] sm:$0xf] %v429_v1  ;;  %v431_v2 = vld [vmem:[%s16125_s5 + $0x39c] sm:$0xf]  ;;  %v433_v3 = vld [vmem:[%s16125_s5 + $0x294] sm:$0xf] }
  0x83   :  { %v435_v4 = vld [vmem:[%s16125_s5 + $0x3a0] sm:$0xf]  ;;  %432 = vst [vmem:[#allocation2 + $0x30c] sm:$0xf] %v431_v2  ;;  %434 = vst [vmem:[#allocation2 + $0x310] sm:$0xf] %v433_v3 }
  0x84   :  { %436 = vst [vmem:[#allocation2 + $0x314] sm:$0xf] %v435_v4  ;;  %v437_v5 = vld [vmem:[%s16125_s5 + $0x298] sm:$0xf]  ;;  %v439_v6 = vld [vmem:[%s16125_s5 + $0x3a4] sm:$0xf] }
  0x85   :  { %v441_v7 = vld [vmem:[%s16125_s5 + $0x29c] sm:$0xf]  ;;  %438 = vst [vmem:[#allocation2 + $0x318] sm:$0xf] %v437_v5  ;;  %440 = vst [vmem:[#allocation2 + $0x31c] sm:$0xf] %v439_v6 }
  0x86   :  { %442 = vst [vmem:[#allocation2 + $0x320] sm:$0xf] %v441_v7  ;;  %v443_v8 = vld [vmem:[%s16125_s5 + $0x3a8] sm:$0xf]  ;;  %v445_v9 = vld [vmem:[%s16125_s5 + $0x2a0] sm:$0xf] }
  0x87   :  { %v447_v10 = vld [vmem:[%s16125_s5 + $0x3ac] sm:$0xf]  ;;  %444 = vst [vmem:[#allocation2 + $0x324] sm:$0xf] %v443_v8  ;;  %446 = vst [vmem:[#allocation2 + $0x328] sm:$0xf] %v445_v9 }
  0x88   :  { %448 = vst [vmem:[#allocation2 + $0x32c] sm:$0xf] %v447_v10  ;;  %v449_v11 = vld [vmem:[%s16125_s5 + $0x2a4] sm:$0xf]  ;;  %v451_v12 = vld [vmem:[%s16125_s5 + $0x3b0] sm:$0xf] }
  0x89   :  { %v453_v13 = vld [vmem:[%s16125_s5 + $0x2a8] sm:$0xf]  ;;  %450 = vst [vmem:[#allocation2 + $0x330] sm:$0xf] %v449_v11  ;;  %452 = vst [vmem:[#allocation2 + $0x334] sm:$0xf] %v451_v12 }
  0x8a   :  { %454 = vst [vmem:[#allocation2 + $0x338] sm:$0xf] %v453_v13  ;;  %v455_v14 = vld [vmem:[%s16125_s5 + $0x3b4] sm:$0xf]  ;;  %v457_v15 = vld [vmem:[%s16125_s5 + $0x2ac] sm:$0xf] }
  0x8b   :  { %v459_v16 = vld [vmem:[%s16125_s5 + $0x3b8] sm:$0xf]  ;;  %456 = vst [vmem:[#allocation2 + $0x33c] sm:$0xf] %v455_v14  ;;  %458 = vst [vmem:[#allocation2 + $0x340] sm:$0xf] %v457_v15 }
  0x8c   :  { %460 = vst [vmem:[#allocation2 + $0x344] sm:$0xf] %v459_v16  ;;  %v461_v17 = vld [vmem:[%s16125_s5 + $0x2b0] sm:$0xf]  ;;  %v463_v18 = vld [vmem:[%s16125_s5 + $0x3bc] sm:$0xf] }
  0x8d   :  { %v465_v19 = vld [vmem:[%s16125_s5 + $0x2b4] sm:$0xf]  ;;  %462 = vst [vmem:[#allocation2 + $0x348] sm:$0xf] %v461_v17  ;;  %464 = vst [vmem:[#allocation2 + $0x34c] sm:$0xf] %v463_v18 }
  0x8e   :  { %466 = vst [vmem:[#allocation2 + $0x350] sm:$0xf] %v465_v19  ;;  %v467_v20 = vld [vmem:[%s16125_s5 + $0x3c0] sm:$0xf]  ;;  %v469_v21 = vld [vmem:[%s16125_s5 + $0x2b8] sm:$0xf] }
  0x8f   :  { %v471_v22 = vld [vmem:[%s16125_s5 + $0x3c4] sm:$0xf]  ;;  %468 = vst [vmem:[#allocation2 + $0x354] sm:$0xf] %v467_v20  ;;  %470 = vst [vmem:[#allocation2 + $0x358] sm:$0xf] %v469_v21 }
  0x90   :  { %472 = vst [vmem:[#allocation2 + $0x35c] sm:$0xf] %v471_v22  ;;  %v473_v23 = vld [vmem:[%s16125_s5 + $0x2bc] sm:$0xf]  ;;  %v475_v24 = vld [vmem:[%s16125_s5 + $0x3c8] sm:$0xf] }
  0x91   :  { %v477_v25 = vld [vmem:[%s16125_s5 + $0x2c0] sm:$0xf]  ;;  %474 = vst [vmem:[#allocation2 + $0x360] sm:$0xf] %v473_v23  ;;  %476 = vst [vmem:[#allocation2 + $0x364] sm:$0xf] %v475_v24 }
  0x92   :  { %478 = vst [vmem:[#allocation2 + $0x368] sm:$0xf] %v477_v25  ;;  %v479_v26 = vld [vmem:[%s16125_s5 + $0x3cc] sm:$0xf]  ;;  %v481_v27 = vld [vmem:[%s16125_s5 + $0x2c4] sm:$0xf] }
  0x93   :  { %v483_v28 = vld [vmem:[%s16125_s5 + $0x3d0] sm:$0xf]  ;;  %480 = vst [vmem:[#allocation2 + $0x36c] sm:$0xf] %v479_v26  ;;  %482 = vst [vmem:[#allocation2 + $0x370] sm:$0xf] %v481_v27 }
  0x94   :  { %484 = vst [vmem:[#allocation2 + $0x374] sm:$0xf] %v483_v28  ;;  %v485_v29 = vld [vmem:[%s16125_s5 + $0x2c8] sm:$0xf]  ;;  %v487_v30 = vld [vmem:[%s16125_s5 + $0x3d4] sm:$0xf] }
  0x95   :  { %v489_v31 = vld [vmem:[%s16125_s5 + $0x2cc] sm:$0xf]  ;;  %486 = vst [vmem:[#allocation2 + $0x378] sm:$0xf] %v485_v29  ;;  %488 = vst [vmem:[#allocation2 + $0x37c] sm:$0xf] %v487_v30 }
  0x96   :  { %490 = vst [vmem:[#allocation2 + $0x380] sm:$0xf] %v489_v31  ;;  %v491_v32 = vld [vmem:[%s16125_s5 + $0x3d8] sm:$0xf]  ;;  %v493_v33 = vld [vmem:[%s16125_s5 + $0x2d0] sm:$0xf] }
  0x97   :  { %v495_v34 = vld [vmem:[%s16125_s5 + $0x3dc] sm:$0xf]  ;;  %492 = vst [vmem:[#allocation2 + $0x384] sm:$0xf] %v491_v32  ;;  %494 = vst [vmem:[#allocation2 + $0x388] sm:$0xf] %v493_v33 }
  0x98   :  { %496 = vst [vmem:[#allocation2 + $0x38c] sm:$0xf] %v495_v34  ;;  %v497_v35 = vld [vmem:[%s16125_s5 + $0x2d4] sm:$0xf]  ;;  %v499_v36 = vld [vmem:[%s16125_s5 + $0x3e0] sm:$0xf] }
  0x99   :  { %v501_v37 = vld [vmem:[%s16125_s5 + $0x2d8] sm:$0xf]  ;;  %498 = vst [vmem:[#allocation2 + $0x390] sm:$0xf] %v497_v35  ;;  %500 = vst [vmem:[#allocation2 + $0x394] sm:$0xf] %v499_v36 }
  0x9a   :  { %502 = vst [vmem:[#allocation2 + $0x398] sm:$0xf] %v501_v37  ;;  %v503_v38 = vld [vmem:[%s16125_s5 + $0x3e4] sm:$0xf]  ;;  %v505_v39 = vld [vmem:[%s16125_s5 + $0x2dc] sm:$0xf] }
  0x9b   :  { %v507_v40 = vld [vmem:[%s16125_s5 + $0x3e8] sm:$0xf]  ;;  %504 = vst [vmem:[#allocation2 + $0x39c] sm:$0xf] %v503_v38  ;;  %506 = vst [vmem:[#allocation2 + $0x3a0] sm:$0xf] %v505_v39 }
  0x9c   :  { %508 = vst [vmem:[#allocation2 + $0x3a4] sm:$0xf] %v507_v40  ;;  %v509_v41 = vld [vmem:[%s16125_s5 + $0x2e0] sm:$0xf]  ;;  %v511_v42 = vld [vmem:[%s16125_s5 + $0x3ec] sm:$0xf] }
  0x9d   :  { %v513_v43 = vld [vmem:[%s16125_s5 + $0x2e4] sm:$0xf]  ;;  %510 = vst [vmem:[#allocation2 + $0x3a8] sm:$0xf] %v509_v41  ;;  %512 = vst [vmem:[#allocation2 + $0x3ac] sm:$0xf] %v511_v42 }
  0x9e   :  { %514 = vst [vmem:[#allocation2 + $0x3b0] sm:$0xf] %v513_v43  ;;  %v515_v44 = vld [vmem:[%s16125_s5 + $0x3f0] sm:$0xf]  ;;  %v517_v45 = vld [vmem:[%s16125_s5 + $0x2e8] sm:$0xf] }
  0x9f   :  { %v519_v46 = vld [vmem:[%s16125_s5 + $0x3f4] sm:$0xf]  ;;  %516 = vst [vmem:[#allocation2 + $0x3b4] sm:$0xf] %v515_v44  ;;  %518 = vst [vmem:[#allocation2 + $0x3b8] sm:$0xf] %v517_v45 }
  0xa0   :  { %520 = vst [vmem:[#allocation2 + $0x3bc] sm:$0xf] %v519_v46  ;;  %v521_v47 = vld [vmem:[%s16125_s5 + $0x2ec] sm:$0xf]  ;;  %v523_v48 = vld [vmem:[%s16125_s5 + $0x3f8] sm:$0xf] }
  0xa1   :  { %v525_v49 = vld [vmem:[%s16125_s5 + $0x2f0] sm:$0xf]  ;;  %522 = vst [vmem:[#allocation2 + $0x3c0] sm:$0xf] %v521_v47  ;;  %524 = vst [vmem:[#allocation2 + $0x3c4] sm:$0xf] %v523_v48 }
  0xa2   :  { %526 = vst [vmem:[#allocation2 + $0x3c8] sm:$0xf] %v525_v49  ;;  %v527_v50 = vld [vmem:[%s16125_s5 + $0x3fc] sm:$0xf]  ;;  %v529_v51 = vld [vmem:[%s16125_s5 + $0x2f4] sm:$0xf] }
  0xa3   :  { %v531_v52 = vld [vmem:[%s16125_s5 + $0x400] sm:$0xf]  ;;  %528 = vst [vmem:[#allocation2 + $0x3cc] sm:$0xf] %v527_v50  ;;  %530 = vst [vmem:[#allocation2 + $0x3d0] sm:$0xf] %v529_v51 }
  0xa4   :  { %532 = vst [vmem:[#allocation2 + $0x3d4] sm:$0xf] %v531_v52  ;;  %v533_v53 = vld [vmem:[%s16125_s5 + $0x2f8] sm:$0xf]  ;;  %v535_v54 = vld [vmem:[%s16125_s5 + $0x404] sm:$0xf] }
  0xa5   :  { %v537_v55 = vld [vmem:[%s16125_s5 + $0x2fc] sm:$0xf]  ;;  %534 = vst [vmem:[#allocation2 + $0x3d8] sm:$0xf] %v533_v53  ;;  %536 = vst [vmem:[#allocation2 + $0x3dc] sm:$0xf] %v535_v54 }
  0xa6   :  { %538 = vst [vmem:[#allocation2 + $0x3e0] sm:$0xf] %v537_v55  ;;  %v539_v56 = vld [vmem:[%s16125_s5 + $0x408] sm:$0xf]  ;;  %v541_v57 = vld [vmem:[%s16125_s5 + $0x300] sm:$0xf] }
  0xa7   :  { %v543_v58 = vld [vmem:[%s16125_s5 + $0x40c] sm:$0xf]  ;;  %540 = vst [vmem:[#allocation2 + $0x3e4] sm:$0xf] %v539_v56  ;;  %542 = vst [vmem:[#allocation2 + $0x3e8] sm:$0xf] %v541_v57 }
  0xa8   :  { %544 = vst [vmem:[#allocation2 + $0x3ec] sm:$0xf] %v543_v58  ;;  %v545_v59 = vld [vmem:[%s16125_s5 + $0x304] sm:$0xf]  ;;  %v547_v60 = vld [vmem:[%s16125_s5 + $0x410] sm:$0xf] }
  0xa9   :  { %v549_v61 = vld [vmem:[%s16125_s5 + $0x308] sm:$0xf]  ;;  %546 = vst [vmem:[#allocation2 + $0x3f0] sm:$0xf] %v545_v59  ;;  %548 = vst [vmem:[#allocation2 + $0x3f4] sm:$0xf] %v547_v60 }
  0xaa   :  { %550 = vst [vmem:[#allocation2 + $0x3f8] sm:$0xf] %v549_v61  ;;  %v551_v62 = vld [vmem:[%s16125_s5 + $0x414] sm:$0xf]  ;;  %v553_v63 = vld [vmem:[%s16125_s5 + $0x30c] sm:$0xf] }
  0xab   :  { %v555_v0 = vld [vmem:[%s16125_s5 + $0x418] sm:$0xf]  ;;  %552 = vst [vmem:[#allocation2 + $0x3fc] sm:$0xf] %v551_v62  ;;  %554 = vst [vmem:[#allocation2 + $0x400] sm:$0xf] %v553_v63 }
  0xac   :  { %556 = vst [vmem:[#allocation2 + $0x404] sm:$0xf] %v555_v0  ;;  %v557_v1 = vld [vmem:[%s16125_s5 + $0x310] sm:$0xf]  ;;  %v559_v2 = vld [vmem:[%s16125_s5 + $0x41c] sm:$0xf] }
  0xad   :  { %v561_v3 = vld [vmem:[%s16125_s5 + $0x314] sm:$0xf]  ;;  %558 = vst [vmem:[#allocation2 + $0x408] sm:$0xf] %v557_v1  ;;  %560 = vst [vmem:[#allocation2 + $0x40c] sm:$0xf] %v559_v2 }
  0xae   :  { %562 = vst [vmem:[#allocation2 + $0x410] sm:$0xf] %v561_v3  ;;  %v563_v4 = vld [vmem:[%s16125_s5 + $0x420] sm:$0xf]  ;;  %v565_v5 = vld [vmem:[%s16125_s5 + $0x318] sm:$0xf] }
  0xaf   :  { %v567_v6 = vld [vmem:[%s16125_s5 + $0x424] sm:$0xf]  ;;  %564 = vst [vmem:[#allocation2 + $0x414] sm:$0xf] %v563_v4  ;;  %566 = vst [vmem:[#allocation2 + $0x418] sm:$0xf] %v565_v5 }
  0xb0   :  { %568 = vst [vmem:[#allocation2 + $0x41c] sm:$0xf] %v567_v6  ;;  %v569_v7 = vld [vmem:[%s16125_s5 + $0x31c] sm:$0xf]  ;;  %v571_v8 = vld [vmem:[%s16125_s5 + $0x428] sm:$0xf] }
  0xb1   :  { %v573_v9 = vld [vmem:[%s16125_s5 + $0x320] sm:$0xf]  ;;  %570 = vst [vmem:[#allocation2 + $0x420] sm:$0xf] %v569_v7  ;;  %572 = vst [vmem:[#allocation2 + $0x424] sm:$0xf] %v571_v8 }
  0xb2   :  { %574 = vst [vmem:[#allocation2 + $0x428] sm:$0xf] %v573_v9  ;;  %v575_v10 = vld [vmem:[%s16125_s5 + $0x42c] sm:$0xf] }
  0xb3   :  { %576 = vst [vmem:[#allocation2 + $0x42c] sm:$0xf] %v575_v10 }
  0xb4   :  { %1143 = vsyncadd [#allocation4], 17152  ;;  %v1182_v11 = vld [vmem:[%s16126_s6] sm:$0xff]  ;;  %v1184_v12 = vld [vmem:[%s16126_s6 + $0x8] sm:$0xff] }
  0xb5   :  { %1183 = vst [vmem:[#allocation3] sm:$0xff] %v1182_v11  ;;  %1185 = vst [vmem:[#allocation3 + $0x8] sm:$0xff] %v1184_v12  ;;  %v1186_v13 = vld [vmem:[%s16126_s6 + $0x10] sm:$0xff]  ;;  %v1188_v14 = vld [vmem:[%s16126_s6 + $0x18] sm:$0xff] }
  0xb6   :  { %v1190_v15 = vld [vmem:[%s16126_s6 + $0x20] sm:$0xff]  ;;  %1187 = vst [vmem:[#allocation3 + $0x10] sm:$0xff] %v1186_v13  ;;  %1189 = vst [vmem:[#allocation3 + $0x18] sm:$0xff] %v1188_v14  ;;  %v1192_v16 = vld [vmem:[%s16126_s6 + $0x28] sm:$0xff] }
  0xb7   :  { %1191 = vst [vmem:[#allocation3 + $0x20] sm:$0xff] %v1190_v15  ;;  %v1194_v17 = vld [vmem:[%s16126_s6 + $0x30] sm:$0xff]  ;;  %v1196_v18 = vld [vmem:[%s16126_s6 + $0x38] sm:$0xff]  ;;  %1193 = vst [vmem:[#allocation3 + $0x28] sm:$0xff] %v1192_v16 }
  0xb8   :  { %1195 = vst [vmem:[#allocation3 + $0x30] sm:$0xff] %v1194_v17  ;;  %1197 = vst [vmem:[#allocation3 + $0x38] sm:$0xff] %v1196_v18  ;;  %v9650_v19 = vld [vmem:[%s16126_s6 + $0x40] sm:$0x7] }
  0xb9   :  { %1208 = vst [vmem:[#allocation3 + $0x40] sm:$0x7] %v9650_v19 }
  0xba   :  { %1212 = vsyncadd [#allocation4 + $0x1], 1072  ;;  %v11020_v20 = vld [vmem:[%s16121_s1 + $0x40] sm:$0xff]   ;;  %v11024_v24 = vld [vmem:[%s16121_s1 + $0x48] sm:$0xff]   ;;  %vm11721_vm0 = vmmov 0   ;;  %vm5642_vm1 = vcmask 1043456  }
  0xbb   :  { %v11021_v21 = vld [vmem:[%s16121_s1] sm:$0xff]   ;;  %10227 = vmatprep.subr.bf16.mxu0 %v11020_v20  ;;  %v11025_v25 = vld [vmem:[%s16121_s1 + $0x8] sm:$0xff]   ;;  %v11028_v28 = vld [vmem:[%s16121_s1 + $0x50] sm:$0xff]   ;;  %vm5638_vm2 = vcmask 982016   ;;  %vm7018_vm3 = vcmask 261120  }
  0xbc   :  { %v11022_v22 = vld [vmem:[%s16121_s1 + $0xc0] sm:$0xff]   ;;  %10228 = vmatpush3.bf16.msra.mxu0 %v11021_v21  ;;  %v11026_v26 = vld [vmem:[%s16121_s1 + $0xc8] sm:$0xff]   ;;  %v11029_v29 = vld [vmem:[%s16121_s1 + $0x10] sm:$0xff]  }
  0xbd   :  { %v11023_v23 = vld [vmem:[%s16121_s1 + $0x80] sm:$0xff]   ;;  %10249 = vmatprep.subr.bf16.mxu1 %v11022_v22  ;;  %10229 = vmatprep.subr.bf16.mxu0 %v11024_v24  ;;  %v11027_v27 = vld [vmem:[%s16121_s1 + $0x88] sm:$0xff]   ;;  %v11030_v30 = vld [vmem:[%s16121_s1 + $0xd0] sm:$0xff]  }
  0xbe   :  { %10250 = vmatpush3.bf16.msra.mxu1 %v11023_v23  ;;  %v11031_v31 = vld [vmem:[%s16121_s1 + $0x90] sm:$0xff]   ;;  %v11032_v32 = vld [vmem:[%s16121_s1 + $0x58] sm:$0xff]   ;;  %v11036_v36 = vld [vmem:[%s16121_s1 + $0x60] sm:$0xff]  }
  0xbf   :  { %10251 = vmatprep.subr.bf16.mxu1 %v11026_v26  ;;  %v11033_v33 = vld [vmem:[%s16121_s1 + $0x18] sm:$0xff]   ;;  %v11037_v37 = vld [vmem:[%s16121_s1 + $0x20] sm:$0xff]   ;;  %v11040_v40 = vld [vmem:[%s16121_s1 + $0x68] sm:$0xff]  }
  0xc0   :  { %10230 = vmatpush3.bf16.msra.mxu0 %v11025_v25  ;;  %v11034_v34 = vld [vmem:[%s16121_s1 + $0xd8] sm:$0xff]   ;;  %v11038_v38 = vld [vmem:[%s16121_s1 + $0xe0] sm:$0xff]   ;;  %v11041_v41 = vld [vmem:[%s16121_s1 + $0x28] sm:$0xff]  }
  0xc1   :  { %10231 = vmatprep.subr.bf16.mxu0 %v11028_v28  ;;  %v11035_v35 = vld [vmem:[%s16121_s1 + $0x98] sm:$0xff]   ;;  %v11039_v39 = vld [vmem:[%s16121_s1 + $0xa0] sm:$0xff]   ;;  %v11042_v42 = vld [vmem:[%s16121_s1 + $0xe8] sm:$0xff]  }
  0xc2   :  { %10252 = vmatpush3.bf16.msra.mxu1 %v11027_v27  ;;  %v11043_v43 = vld [vmem:[%s16121_s1 + $0xa8] sm:$0xff]   ;;  %v11044_v44 = vld [vmem:[%s16121_s1 + $0x70] sm:$0xff]   ;;  %v11048_v48 = vld [vmem:[%s16121_s1 + $0x78] sm:$0xff]  }
  0xc3   :  { %10253 = vmatprep.subr.bf16.mxu1 %v11030_v30  ;;  %v11045_v45 = vld [vmem:[%s16121_s1 + $0x30] sm:$0xff]   ;;  %v11049_v49 = vld [vmem:[%s16121_s1 + $0x38] sm:$0xff]   ;;  %v12689_v51 = vld [vmem:[%s16120_s0 + $0x8] sm:$0xff] }
  0xc4   :  { %10232 = vmatpush3.bf16.msra.mxu0 %v11029_v29  ;;  %v11046_v46 = vld [vmem:[%s16121_s1 + $0xf0] sm:$0xff]   ;;  %v11050_v50 = vld [vmem:[%s16121_s1 + $0xf8] sm:$0xff]   ;;  %v1281_v52 = vpack.c.bf16 %v12689_v51, %v12689_v51  ;;  %v12699_v54 = vld [vmem:[%s16120_s0] sm:$0xff] }
  0xc5   :  { %10233 = vmatprep.subr.bf16.mxu0 %v11032_v32  ;;  %v11047_v47 = vld [vmem:[%s16121_s1 + $0xb0] sm:$0xff]   ;;  %v11051_v53 = vld [vmem:[%s16121_s1 + $0xb8] sm:$0xff]   ;;  %v1280_v55 = vpack.c.bf16 %v12699_v54, %v12699_v54  ;;  %v11052_v56 = vld [vmem:[%s16121_s1 + $0x140] sm:$0xff]  }
  0xc6   :  { %10254 = vmatpush3.bf16.msra.mxu1 %v11031_v31  ;;  %5678 = vmatprep.mubr.bf16.mxu0 %v1281_v52  ;;  %v12709_v57 = vld [vmem:[%s16120_s0 + $0x18] sm:$0xff]  ;;  %v11053_v59 = vld [vmem:[%s16121_s1 + $0x100] sm:$0xff]   ;;  %v12719_v60 = vld [vmem:[%s16120_s0 + $0x10] sm:$0xff] }
  0xc7   :  { %10255 = vmatprep.subr.bf16.mxu1 %v11034_v34  ;;  %v1283_v58 = vpack.c.bf16 %v12709_v57, %v12709_v57  ;;  %v1282_v61 = vpack.c.bf16 %v12719_v60, %v12719_v60  ;;  %v11054_v62 = vld [vmem:[%s16121_s1 + $0x1c0] sm:$0xff]   ;;  %v11056_v0 = vld [vmem:[%s16121_s1 + $0x148] sm:$0xff]   ;;  %v11060_v4 = vld [vmem:[%s16121_s1 + $0x150] sm:$0xff]  }
  0xc8   :  { %10234 = vmatpush3.bf16.msra.mxu0 %v11033_v33  ;;  %v11055_v63 = vld [vmem:[%s16121_s1 + $0x180] sm:$0xff]   ;;  %v11057_v1 = vld [vmem:[%s16121_s1 + $0x108] sm:$0xff]   ;;  %v11061_v5 = vld [vmem:[%s16121_s1 + $0x110] sm:$0xff]  }
  0xc9   :  { %10235 = vmatprep.subr.bf16.mxu0 %v11036_v36  ;;  %5718 = vmatprep.mubr.bf16.mxu1 %v1283_v58  ;;  %v11058_v2 = vld [vmem:[%s16121_s1 + $0x1c8] sm:$0xff]   ;;  %v11062_v6 = vld [vmem:[%s16121_s1 + $0x1d0] sm:$0xff]   ;;  %v11064_v8 = vld [vmem:[%s16121_s1 + $0x158] sm:$0xff]  }
  0xca   :  { %10256 = vmatpush3.bf16.msra.mxu1 %v11035_v35  ;;  %v11059_v3 = vld [vmem:[%s16121_s1 + $0x188] sm:$0xff]   ;;  %v11063_v7 = vld [vmem:[%s16121_s1 + $0x190] sm:$0xff]   ;;  %v11065_v9 = vld [vmem:[%s16121_s1 + $0x118] sm:$0xff]  }
  0xcb   :  { %10257 = vmatprep.subr.bf16.mxu1 %v11038_v38  ;;  %v11066_v10 = vld [vmem:[%s16121_s1 + $0x1d8] sm:$0xff]   ;;  %v11068_v12 = vld [vmem:[%s16121_s1 + $0x160] sm:$0xff]   ;;  %v11072_v16 = vld [vmem:[%s16121_s1 + $0x168] sm:$0xff]  }
  0xcc   :  { %10236 = vmatpush3.bf16.msra.mxu0 %v11037_v37  ;;  %v11067_v11 = vld [vmem:[%s16121_s1 + $0x198] sm:$0xff]   ;;  %v11069_v13 = vld [vmem:[%s16121_s1 + $0x120] sm:$0xff]   ;;  %v11073_v17 = vld [vmem:[%s16121_s1 + $0x128] sm:$0xff]  }
  0xcd   :  { %10237 = vmatprep.subr.bf16.mxu0 %v11040_v40  ;;  %v11070_v14 = vld [vmem:[%s16121_s1 + $0x1e0] sm:$0xff]   ;;  %v11074_v18 = vld [vmem:[%s16121_s1 + $0x1e8] sm:$0xff]   ;;  %v11076_v20 = vld [vmem:[%s16121_s1 + $0x170] sm:$0xff]  }
  0xce   :  { %10258 = vmatpush3.bf16.msra.mxu1 %v11039_v39  ;;  %v11071_v15 = vld [vmem:[%s16121_s1 + $0x1a0] sm:$0xff]   ;;  %v11075_v19 = vld [vmem:[%s16121_s1 + $0x1a8] sm:$0xff]   ;;  %v11077_v21 = vld [vmem:[%s16121_s1 + $0x130] sm:$0xff]  }
  0xcf   :  { %10259 = vmatprep.subr.bf16.mxu1 %v11042_v42  ;;  %v11078_v22 = vld [vmem:[%s16121_s1 + $0x1f0] sm:$0xff]   ;;  %v11080_v24 = vld [vmem:[%s16121_s1 + $0x178] sm:$0xff]   ;;  %v12813_v27 = vld [vmem:[%s16120_s0 + $0x28] sm:$0xff] }
  0xd0   :  { %10238 = vmatpush3.bf16.msra.mxu0 %v11041_v41  ;;  %v11079_v23 = vld [vmem:[%s16121_s1 + $0x1b0] sm:$0xff]   ;;  %v11081_v25 = vld [vmem:[%s16121_s1 + $0x138] sm:$0xff]   ;;  %v1285_v28 = vpack.c.bf16 %v12813_v27, %v12813_v27  ;;  %v12823_v30 = vld [vmem:[%s16120_s0 + $0x20] sm:$0xff] }
  0xd1   :  { %10239 = vmatprep.subr.bf16.mxu0 %v11044_v44  ;;  %v11082_v26 = vld [vmem:[%s16121_s1 + $0x1f8] sm:$0xff]   ;;  %v1284_v31 = vpack.c.bf16 %v12823_v30, %v12823_v30  ;;  %v11084_v32 = vld [vmem:[%s16121_s1 + $0x240] sm:$0xff]   ;;  %v12843_v36 = vld [vmem:[%s16120_s0 + $0x30] sm:$0xff] }
  0xd2   :  { %10260 = vmatpush3.bf16.msra.mxu1 %v11043_v43  ;;  %v11083_v29 = vld [vmem:[%s16121_s1 + $0x1b8] sm:$0xff]   ;;  %v11085_v35 = vld [vmem:[%s16121_s1 + $0x200] sm:$0xff]   ;;  %v1286_v37 = vpack.c.bf16 %v12843_v36, %v12843_v36  ;;  %v11088_v40 = vld [vmem:[%s16121_s1 + $0x248] sm:$0xff]  }
  0xd3   :  { %10261 = vmatprep.subr.bf16.mxu1 %v11046_v46  ;;  %v12833_v33 = vld [vmem:[%s16120_s0 + $0x38] sm:$0xff]  ;;  %v11086_v38 = vld [vmem:[%s16121_s1 + $0x2c0] sm:$0xff]   ;;  %v11089_v41 = vld [vmem:[%s16121_s1 + $0x208] sm:$0xff]  }
  0xd4   :  { %10240 = vmatpush3.bf16.msra.mxu0 %v11045_v45  ;;  %v1287_v34 = vpack.c.bf16 %v12833_v33, %v12833_v33  ;;  %v11087_v39 = vld [vmem:[%s16121_s1 + $0x280] sm:$0xff]   ;;  %v11090_v42 = vld [vmem:[%s16121_s1 + $0x2c8] sm:$0xff]   ;;  %v11092_v44 = vld [vmem:[%s16121_s1 + $0x250] sm:$0xff]  }
  0xd5   :  { %10241 = vmatprep.subr.bf16.mxu0 %v11048_v48  ;;  %v11091_v43 = vld [vmem:[%s16121_s1 + $0x288] sm:$0xff]   ;;  %v11093_v45 = vld [vmem:[%s16121_s1 + $0x210] sm:$0xff]   ;;  %v11096_v48 = vld [vmem:[%s16121_s1 + $0x258] sm:$0xff]  }
  0xd6   :  { %10262 = vmatpush3.bf16.msra.mxu1 %v11047_v47  ;;  %v11094_v46 = vld [vmem:[%s16121_s1 + $0x2d0] sm:$0xff]   ;;  %v11099_v52 = vld [vmem:[%s16121_s1 + $0x298] sm:$0xff]   ;;  %v11103_v58 = vld [vmem:[%s16121_s1 + $0x2a0] sm:$0xff]  }
  0xd7   :  { %10263 = vmatprep.subr.bf16.mxu1 %v11050_v50  ;;  %v11095_v47 = vld [vmem:[%s16121_s1 + $0x290] sm:$0xff]   ;;  %v11098_v50 = vld [vmem:[%s16121_s1 + $0x2d8] sm:$0xff]  }
  0xd8   :  { %10242 = vmatpush3.bf16.msra.mxu0 %v11049_v49  ;;  %v11097_v49 = vld [vmem:[%s16121_s1 + $0x218] sm:$0xff]  }
  0xd9   :  { %10271 = vmatprep.subr.bf16.mxu0 %v11052_v56  ;;  %v11102_v56 = vld [vmem:[%s16121_s1 + $0x2e0] sm:$0xff]  }
  0xda   :  { %10264 = vmatpush3.bf16.msra.mxu1 %v11051_v53  ;;  %v11100_v53 = vld [vmem:[%s16121_s1 + $0x260] sm:$0xff]  }
  0xdb   :  { %5679 = vmatmul.mubr.bf16.vlgmr.msra.gmra.mrb[0].mxu0 %v1280_v55  ;;  %10293 = vmatprep.subr.bf16.mxu1 %v11054_v62  ;;  %v11101_v55 = vld [vmem:[%s16121_s1 + $0x220] sm:$0xff]   ;;  %v11106_v62 = vld [vmem:[%s16121_s1 + $0x2e8] sm:$0xff]  }
  0xdc   :  { %10272 = vmatpush3.bf16.msra.mxu0 %v11053_v59  ;;  %5758 = vmatprep.mubr.bf16.mxu0 %v1285_v28  ;;  %v11104_v59 = vld [vmem:[%s16121_s1 + $0x268] sm:$0xff]   ;;  %v11127_v28 = vld [vmem:[%s16121_s1 + $0x390] sm:$0xff]  }
  0xdd   :  { %5719 = vmatmul.mubr.bf16.vlgmr.msra.gmra.mrb[0].mxu1 %v1282_v61  ;;  %10273 = vmatprep.subr.bf16.mxu0 %v11056_v0  ;;  %v11105_v61 = vld [vmem:[%s16121_s1 + $0x228] sm:$0xff]   ;;  %v11108_v0 = vld [vmem:[%s16121_s1 + $0x270] sm:$0xff]  }
  0xde   :  { %10294 = vmatpush3.bf16.msra.mxu1 %v11055_v63  ;;  %5798 = vmatprep.mubr.bf16.mxu1 %v1287_v34  ;;  %v11107_v63 = vld [vmem:[%s16121_s1 + $0x2a8] sm:$0xff]   ;;  %v11131_v34 = vld [vmem:[%s16121_s1 + $0x398] sm:$0xff]  }
  0xdf   :  { %10295 = vmatprep.subr.bf16.mxu1 %v11058_v2  ;;  %v11110_v2 = vld [vmem:[%s16121_s1 + $0x2f0] sm:$0xff]  }
  0xe0   :  { %10274 = vmatpush3.bf16.msra.mxu0 %v11057_v1  ;;  %v11109_v1 = vld [vmem:[%s16121_s1 + $0x230] sm:$0xff]  }
  0xe1   :  { %10275 = vmatprep.subr.bf16.mxu0 %v11060_v4  ;;  %v11112_v4 = vld [vmem:[%s16121_s1 + $0x278] sm:$0xff]  }
  0xe2   :  { %10296 = vmatpush3.bf16.msra.mxu1 %v11059_v3  ;;  %v11111_v3 = vld [vmem:[%s16121_s1 + $0x2b0] sm:$0xff]  }
  0xe3   :  { %10297 = vmatprep.subr.bf16.mxu1 %v11062_v6  ;;  %v11114_v6 = vld [vmem:[%s16121_s1 + $0x2f8] sm:$0xff]  }
  0xe4   :  { %10276 = vmatpush3.bf16.msra.mxu0 %v11061_v5  ;;  %v11113_v5 = vld [vmem:[%s16121_s1 + $0x238] sm:$0xff]  }
  0xe5   :  { %10277 = vmatprep.subr.bf16.mxu0 %v11064_v8 }
  0xe6   :  { %10298 = vmatpush3.bf16.msra.mxu1 %v11063_v7  ;;  %v12937_v7 = vld [vmem:[%s16120_s0 + $0x48] sm:$0xff] }
  0xe7   :  { %10299 = vmatprep.subr.bf16.mxu1 %v11066_v10  ;;  %v1289_v8 = vpack.c.bf16 %v12937_v7, %v12937_v7  ;;  %v12947_v10 = vld [vmem:[%s16120_s0 + $0x40] sm:$0xff] }
  0xe8   :  { %10278 = vmatpush3.bf16.msra.mxu0 %v11065_v9  ;;  %v11115_v9 = vld [vmem:[%s16121_s1 + $0x2b8] sm:$0xff]  }
  0xe9   :  { %10279 = vmatprep.subr.bf16.mxu0 %v11068_v12  ;;  %v11116_v12 = vld [vmem:[%s16121_s1 + $0x340] sm:$0xff]  }
  0xea   :  { %10300 = vmatpush3.bf16.msra.mxu1 %v11067_v11  ;;  %v1288_v11 = vpack.c.bf16 %v12947_v10, %v12947_v10 }
  0xeb   :  { %10301 = vmatprep.subr.bf16.mxu1 %v11070_v14 }
  0xec   :  { %10280 = vmatpush3.bf16.msra.mxu0 %v11069_v13  ;;  %v12957_v13 = vld [vmem:[%s16120_s0 + $0x58] sm:$0xff] }
  0xed   :  { %10281 = vmatprep.subr.bf16.mxu0 %v11072_v16  ;;  %v1291_v14 = vpack.c.bf16 %v12957_v13, %v12957_v13  ;;  %v12967_v16 = vld [vmem:[%s16120_s0 + $0x50] sm:$0xff] }
  0xee   :  { %10302 = vmatpush3.bf16.msra.mxu1 %v11071_v15  ;;  %v11117_v15 = vld [vmem:[%s16121_s1 + $0x300] sm:$0xff]  }
  0xef   :  { %10303 = vmatprep.subr.bf16.mxu1 %v11074_v18  ;;  %v11118_v18 = vld [vmem:[%s16121_s1 + $0x3c0] sm:$0xff]  }
  0xf0   :  { %10282 = vmatpush3.bf16.msra.mxu0 %v11073_v17  ;;  %v1290_v17 = vpack.c.bf16 %v12967_v16, %v12967_v16 }
  0xf1   :  { %10283 = vmatprep.subr.bf16.mxu0 %v11076_v20  ;;  %v11120_v20 = vld [vmem:[%s16121_s1 + $0x348] sm:$0xff]  }
  0xf2   :  { %10304 = vmatpush3.bf16.msra.mxu1 %v11075_v19  ;;  %v11119_v19 = vld [vmem:[%s16121_s1 + $0x380] sm:$0xff]  }
  0xf3   :  { %10305 = vmatprep.subr.bf16.mxu1 %v11078_v22  ;;  %v11122_v22 = vld [vmem:[%s16121_s1 + $0x3c8] sm:$0xff]  }
  0xf4   :  { %10284 = vmatpush3.bf16.msra.mxu0 %v11077_v21  ;;  %v11121_v21 = vld [vmem:[%s16121_s1 + $0x308] sm:$0xff]  }
  0xf5   :  { %10285 = vmatprep.subr.bf16.mxu0 %v11080_v24  ;;  %v11124_v24 = vld [vmem:[%s16121_s1 + $0x350] sm:$0xff]  }
  0xf6   :  { %10306 = vmatpush3.bf16.msra.mxu1 %v11079_v23  ;;  %v11123_v23 = vld [vmem:[%s16121_s1 + $0x388] sm:$0xff]  }
  0xf7   :  { %10307 = vmatprep.subr.bf16.mxu1 %v11082_v26  ;;  %v11126_v26 = vld [vmem:[%s16121_s1 + $0x3d0] sm:$0xff]  }
  0xf8   :  { %10286 = vmatpush3.bf16.msra.mxu0 %v11081_v25  ;;  %v11125_v25 = vld [vmem:[%s16121_s1 + $0x310] sm:$0xff]  }
  0xf9   :  { %10315 = vmatprep.subr.bf16.mxu0 %v11084_v32  ;;  %v11130_v32 = vld [vmem:[%s16121_s1 + $0x3d8] sm:$0xff]  }
  0xfa   :  { %10308 = vmatpush3.bf16.msra.mxu1 %v11083_v29  ;;  %v11128_v29 = vld [vmem:[%s16121_s1 + $0x358] sm:$0xff]  }
  0xfb   :  { %5759 = vmatmul.mubr.bf16.vlgmr.msra.gmra.mrb[4].mxu0 %v1284_v31  ;;  %10337 = vmatprep.subr.bf16.mxu1 %v11086_v38  ;;  %v11129_v31 = vld [vmem:[%s16121_s1 + $0x318] sm:$0xff]   ;;  %v11134_v38 = vld [vmem:[%s16121_s1 + $0x3e0] sm:$0xff]  }
  0xfc   :  { %10316 = vmatpush3.bf16.msra.mxu0 %v11085_v35  ;;  %5838 = vmatprep.mubr.bf16.mxu0 %v1289_v8  ;;  %v11132_v35 = vld [vmem:[%s16121_s1 + $0x360] sm:$0xff]   ;;  %v11155_v8 = vld [vmem:[%s16121_s1 + $0x488] sm:$0xff]  }
  0xfd   :  { %5799 = vmatmul.mubr.bf16.vlgmr.msra.gmra.mrb[4].mxu1 %v1286_v37  ;;  %10317 = vmatprep.subr.bf16.mxu0 %v11088_v40  ;;  %v11133_v37 = vld [vmem:[%s16121_s1 + $0x320] sm:$0xff]   ;;  %v11136_v40 = vld [vmem:[%s16121_s1 + $0x368] sm:$0xff]  }
  0xfe   :  { %10338 = vmatpush3.bf16.msra.mxu1 %v11087_v39  ;;  %5878 = vmatprep.mubr.bf16.mxu1 %v1291_v14  ;;  %v11135_v39 = vld [vmem:[%s16121_s1 + $0x3a0] sm:$0xff]   ;;  %v11159_v14 = vld [vmem:[%s16121_s1 + $0x490] sm:$0xff]  }
  0xff   :  { %10339 = vmatprep.subr.bf16.mxu1 %v11090_v42  ;;  %v11138_v42 = vld [vmem:[%s16121_s1 + $0x3e8] sm:$0xff]  }
 0x100   :  { %10318 = vmatpush3.bf16.msra.mxu0 %v11089_v41  ;;  %v11137_v41 = vld [vmem:[%s16121_s1 + $0x328] sm:$0xff]  }
 0x101   :  { %10319 = vmatprep.subr.bf16.mxu0 %v11092_v44  ;;  %v11140_v44 = vld [vmem:[%s16121_s1 + $0x370] sm:$0xff]  }
 0x102   :  { %10340 = vmatpush3.bf16.msra.mxu1 %v11091_v43  ;;  %v11139_v43 = vld [vmem:[%s16121_s1 + $0x3a8] sm:$0xff]  }
 0x103   :  { %10341 = vmatprep.subr.bf16.mxu1 %v11094_v46  ;;  %v11142_v46 = vld [vmem:[%s16121_s1 + $0x3f0] sm:$0xff]  }
 0x104   :  { %10320 = vmatpush3.bf16.msra.mxu0 %v11093_v45  ;;  %v11141_v45 = vld [vmem:[%s16121_s1 + $0x330] sm:$0xff]  }
 0x105   :  { %10321 = vmatprep.subr.bf16.mxu0 %v11096_v48  ;;  %v11144_v48 = vld [vmem:[%s16121_s1 + $0x378] sm:$0xff]  }
 0x106   :  { %10342 = vmatpush3.bf16.msra.mxu1 %v11095_v47  ;;  %v11143_v47 = vld [vmem:[%s16121_s1 + $0x3b0] sm:$0xff]  }
 0x107   :  { %10343 = vmatprep.subr.bf16.mxu1 %v11098_v50  ;;  %v11146_v50 = vld [vmem:[%s16121_s1 + $0x3f8] sm:$0xff]  }
 0x108   :  { %10322 = vmatpush3.bf16.msra.mxu0 %v11097_v49  ;;  %v11145_v49 = vld [vmem:[%s16121_s1 + $0x338] sm:$0xff]  }
 0x109   :  { %10323 = vmatprep.subr.bf16.mxu0 %v11100_v53 }
 0x10a   :  { %10344 = vmatpush3.bf16.msra.mxu1 %v11099_v52  ;;  %v13061_v52 = vld [vmem:[%s16120_s0 + $0x68] sm:$0xff] }
 0x10b   :  { %10345 = vmatprep.subr.bf16.mxu1 %v11102_v56  ;;  %v1293_v53 = vpack.c.bf16 %v13061_v52, %v13061_v52  ;;  %v13071_v56 = vld [vmem:[%s16120_s0 + $0x60] sm:$0xff] }
 0x10c   :  { %10324 = vmatpush3.bf16.msra.mxu0 %v11101_v55  ;;  %v11147_v55 = vld [vmem:[%s16121_s1 + $0x3b8] sm:$0xff]  }
 0x10d   :  { %10325 = vmatprep.subr.bf16.mxu0 %v11104_v59  ;;  %v11148_v59 = vld [vmem:[%s16121_s1 + $0x440] sm:$0xff]  }
 0x10e   :  { %10346 = vmatpush3.bf16.msra.mxu1 %v11103_v58  ;;  %v1292_v58 = vpack.c.bf16 %v13071_v56, %v13071_v56 }
 0x10f   :  { %10347 = vmatprep.subr.bf16.mxu1 %v11106_v62 }
 0x110   :  { %10326 = vmatpush3.bf16.msra.mxu0 %v11105_v61  ;;  %v13081_v61 = vld [vmem:[%s16120_s0 + $0x78] sm:$0xff] }
 0x111   :  { %10327 = vmatprep.subr.bf16.mxu0 %v11108_v0  ;;  %v1295_v62 = vpack.c.bf16 %v13081_v61, %v13081_v61  ;;  %v13091_v0 = vld [vmem:[%s16120_s0 + $0x70] sm:$0xff] }
 0x112   :  { %10348 = vmatpush3.bf16.msra.mxu1 %v11107_v63  ;;  %v11149_v63 = vld [vmem:[%s16121_s1 + $0x400] sm:$0xff]  }
 0x113   :  { %10349 = vmatprep.subr.bf16.mxu1 %v11110_v2  ;;  %v11150_v2 = vld [vmem:[%s16121_s1 + $0x4c0] sm:$0xff]  }
 0x114   :  { %10328 = vmatpush3.bf16.msra.mxu0 %v11109_v1  ;;  %v1294_v1 = vpack.c.bf16 %v13091_v0, %v13091_v0 }
 0x115   :  { %10329 = vmatprep.subr.bf16.mxu0 %v11112_v4  ;;  %v11152_v4 = vld [vmem:[%s16121_s1 + $0x448] sm:$0xff]  }
 0x116   :  { %10350 = vmatpush3.bf16.msra.mxu1 %v11111_v3  ;;  %v11151_v3 = vld [vmem:[%s16121_s1 + $0x480] sm:$0xff]  }
 0x117   :  { %10351 = vmatprep.subr.bf16.mxu1 %v11114_v6  ;;  %v11154_v6 = vld [vmem:[%s16121_s1 + $0x4c8] sm:$0xff]  }
 0x118   :  { %10330 = vmatpush3.bf16.msra.mxu0 %v11113_v5  ;;  %v11153_v5 = vld [vmem:[%s16121_s1 + $0x408] sm:$0xff]  }
 0x119   :  { %10359 = vmatprep.subr.bf16.mxu0 %v11116_v12  ;;  %v11158_v12 = vld [vmem:[%s16121_s1 + $0x4d0] sm:$0xff]  }
 0x11a   :  { %10352 = vmatpush3.bf16.msra.mxu1 %v11115_v9  ;;  %v11156_v9 = vld [vmem:[%s16121_s1 + $0x450] sm:$0xff]  }
 0x11b   :  { %5839 = vmatmul.mubr.bf16.vlgmr.msra.gmra.mrb[8].mxu0 %v1288_v11  ;;  %10381 = vmatprep.subr.bf16.mxu1 %v11118_v18  ;;  %v11157_v11 = vld [vmem:[%s16121_s1 + $0x410] sm:$0xff]   ;;  %v11162_v18 = vld [vmem:[%s16121_s1 + $0x4d8] sm:$0xff]  }
 0x11c   :  { %10360 = vmatpush3.bf16.msra.mxu0 %v11117_v15  ;;  %5918 = vmatprep.mubr.bf16.mxu0 %v1293_v53  ;;  %v11160_v15 = vld [vmem:[%s16121_s1 + $0x458] sm:$0xff]   ;;  %v11183_v53 = vld [vmem:[%s16121_s1 + $0x580] sm:$0xff]  }
 0x11d   :  { %5879 = vmatmul.mubr.bf16.vlgmr.msra.gmra.mrb[8].mxu1 %v1290_v17  ;;  %10361 = vmatprep.subr.bf16.mxu0 %v11120_v20  ;;  %v11161_v17 = vld [vmem:[%s16121_s1 + $0x418] sm:$0xff]   ;;  %v11164_v20 = vld [vmem:[%s16121_s1 + $0x460] sm:$0xff]  }
 0x11e   :  { %10382 = vmatpush3.bf16.msra.mxu1 %v11119_v19  ;;  %5958 = vmatprep.mubr.bf16.mxu1 %v1295_v62  ;;  %v11163_v19 = vld [vmem:[%s16121_s1 + $0x498] sm:$0xff]   ;;  %v11187_v62 = vld [vmem:[%s16121_s1 + $0x588] sm:$0xff]  }
 0x11f   :  { %10383 = vmatprep.subr.bf16.mxu1 %v11122_v22  ;;  %v11166_v22 = vld [vmem:[%s16121_s1 + $0x4e0] sm:$0xff]  }
 0x120   :  { %10362 = vmatpush3.bf16.msra.mxu0 %v11121_v21  ;;  %v11165_v21 = vld [vmem:[%s16121_s1 + $0x420] sm:$0xff]  }
 0x121   :  { %10363 = vmatprep.subr.bf16.mxu0 %v11124_v24  ;;  %v11168_v24 = vld [vmem:[%s16121_s1 + $0x468] sm:$0xff]  }
 0x122   :  { %10384 = vmatpush3.bf16.msra.mxu1 %v11123_v23  ;;  %v11167_v23 = vld [vmem:[%s16121_s1 + $0x4a0] sm:$0xff]  }
 0x123   :  { %10385 = vmatprep.subr.bf16.mxu1 %v11126_v26  ;;  %v11170_v26 = vld [vmem:[%s16121_s1 + $0x4e8] sm:$0xff]  }
 0x124   :  { %10364 = vmatpush3.bf16.msra.mxu0 %v11125_v25  ;;  %v11169_v25 = vld [vmem:[%s16121_s1 + $0x428] sm:$0xff]  }
 0x125   :  { %10365 = vmatprep.subr.bf16.mxu0 %v11128_v29  ;;  %v11172_v29 = vld [vmem:[%s16121_s1 + $0x470] sm:$0xff]  }
 0x126   :  { %10386 = vmatpush3.bf16.msra.mxu1 %v11127_v28  ;;  %v11171_v28 = vld [vmem:[%s16121_s1 + $0x4a8] sm:$0xff]  }
 0x127   :  { %10387 = vmatprep.subr.bf16.mxu1 %v11130_v32  ;;  %v11174_v32 = vld [vmem:[%s16121_s1 + $0x4f0] sm:$0xff]  }
 0x128   :  { %10366 = vmatpush3.bf16.msra.mxu0 %v11129_v31  ;;  %v11173_v31 = vld [vmem:[%s16121_s1 + $0x430] sm:$0xff]  }
 0x129   :  { %10367 = vmatprep.subr.bf16.mxu0 %v11132_v35  ;;  %v11176_v35 = vld [vmem:[%s16121_s1 + $0x478] sm:$0xff]  }
 0x12a   :  { %10388 = vmatpush3.bf16.msra.mxu1 %v11131_v34  ;;  %v11175_v34 = vld [vmem:[%s16121_s1 + $0x4b0] sm:$0xff]  }
 0x12b   :  { %10389 = vmatprep.subr.bf16.mxu1 %v11134_v38  ;;  %v11178_v38 = vld [vmem:[%s16121_s1 + $0x4f8] sm:$0xff]  }
 0x12c   :  { %10368 = vmatpush3.bf16.msra.mxu0 %v11133_v37  ;;  %v11177_v37 = vld [vmem:[%s16121_s1 + $0x438] sm:$0xff]  }
 0x12d   :  { %10369 = vmatprep.subr.bf16.mxu0 %v11136_v40 }
 0x12e   :  { %10390 = vmatpush3.bf16.msra.mxu1 %v11135_v39  ;;  %v13185_v39 = vld [vmem:[%s16120_s0 + $0x88] sm:$0xff] }
 0x12f   :  { %10391 = vmatprep.subr.bf16.mxu1 %v11138_v42  ;;  %16234 = vst [vmem:[#allocation12_spill] sm:$0xff] %v13185_v39  ;;  %v1297_v40 = vpack.c.bf16 %v13185_v39, %v13185_v39  ;;  %v13195_v42 = vld [vmem:[%s16120_s0 + $0x80] sm:$0xff] }
 0x130   :  { %10370 = vmatpush3.bf16.msra.mxu0 %v11137_v41  ;;  %v11179_v41 = vld [vmem:[%s16121_s1 + $0x4b8] sm:$0xff]   ;;  %16235 = vst [vmem:[#allocation13_spill] sm:$0xff] %v13195_v42 }
 0x131   :  { %10371 = vmatprep.subr.bf16.mxu0 %v11140_v44  ;;  %v11180_v44 = vld [vmem:[%s16121_s1 + $0x540] sm:$0xff]  }
 0x132   :  { %10392 = vmatpush3.bf16.msra.mxu1 %v11139_v43  ;;  %v1296_v43 = vpack.c.bf16 %v13195_v42, %v13195_v42 }
 0x133   :  { %10393 = vmatprep.subr.bf16.mxu1 %v11142_v46 }
 0x134   :  { %10372 = vmatpush3.bf16.msra.mxu0 %v11141_v45  ;;  %v13205_v45 = vld [vmem:[%s16120_s0 + $0x98] sm:$0xff] }
 0x135   :  { %10373 = vmatprep.subr.bf16.mxu0 %v11144_v48  ;;  %16236 = vst [vmem:[#allocation14_spill] sm:$0xff] %v13205_v45  ;;  %v1299_v46 = vpack.c.bf16 %v13205_v45, %v13205_v45  ;;  %v13215_v48 = vld [vmem:[%s16120_s0 + $0x90] sm:$0xff] }
 0x136   :  { %10394 = vmatpush3.bf16.msra.mxu1 %v11143_v47  ;;  %v11181_v47 = vld [vmem:[%s16121_s1 + $0x500] sm:$0xff]   ;;  %16237 = vst [vmem:[#allocation15_spill] sm:$0xff] %v13215_v48 }
 0x137   :  { %10395 = vmatprep.subr.bf16.mxu1 %v11146_v50  ;;  %v11182_v50 = vld [vmem:[%s16121_s1 + $0x5c0] sm:$0xff]  }
 0x138   :  { %10374 = vmatpush3.bf16.msra.mxu0 %v11145_v49  ;;  %v1298_v49 = vpack.c.bf16 %v13215_v48, %v13215_v48 }
 0x139   :  { %10403 = vmatprep.subr.bf16.mxu0 %v11148_v59  ;;  %v11186_v59 = vld [vmem:[%s16121_s1 + $0x5c8] sm:$0xff]  }
 0x13a   :  { %10396 = vmatpush3.bf16.msra.mxu1 %v11147_v55  ;;  %v11184_v55 = vld [vmem:[%s16121_s1 + $0x548] sm:$0xff]  }
 0x13b   :  { %5919 = vmatmul.mubr.bf16.vlgmr.msra.gmra.mrb[12].mxu0 %v1292_v58  ;;  %10425 = vmatprep.subr.bf16.mxu1 %v11150_v2  ;;  %v11185_v58 = vld [vmem:[%s16121_s1 + $0x508] sm:$0xff]   ;;  %v11190_v2 = vld [vmem:[%s16121_s1 + $0x5d0] sm:$0xff]  }
 0x13c   :  { %10404 = vmatpush3.bf16.msra.mxu0 %v11149_v63  ;;  %5998 = vmatprep.mubr.bf16.mxu0 %v1297_v40  ;;  %v11188_v63 = vld [vmem:[%s16121_s1 + $0x550] sm:$0xff]   ;;  %v11213_v40 = vld [vmem:[%s16121_s1 + $0x600] sm:$0xff]  }
 0x13d   :  { %5959 = vmatmul.mubr.bf16.vlgmr.msra.gmra.mrb[12].mxu1 %v1294_v1  ;;  %10405 = vmatprep.subr.bf16.mxu0 %v11152_v4  ;;  %v11189_v1 = vld [vmem:[%s16121_s1 + $0x510] sm:$0xff]   ;;  %v11192_v4 = vld [vmem:[%s16121_s1 + $0x558] sm:$0xff]  }
 0x13e   :  { %10426 = vmatpush3.bf16.msra.mxu1 %v11151_v3  ;;  %6038 = vmatprep.mubr.bf16.mxu1 %v1299_v46  ;;  %v11191_v3 = vld [vmem:[%s16121_s1 + $0x590] sm:$0xff]   ;;  %v11215_v46 = vld [vmem:[%s16121_s1 + $0x680] sm:$0xff]  }
 0x13f   :  { %10427 = vmatprep.subr.bf16.mxu1 %v11154_v6  ;;  %v11194_v6 = vld [vmem:[%s16121_s1 + $0x5d8] sm:$0xff]  }
 0x140   :  { %10406 = vmatpush3.bf16.msra.mxu0 %v11153_v5  ;;  %v11193_v5 = vld [vmem:[%s16121_s1 + $0x518] sm:$0xff]  }
 0x141   :  { %10407 = vmatprep.subr.bf16.mxu0 %v11156_v9  ;;  %v11196_v9 = vld [vmem:[%s16121_s1 + $0x560] sm:$0xff]  }
 0x142   :  { %10428 = vmatpush3.bf16.msra.mxu1 %v11155_v8  ;;  %v11195_v8 = vld [vmem:[%s16121_s1 + $0x598] sm:$0xff]  }
 0x143   :  { %10429 = vmatprep.subr.bf16.mxu1 %v11158_v12  ;;  %v11198_v12 = vld [vmem:[%s16121_s1 + $0x5e0] sm:$0xff]  }
 0x144   :  { %10408 = vmatpush3.bf16.msra.mxu0 %v11157_v11  ;;  %v11197_v11 = vld [vmem:[%s16121_s1 + $0x520] sm:$0xff]  }
 0x145   :  { %10409 = vmatprep.subr.bf16.mxu0 %v11160_v15  ;;  %v11200_v15 = vld [vmem:[%s16121_s1 + $0x568] sm:$0xff]  }
 0x146   :  { %10430 = vmatpush3.bf16.msra.mxu1 %v11159_v14  ;;  %v11199_v14 = vld [vmem:[%s16121_s1 + $0x5a0] sm:$0xff]  }
 0x147   :  { %10431 = vmatprep.subr.bf16.mxu1 %v11162_v18  ;;  %v11202_v18 = vld [vmem:[%s16121_s1 + $0x5e8] sm:$0xff]  }
 0x148   :  { %10410 = vmatpush3.bf16.msra.mxu0 %v11161_v17  ;;  %v11201_v17 = vld [vmem:[%s16121_s1 + $0x528] sm:$0xff]  }
 0x149   :  { %10411 = vmatprep.subr.bf16.mxu0 %v11164_v20  ;;  %v11204_v20 = vld [vmem:[%s16121_s1 + $0x570] sm:$0xff]  }
 0x14a   :  { %10432 = vmatpush3.bf16.msra.mxu1 %v11163_v19  ;;  %v11203_v19 = vld [vmem:[%s16121_s1 + $0x5a8] sm:$0xff]  }
 0x14b   :  { %10433 = vmatprep.subr.bf16.mxu1 %v11166_v22  ;;  %v11206_v22 = vld [vmem:[%s16121_s1 + $0x5f0] sm:$0xff]  }
 0x14c   :  { %10412 = vmatpush3.bf16.msra.mxu0 %v11165_v21  ;;  %v11205_v21 = vld [vmem:[%s16121_s1 + $0x530] sm:$0xff]  }
 0x14d   :  { %10413 = vmatprep.subr.bf16.mxu0 %v11168_v24  ;;  %v11208_v24 = vld [vmem:[%s16121_s1 + $0x578] sm:$0xff]  }
 0x14e   :  { %10434 = vmatpush3.bf16.msra.mxu1 %v11167_v23  ;;  %v11207_v23 = vld [vmem:[%s16121_s1 + $0x5b0] sm:$0xff]  }
 0x14f   :  { %10435 = vmatprep.subr.bf16.mxu1 %v11170_v26  ;;  %v11210_v26 = vld [vmem:[%s16121_s1 + $0x5f8] sm:$0xff]  }
 0x150   :  { %10414 = vmatpush3.bf16.msra.mxu0 %v11169_v25  ;;  %v11209_v25 = vld [vmem:[%s16121_s1 + $0x538] sm:$0xff]  }
 0x151   :  { %10415 = vmatprep.subr.bf16.mxu0 %v11172_v29 }
 0x152   :  { %10436 = vmatpush3.bf16.msra.mxu1 %v11171_v28  ;;  %v13309_v28 = vld [vmem:[%s16120_s0 + $0xa8] sm:$0xff] }
 0x153   :  { %10437 = vmatprep.subr.bf16.mxu1 %v11174_v32  ;;  %16238 = vst [vmem:[#allocation16_spill] sm:$0xff] %v13309_v28  ;;  %v1301_v29 = vpack.c.bf16 %v13309_v28, %v13309_v28  ;;  %v13319_v32 = vld [vmem:[%s16120_s0 + $0xa0] sm:$0xff] }
 0x154   :  { %10416 = vmatpush3.bf16.msra.mxu0 %v11173_v31  ;;  %v11211_v31 = vld [vmem:[%s16121_s1 + $0x5b8] sm:$0xff]   ;;  %16239 = vst [vmem:[#allocation17_spill] sm:$0xff] %v13319_v32 }
 0x155   :  { %10417 = vmatprep.subr.bf16.mxu0 %v11176_v35  ;;  %v11212_v35 = vld [vmem:[%s16121_s1 + $0x640] sm:$0xff]  }
 0x156   :  { %10438 = vmatpush3.bf16.msra.mxu1 %v11175_v34  ;;  %v1300_v34 = vpack.c.bf16 %v13319_v32, %v13319_v32 }
 0x157   :  { %10439 = vmatprep.subr.bf16.mxu1 %v11178_v38 }
 0x158   :  { %10418 = vmatpush3.bf16.msra.mxu0 %v11177_v37  ;;  %v13329_v37 = vld [vmem:[%s16120_s0 + $0xb8] sm:$0xff] }
 0x159   :  { %10447 = vmatprep.subr.bf16.mxu0 %v11180_v44  ;;  %16240 = vst [vmem:[#allocation18_spill] sm:$0xff] %v13329_v37  ;;  %v1303_v38 = vpack.c.bf16 %v13329_v37, %v13329_v37  ;;  %v11214_v44 = vld [vmem:[%s16121_s1 + $0x6c0] sm:$0xff]  }
 0x15a   :  { %10440 = vmatpush3.bf16.msra.mxu1 %v11179_v41  ;;  %v13339_v41 = vld [vmem:[%s16120_s0 + $0xb0] sm:$0xff] }
 0x15b   :  { %5999 = vmatmul.mubr.bf16.vlgmr.msra.gmra.mrb[16].mxu0 %v1296_v43  ;;  %10469 = vmatprep.subr.bf16.mxu1 %v11182_v50  ;;  %16241 = vst [vmem:[#allocation19_spill] sm:$0xff] %v13339_v41  ;;  %v1302_v43 = vpack.c.bf16 %v13339_v41, %v13339_v41  ;;  %v11218_v50 = vld [vmem:[%s16121_s1 + $0x6c8] sm:$0xff]  }
 0x15c   :  { %10448 = vmatpush3.bf16.msra.mxu0 %v11181_v47  ;;  %6078 = vmatprep.mubr.bf16.mxu0 %v1301_v29  ;;  %v11216_v47 = vld [vmem:[%s16121_s1 + $0x648] sm:$0xff]  }
 0x15d   :  { %6039 = vmatmul.mubr.bf16.vlgmr.msra.gmra.mrb[16].mxu1 %v1298_v49  ;;  %10449 = vmatprep.subr.bf16.mxu0 %v11184_v55  ;;  %v11217_v49 = vld [vmem:[%s16121_s1 + $0x608] sm:$0xff]   ;;  %v11220_v55 = vld [vmem:[%s16121_s1 + $0x650] sm:$0xff]  }
 0x15e   :  { %10470 = vmatpush3.bf16.msra.mxu1 %v11183_v53  ;;  %6118 = vmatprep.mubr.bf16.mxu1 %v1303_v38  ;;  %v11219_v53 = vld [vmem:[%s16121_s1 + $0x688] sm:$0xff]   ;;  %v11245_v38 = vld [vmem:[%s16121_s1 + $0x700] sm:$0xff]  }
 0x15f   :  { %10471 = vmatprep.subr.bf16.mxu1 %v11186_v59  ;;  %v11222_v59 = vld [vmem:[%s16121_s1 + $0x6d0] sm:$0xff]  }
 0x160   :  { %10450 = vmatpush3.bf16.msra.mxu0 %v11185_v58  ;;  %v11221_v58 = vld [vmem:[%s16121_s1 + $0x610] sm:$0xff]  }
 0x161   :  { %10451 = vmatprep.subr.bf16.mxu0 %v11188_v63  ;;  %v11224_v63 = vld [vmem:[%s16121_s1 + $0x658] sm:$0xff]  }
 0x162   :  { %10472 = vmatpush3.bf16.msra.mxu1 %v11187_v62  ;;  %v11223_v62 = vld [vmem:[%s16121_s1 + $0x690] sm:$0xff]  }
 0x163   :  { %10473 = vmatprep.subr.bf16.mxu1 %v11190_v2  ;;  %v11226_v2 = vld [vmem:[%s16121_s1 + $0x6d8] sm:$0xff]  }
 0x164   :  { %10452 = vmatpush3.bf16.msra.mxu0 %v11189_v1  ;;  %v11225_v1 = vld [vmem:[%s16121_s1 + $0x618] sm:$0xff]  }
 0x165   :  { %10453 = vmatprep.subr.bf16.mxu0 %v11192_v4  ;;  %v11228_v4 = vld [vmem:[%s16121_s1 + $0x660] sm:$0xff]  }
 0x166   :  { %10474 = vmatpush3.bf16.msra.mxu1 %v11191_v3  ;;  %v11227_v3 = vld [vmem:[%s16121_s1 + $0x698] sm:$0xff]  }
 0x167   :  { %10475 = vmatprep.subr.bf16.mxu1 %v11194_v6  ;;  %v11230_v6 = vld [vmem:[%s16121_s1 + $0x6e0] sm:$0xff]  }
 0x168   :  { %10454 = vmatpush3.bf16.msra.mxu0 %v11193_v5  ;;  %v11229_v5 = vld [vmem:[%s16121_s1 + $0x620] sm:$0xff]  }
 0x169   :  { %10455 = vmatprep.subr.bf16.mxu0 %v11196_v9  ;;  %v11232_v9 = vld [vmem:[%s16121_s1 + $0x668] sm:$0xff]  }
 0x16a   :  { %10476 = vmatpush3.bf16.msra.mxu1 %v11195_v8  ;;  %v11231_v8 = vld [vmem:[%s16121_s1 + $0x6a0] sm:$0xff]  }
 0x16b   :  { %10477 = vmatprep.subr.bf16.mxu1 %v11198_v12  ;;  %v11234_v12 = vld [vmem:[%s16121_s1 + $0x6e8] sm:$0xff]  }
 0x16c   :  { %10456 = vmatpush3.bf16.msra.mxu0 %v11197_v11  ;;  %v11233_v11 = vld [vmem:[%s16121_s1 + $0x628] sm:$0xff]  }
 0x16d   :  { %10457 = vmatprep.subr.bf16.mxu0 %v11200_v15  ;;  %v11236_v15 = vld [vmem:[%s16121_s1 + $0x670] sm:$0xff]  }
 0x16e   :  { %10478 = vmatpush3.bf16.msra.mxu1 %v11199_v14  ;;  %v11235_v14 = vld [vmem:[%s16121_s1 + $0x6a8] sm:$0xff]  }
 0x16f   :  { %10479 = vmatprep.subr.bf16.mxu1 %v11202_v18  ;;  %v11238_v18 = vld [vmem:[%s16121_s1 + $0x6f0] sm:$0xff]  }
 0x170   :  { %10458 = vmatpush3.bf16.msra.mxu0 %v11201_v17  ;;  %v11237_v17 = vld [vmem:[%s16121_s1 + $0x630] sm:$0xff]  }
 0x171   :  { %10459 = vmatprep.subr.bf16.mxu0 %v11204_v20  ;;  %v11240_v20 = vld [vmem:[%s16121_s1 + $0x678] sm:$0xff]  }
 0x172   :  { %10480 = vmatpush3.bf16.msra.mxu1 %v11203_v19  ;;  %v11239_v19 = vld [vmem:[%s16121_s1 + $0x6b0] sm:$0xff]  }
 0x173   :  { %10481 = vmatprep.subr.bf16.mxu1 %v11206_v22  ;;  %v11242_v22 = vld [vmem:[%s16121_s1 + $0x6f8] sm:$0xff]  }
 0x174   :  { %10460 = vmatpush3.bf16.msra.mxu0 %v11205_v21  ;;  %v11241_v21 = vld [vmem:[%s16121_s1 + $0x638] sm:$0xff]  }
 0x175   :  { %10461 = vmatprep.subr.bf16.mxu0 %v11208_v24 }
 0x176   :  { %10482 = vmatpush3.bf16.msra.mxu1 %v11207_v23  ;;  %v13433_v23 = vld [vmem:[%s16120_s0 + $0xc8] sm:$0xff] }
 0x177   :  { %10483 = vmatprep.subr.bf16.mxu1 %v11210_v26  ;;  %16242 = vst [vmem:[#allocation20_spill] sm:$0xff] %v13433_v23  ;;  %v1305_v24 = vpack.c.bf16 %v13433_v23, %v13433_v23  ;;  %v13443_v26 = vld [vmem:[%s16120_s0 + $0xc0] sm:$0xff] }
 0x178   :  { %10462 = vmatpush3.bf16.msra.mxu0 %v11209_v25  ;;  %v11243_v25 = vld [vmem:[%s16121_s1 + $0x6b8] sm:$0xff]   ;;  %16243 = vst [vmem:[#allocation21_spill] sm:$0xff] %v13443_v26  ;;  %v1304_v29 = vpack.c.bf16 %v13443_v26, %v13443_v26 }
 0x179   :  { %10491 = vmatprep.subr.bf16.mxu0 %v11212_v35 }
 0x17a   :  { %10484 = vmatpush3.bf16.msra.mxu1 %v11211_v31  ;;  %v11244_v31 = vld [vmem:[%s16121_s1 + $0x740] sm:$0xff]  }
 0x17b   :  { %6079 = vmatmul.mubr.bf16.vlgmr.msra.gmra.mrb[20].mxu0 %v1300_v34  ;;  %10513 = vmatprep.subr.bf16.mxu1 %v11214_v44  ;;  %v13453_v34 = vld [vmem:[%s16120_s0 + $0xd8] sm:$0xff]  ;;  %v11246_v44 = vld [vmem:[%s16121_s1 + $0x7c0] sm:$0xff]  }
 0x17c   :  { %10492 = vmatpush3.bf16.msra.mxu0 %v11213_v40  ;;  %6158 = vmatprep.mubr.bf16.mxu0 %v1305_v24  ;;  %16244 = vst [vmem:[#allocation22_spill] sm:$0xff] %v13453_v34  ;;  %v1307_v35 = vpack.c.bf16 %v13453_v34, %v13453_v34  ;;  %v13463_v40 = vld [vmem:[%s16120_s0 + $0xd0] sm:$0xff] }
 0x17d   :  { %6119 = vmatmul.mubr.bf16.vlgmr.msra.gmra.mrb[20].mxu1 %v1302_v43  ;;  %10493 = vmatprep.subr.bf16.mxu0 %v11216_v47  ;;  %16245 = vst [vmem:[#allocation23_spill] sm:$0xff] %v13463_v40  ;;  %v1306_v43 = vpack.c.bf16 %v13463_v40, %v13463_v40  ;;  %v11248_v47 = vld [vmem:[%s16121_s1 + $0x748] sm:$0xff]  }
 0x17e   :  { %10514 = vmatpush3.bf16.msra.mxu1 %v11215_v46  ;;  %6198 = vmatprep.mubr.bf16.mxu1 %v1307_v35  ;;  %v11247_v46 = vld [vmem:[%s16121_s1 + $0x780] sm:$0xff]   ;;  %v11266_v35 = vld [vmem:[%s16121_s1 + $0x7e8] sm:$0xff]  }
 0x17f   :  { %10515 = vmatprep.subr.bf16.mxu1 %v11218_v50  ;;  %v11250_v50 = vld [vmem:[%s16121_s1 + $0x7c8] sm:$0xff]  }
 0x180   :  { %10494 = vmatpush3.bf16.msra.mxu0 %v11217_v49  ;;  %v11249_v49 = vld [vmem:[%s16121_s1 + $0x708] sm:$0xff]  }
 0x181   :  { %10495 = vmatprep.subr.bf16.mxu0 %v11220_v55  ;;  %v11252_v55 = vld [vmem:[%s16121_s1 + $0x750] sm:$0xff]  }
 0x182   :  { %10516 = vmatpush3.bf16.msra.mxu1 %v11219_v53  ;;  %v11251_v53 = vld [vmem:[%s16121_s1 + $0x788] sm:$0xff]  }
 0x183   :  { %10517 = vmatprep.subr.bf16.mxu1 %v11222_v59  ;;  %v11254_v59 = vld [vmem:[%s16121_s1 + $0x7d0] sm:$0xff]  }
 0x184   :  { %10496 = vmatpush3.bf16.msra.mxu0 %v11221_v58  ;;  %v11253_v58 = vld [vmem:[%s16121_s1 + $0x710] sm:$0xff]  }
 0x185   :  { %10497 = vmatprep.subr.bf16.mxu0 %v11224_v63  ;;  %v11256_v63 = vld [vmem:[%s16121_s1 + $0x758] sm:$0xff]  }
 0x186   :  { %10518 = vmatpush3.bf16.msra.mxu1 %v11223_v62  ;;  %v11255_v62 = vld [vmem:[%s16121_s1 + $0x790] sm:$0xff]  }
 0x187   :  { %10519 = vmatprep.subr.bf16.mxu1 %v11226_v2  ;;  %v11257_v2 = vld [vmem:[%s16121_s1 + $0x718] sm:$0xff]  }
 0x188   :  { %10498 = vmatpush3.bf16.msra.mxu0 %v11225_v1 }
 0x189   :  { %10499 = vmatprep.subr.bf16.mxu0 %v11228_v4  ;;  %v11258_v4 = vld [vmem:[%s16121_s1 + $0x7d8] sm:$0xff]  }
 0x18a   :  { %10520 = vmatpush3.bf16.msra.mxu1 %v11227_v3 }
 0x18b   :  { %10521 = vmatprep.subr.bf16.mxu1 %v11230_v6 }
 0x18c   :  { %10500 = vmatpush3.bf16.msra.mxu0 %v11229_v5 }
 0x18d   :  { %10501 = vmatprep.subr.bf16.mxu0 %v11232_v9 }
 0x18e   :  { %10522 = vmatpush3.bf16.msra.mxu1 %v11231_v8  ;;  %v11259_v8 = vld [vmem:[%s16121_s1 + $0x798] sm:$0xff]  }
 0x18f   :  { %10523 = vmatprep.subr.bf16.mxu1 %v11234_v12 }
 0x190   :  { %10502 = vmatpush3.bf16.msra.mxu0 %v11233_v11  ;;  %v11260_v11 = vld [vmem:[%s16121_s1 + $0x760] sm:$0xff]  }
 0x191   :  { %10503 = vmatprep.subr.bf16.mxu0 %v11236_v15 }
 0x192   :  { %10524 = vmatpush3.bf16.msra.mxu1 %v11235_v14  ;;  %v11261_v14 = vld [vmem:[%s16121_s1 + $0x720] sm:$0xff]  }
 0x193   :  { %10525 = vmatprep.subr.bf16.mxu1 %v11238_v18 }
 0x194   :  { %10504 = vmatpush3.bf16.msra.mxu0 %v11237_v17  ;;  %v11262_v17 = vld [vmem:[%s16121_s1 + $0x7e0] sm:$0xff]  }
 0x195   :  { %10505 = vmatprep.subr.bf16.mxu0 %v11240_v20  ;;  %v11263_v20 = vld [vmem:[%s16121_s1 + $0x7a0] sm:$0xff]  }
 0x196   :  { %10526 = vmatpush3.bf16.msra.mxu1 %v11239_v19 }
 0x197   :  { %10527 = vmatprep.subr.bf16.mxu1 %v11242_v22 }
 0x198   :  { %10506 = vmatpush3.bf16.msra.mxu0 %v11241_v21  ;;  %v9651_v21 = vld [vmem:[%s16122_s2] ss:$0 sm:$0xff] }
 0x199   :  { %10535 = vmatprep.subr.bf16.mxu0 %v11244_v31 }
 0x19a   :  { %10528 = vmatpush3.bf16.msra.mxu1 %v11243_v25  ;;  %v11264_v25 = vld [vmem:[%s16121_s1 + $0x768] sm:$0xff]  }
 0x19b   :  { %6159 = vmatmul.mubr.bf16.vlgmr.msra.gmra.mrb[24].mxu0 %v1304_v29  ;;  %10557 = vmatprep.subr.bf16.mxu1 %v11246_v44  ;;  %v11265_v29 = vld [vmem:[%s16121_s1 + $0x728] sm:$0xff]   ;;  %v11269_v44 = vld [vmem:[%s16121_s1 + $0x730] sm:$0xff]  }
 0x19c   :  { %10536 = vmatpush3.bf16.msra.mxu0 %v11245_v38  ;;  %v11267_v38 = vld [vmem:[%s16121_s1 + $0x7a8] sm:$0xff]  }
 0x19d   :  { %6199 = vmatmul.mubr.bf16.vlgmr.msra.gmra.mrb[24].mxu1 %v1306_v43  ;;  %10537 = vmatprep.subr.bf16.mxu0 %v11248_v47  ;;  %v11268_v43 = vld [vmem:[%s16121_s1 + $0x770] sm:$0xff]  }
 0x19e   :  { %10558 = vmatpush3.bf16.msra.mxu1 %v11247_v46  ;;  %v11270_v46 = vld [vmem:[%s16121_s1 + $0x7f0] sm:$0xff]  }
 0x19f   :  { %10559 = vmatprep.subr.bf16.mxu1 %v11250_v50  ;;  %v11271_v47 = vld [vmem:[%s16121_s1 + $0x7b0] sm:$0xff]   ;;  %v11273_v50 = vld [vmem:[%s16121_s1 + $0x738] sm:$0xff]  }
 0x1a0   :  { %10538 = vmatpush3.bf16.msra.mxu0 %v11249_v49  ;;  %v11272_v49 = vld [vmem:[%s16121_s1 + $0x778] sm:$0xff]  }
 0x1a1   :  { %10539 = vmatprep.subr.bf16.mxu0 %v11252_v55  ;;  %v13562_v55 = vld [vmem:[%s16120_s0 + $0xe8] sm:$0xff] }
 0x1a2   :  { %10560 = vmatpush3.bf16.msra.mxu1 %v11251_v53  ;;  %v11274_v53 = vld [vmem:[%s16121_s1 + $0x7f8] sm:$0xff]   ;;  %16246 = vst [vmem:[#allocation24_spill] sm:$0xff] %v13562_v55 }
 0x1a3   :  { %10561 = vmatprep.subr.bf16.mxu1 %v11254_v59  ;;  %v11275_v59 = vld [vmem:[%s16121_s1 + $0x7b8] sm:$0xff]  }
 0x1a4   :  { %10540 = vmatpush3.bf16.msra.mxu0 %v11253_v58  ;;  %v1309_v58 = vpack.c.bf16 %v13562_v55, %v13562_v55 }
 0x1a5   :  { %10541 = vmatprep.subr.bf16.mxu0 %v11256_v63 }
 0x1a6   :  { %10562 = vmatpush3.bf16.msra.mxu1 %v11255_v62  ;;  %v13572_v62 = vld [vmem:[%s16120_s0 + $0xe0] sm:$0xff]  ;;  %6238 = vmatprep.mubr.bf16.mxu0 %v1309_v58 }
 0x1a7   :  { %10563 = vmatprep.subr.bf16.mxu1 %v11258_v4  ;;  %16247 = vst [vmem:[#allocation25_spill] sm:$0xff] %v13572_v62  ;;  %v1308_v63 = vpack.c.bf16 %v13572_v62, %v13572_v62  ;;  %v11277_v4 = vld [vmem:[%s16121_s1 + $0x800] sm:$0xff]  }
 0x1a8   :  { %10542 = vmatpush3.bf16.msra.mxu0 %v11257_v2  ;;  %v13582_v2 = vld [vmem:[%s16120_s0 + $0xf8] sm:$0xff]  ;;  %v11294_v58 = vld [vmem:[%s16121_s1 + $0x8e0] sm:$0xff]  }
 0x1a9   :  { %10543 = vmatprep.subr.bf16.mxu0 %v11260_v11  ;;  %16248 = vst [vmem:[#allocation26_spill] sm:$0xff] %v13582_v2  ;;  %v11280_v11 = vld [vmem:[%s16121_s1 + $0x848] sm:$0xff]  }
 0x1aa   :  { %10564 = vmatpush3.bf16.msra.mxu1 %v11259_v8  ;;  %v11278_v8 = vld [vmem:[%s16121_s1 + $0x8c0] sm:$0xff]  }
 0x1ab   :  { %10565 = vmatprep.subr.bf16.mxu1 %v11262_v17  ;;  %v11284_v17 = vld [vmem:[%s16121_s1 + $0x850] sm:$0xff]  }
 0x1ac   :  { %10544 = vmatpush3.bf16.msra.mxu0 %v11261_v14  ;;  %v11282_v14 = vld [vmem:[%s16121_s1 + $0x8c8] sm:$0xff]  }
 0x1ad   :  { %10545 = vmatprep.subr.bf16.mxu0 %v11264_v25 }
 0x1ae   :  { %v10243_v1 = vpop.f32.mrb[0].mxu0  ;;  %10566 = vmatpush3.bf16.msra.mxu1 %v11263_v20  ;;  %v11287_v20 = vld [vmem:[%s16121_s1 + $0x890] sm:$0xff]  }
 0x1af   :  { %v10244_v3 = vpop.f32.mrb[1].mxu0  ;;  %10567 = vmatprep.subr.bf16.mxu1 %v11266_v35 }
 0x1b0   :  { %v10245_v5 = vadd.f32 %v10244_v3, %v10243_v1  ;;  %v10246_v6 = vpop.f32.mrb[2].mxu0  ;;  %v10265_v9 = vpop.f32.mrb[0].mxu1  ;;  %10546 = vmatpush3.bf16.msra.mxu0 %v11265_v29  ;;  %v11276_v1 = vld [vmem:[%s16121_s1 + $0x840] sm:$0xff]   ;;  %v1311_v3 = vpack.c.bf16 %v13582_v2, %v13582_v2  ;;  %v11290_v29 = vld [vmem:[%s16121_s1 + $0x8d8] sm:$0xff]  }
 0x1b1   :  { %v10247_v12 = vpop.f32.mrb[3].mxu0  ;;  %v10266_v15 = vpop.f32.mrb[1].mxu1  ;;  %10547 = vmatprep.subr.bf16.mxu0 %v11268_v43  ;;  %v11291_v43 = vld [vmem:[%s16121_s1 + $0x898] sm:$0xff]  }
 0x1b2   :  { %v10267_v18 = vadd.f32 %v10266_v15, %v10265_v9  ;;  %v10268_v19 = vpop.f32.mrb[2].mxu1  ;;  %v5681_v24 = vadd.f32 %v10245_v5, %v9651_v21  ;;  %10568 = vmatpush3.bf16.msra.mxu1 %v11267_v38  ;;  %v13592_v5 = vld [vmem:[%s16120_s0 + $0xf0] sm:$0xff]  ;;  %6278 = vmatprep.mubr.bf16.mxu1 %v1311_v3  ;;  %v11279_v9 = vld [vmem:[%s16121_s1 + $0x880] sm:$0xff]   ;;  %v11281_v12 = vld [vmem:[%s16121_s1 + $0x808] sm:$0xff]  }
 0x1b3   :  { %v10269_v22 = vpop.f32.mrb[3].mxu1  ;;  %10569 = vmatprep.subr.bf16.mxu1 %v11270_v46  ;;  %16249 = vst [vmem:[#allocation27_spill] sm:$0xff] %v13592_v5  ;;  %v1310_v6 = vpack.c.bf16 %v13592_v5, %v13592_v5  ;;  %v11283_v15 = vld [vmem:[%s16121_s1 + $0x888] sm:$0xff]   ;;  %v11286_v19 = vld [vmem:[%s16121_s1 + $0x8d0] sm:$0xff]   ;;  %v11288_v21 = vld [vmem:[%s16121_s1 + $0x858] sm:$0xff]  }
 0x1b4   :  { %v13530_v31 = vadd.f32 %v10267_v18, %v5681_v24  ;;  %10548 = vmatpush3.bf16.msra.mxu0 %v11269_v44  ;;  %v11285_v18 = vld [vmem:[%s16121_s1 + $0x810] sm:$0xff]   ;;  %v11289_v24 = vld [vmem:[%s16121_s1 + $0x818] sm:$0xff]   ;;  %v11292_v46 = vld [vmem:[%s16121_s1 + $0x860] sm:$0xff]  }
 0x1b5   :  { %10549 = vmatprep.subr.bf16.mxu0 %v11272_v49  ;;  %v11296_v3 = vld [vmem:[%s16121_s1 + $0x868] sm:$0xff]  }
 0x1b6   :  { %10570 = vmatpush3.bf16.msra.mxu1 %v11271_v47 }
 0x1b7   :  { %10571 = vmatprep.subr.bf16.mxu1 %v11274_v53 }
 0x1b8   :  { %10550 = vmatpush3.bf16.msra.mxu0 %v11273_v50  ;;  %v11293_v50 = vld [vmem:[%s16121_s1 + $0x820] sm:$0xff]  }
 0x1b9   :  { %10579 = vmatprep.subr.bf16.mxu0 %v11276_v1  ;;  %v11295_v1 = vld [vmem:[%s16121_s1 + $0x8a0] sm:$0xff]  }
 0x1ba   :  { %10572 = vmatpush3.bf16.msra.mxu1 %v11275_v59 }
 0x1bb   :  { %6239 = vmatmul.mubr.bf16.vlgmr.msra.gmra.mrb[28].mxu0 %v1308_v63  ;;  %10601 = vmatprep.subr.bf16.mxu1 %v11278_v8  ;;  %v11298_v8 = vld [vmem:[%s16121_s1 + $0x8e8] sm:$0xff]  }
 0x1bc   :  { %10580 = vmatpush3.bf16.msra.mxu0 %v11277_v4 }
 0x1bd   :  { %6279 = vmatmul.mubr.bf16.vlgmr.msra.gmra.mrb[28].mxu1 %v1310_v6  ;;  %10581 = vmatprep.subr.bf16.mxu0 %v11280_v11  ;;  %v11297_v6 = vld [vmem:[%s16121_s1 + $0x828] sm:$0xff]   ;;  %v11300_v11 = vld [vmem:[%s16121_s1 + $0x870] sm:$0xff]  }
 0x1be   :  { %10602 = vmatpush3.bf16.msra.mxu1 %v11279_v9  ;;  %v11299_v9 = vld [vmem:[%s16121_s1 + $0x8a8] sm:$0xff]  }
 0x1bf   :  { %10603 = vmatprep.subr.bf16.mxu1 %v11282_v14  ;;  %v11302_v14 = vld [vmem:[%s16121_s1 + $0x8f0] sm:$0xff]  }
 0x1c0   :  { %10582 = vmatpush3.bf16.msra.mxu0 %v11281_v12  ;;  %v11301_v12 = vld [vmem:[%s16121_s1 + $0x830] sm:$0xff]  }
 0x1c1   :  { %10583 = vmatprep.subr.bf16.mxu0 %v11284_v17  ;;  %v11304_v17 = vld [vmem:[%s16121_s1 + $0x878] sm:$0xff]  }
 0x1c2   :  { %10604 = vmatpush3.bf16.msra.mxu1 %v11283_v15  ;;  %v11303_v15 = vld [vmem:[%s16121_s1 + $0x8b0] sm:$0xff]  }
 0x1c3   :  { %10605 = vmatprep.subr.bf16.mxu1 %v11286_v19  ;;  %v11306_v19 = vld [vmem:[%s16121_s1 + $0x8f8] sm:$0xff]  }
 0x1c4   :  { %10584 = vmatpush3.bf16.msra.mxu0 %v11285_v18  ;;  %v11305_v18 = vld [vmem:[%s16121_s1 + $0x838] sm:$0xff]  }
 0x1c5   :  { %10585 = vmatprep.subr.bf16.mxu0 %v11288_v21 }
 0x1c6   :  { %10606 = vmatpush3.bf16.msra.mxu1 %v11287_v20  ;;  %v13689_v20 = vld [vmem:[%s16120_s0 + $0x108] sm:$0xff] }
 0x1c7   :  { %10607 = vmatprep.subr.bf16.mxu1 %v11290_v29  ;;  %16250 = vst [vmem:[#allocation28_spill] sm:$0xff] %v13689_v20  ;;  %v1313_v21 = vpack.c.bf16 %v13689_v20, %v13689_v20  ;;  %v11308_v29 = vld [vmem:[%s16121_s1 + $0x940] sm:$0xff]  }
 0x1c8   :  { %10586 = vmatpush3.bf16.msra.mxu0 %v11289_v24  ;;  %v13699_v24 = vld [vmem:[%s16120_s0 + $0x100] sm:$0xff] }
 0x1c9   :  { %10587 = vmatprep.subr.bf16.mxu0 %v11292_v46  ;;  %16251 = vst [vmem:[#allocation29_spill] sm:$0xff] %v13699_v24  ;;  %6318 = vmatprep.mubr.bf16.mxu0 %v1313_v21 }
 0x1ca   :  { %10608 = vmatpush3.bf16.msra.mxu1 %v11291_v43  ;;  %v11309_v43 = vld [vmem:[%s16121_s1 + $0x900] sm:$0xff]  }
 0x1cb   :  { %10609 = vmatprep.subr.bf16.mxu1 %v11294_v58  ;;  %v11314_v58 = vld [vmem:[%s16121_s1 + $0x9c8] sm:$0xff]  }
 0x1cc   :  { %10588 = vmatpush3.bf16.msra.mxu0 %v11293_v50  ;;  %v11312_v50 = vld [vmem:[%s16121_s1 + $0x948] sm:$0xff]  }
 0x1cd   :  { %10589 = vmatprep.subr.bf16.mxu0 %v11296_v3  ;;  %v11319_v3 = vld [vmem:[%s16121_s1 + $0x990] sm:$0xff]  }
 0x1ce   :  { %v10287_v22 = vpop.f32.mrb[4].mxu0  ;;  %10610 = vmatpush3.bf16.msra.mxu1 %v11295_v1  ;;  %v11317_v1 = vld [vmem:[%s16121_s1 + $0x910] sm:$0xff]  }
 0x1cf   :  { %v10288_v25 = vpop.f32.mrb[5].mxu0  ;;  %10611 = vmatprep.subr.bf16.mxu1 %v11298_v8 }
 0x1d0   :  { %v10289_v35 = vadd.f32 %v10288_v25, %v10287_v22  ;;  %v10290_v38 = vpop.f32.mrb[6].mxu0  ;;  %v10309_v44 = vpop.f32.mrb[4].mxu1  ;;  %10590 = vmatpush3.bf16.msra.mxu0 %v11297_v6  ;;  %v11307_v22 = vld [vmem:[%s16121_s1 + $0x8b8] sm:$0xff]   ;;  %v1312_v25 = vpack.c.bf16 %v13699_v24, %v13699_v24 }
 0x1d1   :  { %v10291_v49 = vpop.f32.mrb[7].mxu0  ;;  %v10310_v53 = vpop.f32.mrb[5].mxu1  ;;  %10591 = vmatprep.subr.bf16.mxu0 %v11300_v11  ;;  %v11320_v6 = vld [vmem:[%s16121_s1 + $0x958] sm:$0xff]  }
 0x1d2   :  { %v5761_v47 = vadd.f32 %v10289_v35, %v13530_v31  ;;  %v10311_v59 = vadd.f32 %v10310_v53, %v10309_v44  ;;  %v10312_v63 = vpop.f32.mrb[6].mxu1  ;;  %10612 = vmatpush3.bf16.msra.mxu1 %v11299_v9  ;;  %v13709_v35 = vld [vmem:[%s16120_s0 + $0x118] sm:$0xff]  ;;  %v13719_v44 = vld [vmem:[%s16120_s0 + $0x110] sm:$0xff]  ;;  %v11311_v49 = vld [vmem:[%s16121_s1 + $0x980] sm:$0xff]  }
 0x1d3   :  { %v10313_v31 = vpop.f32.mrb[7].mxu1  ;;  %10613 = vmatprep.subr.bf16.mxu1 %v11302_v14  ;;  %16252 = vst [vmem:[#allocation30_spill] sm:$0xff] %v13709_v35  ;;  %v1315_v38 = vpack.c.bf16 %v13709_v35, %v13709_v35  ;;  %16253 = vst [vmem:[#allocation31_spill] sm:$0xff] %v13719_v44  ;;  %v1314_v46 = vpack.c.bf16 %v13719_v44, %v13719_v44  ;;  %v11313_v53 = vld [vmem:[%s16121_s1 + $0x908] sm:$0xff]   ;;  %v11316_v63 = vld [vmem:[%s16121_s1 + $0x950] sm:$0xff]  }
 0x1d4   :  { %v13654_v4 = vadd.f32 %v10311_v59, %v5761_v47  ;;  %10592 = vmatpush3.bf16.msra.mxu0 %v11301_v12  ;;  %v11310_v47 = vld [vmem:[%s16121_s1 + $0x9c0] sm:$0xff]   ;;  %v11315_v59 = vld [vmem:[%s16121_s1 + $0x988] sm:$0xff]   ;;  %v11318_v31 = vld [vmem:[%s16121_s1 + $0x9d0] sm:$0xff]  }
 0x1d5   :  { %10593 = vmatprep.subr.bf16.mxu0 %v11304_v17  ;;  %6358 = vmatprep.mubr.bf16.mxu1 %v1315_v38  ;;  %v11321_v9 = vld [vmem:[%s16121_s1 + $0x918] sm:$0xff]   ;;  %v11326_v38 = vld [vmem:[%s16121_s1 + $0x9e0] sm:$0xff]  }
 0x1d6   :  { %10614 = vmatpush3.bf16.msra.mxu1 %v11303_v15  ;;  %v11322_v12 = vld [vmem:[%s16121_s1 + $0x9d8] sm:$0xff]  }
 0x1d7   :  { %10615 = vmatprep.subr.bf16.mxu1 %v11306_v19  ;;  %v11323_v17 = vld [vmem:[%s16121_s1 + $0x998] sm:$0xff]   ;;  %v11324_v19 = vld [vmem:[%s16121_s1 + $0x960] sm:$0xff]  }
 0x1d8   :  { %10594 = vmatpush3.bf16.msra.mxu0 %v11305_v18 }
 0x1d9   :  { %10623 = vmatprep.subr.bf16.mxu0 %v11308_v29 }
 0x1da   :  { %10616 = vmatpush3.bf16.msra.mxu1 %v11307_v22 }
 0x1db   :  { %6319 = vmatmul.mubr.bf16.vlgmr.msra.gmra.mrb[32].mxu0 %v1312_v25  ;;  %10645 = vmatprep.subr.bf16.mxu1 %v11310_v47  ;;  %v11325_v25 = vld [vmem:[%s16121_s1 + $0x920] sm:$0xff]  }
 0x1dc   :  { %10624 = vmatpush3.bf16.msra.mxu0 %v11309_v43  ;;  %v11327_v47 = vld [vmem:[%s16121_s1 + $0x9a0] sm:$0xff]  }
 0x1dd   :  { %6359 = vmatmul.mubr.bf16.vlgmr.msra.gmra.mrb[32].mxu1 %v1314_v46  ;;  %10625 = vmatprep.subr.bf16.mxu0 %v11312_v50 }
 0x1de   :  { %10646 = vmatpush3.bf16.msra.mxu1 %v11311_v49  ;;  %v11328_v49 = vld [vmem:[%s16121_s1 + $0x968] sm:$0xff]  }
 0x1df   :  { %10647 = vmatprep.subr.bf16.mxu1 %v11314_v58  ;;  %v11330_v58 = vld [vmem:[%s16121_s1 + $0x9e8] sm:$0xff]  }
 0x1e0   :  { %10626 = vmatpush3.bf16.msra.mxu0 %v11313_v53  ;;  %v11329_v53 = vld [vmem:[%s16121_s1 + $0x928] sm:$0xff]  }
 0x1e1   :  { %10627 = vmatprep.subr.bf16.mxu0 %v11316_v63  ;;  %v11332_v63 = vld [vmem:[%s16121_s1 + $0x970] sm:$0xff]  }
 0x1e2   :  { %10648 = vmatpush3.bf16.msra.mxu1 %v11315_v59  ;;  %v11331_v59 = vld [vmem:[%s16121_s1 + $0x9a8] sm:$0xff]  }
 0x1e3   :  { %10649 = vmatprep.subr.bf16.mxu1 %v11318_v31  ;;  %v11334_v31 = vld [vmem:[%s16121_s1 + $0x9f0] sm:$0xff]  }
 0x1e4   :  { %10628 = vmatpush3.bf16.msra.mxu0 %v11317_v1  ;;  %v11333_v1 = vld [vmem:[%s16121_s1 + $0x930] sm:$0xff]  }
 0x1e5   :  { %10629 = vmatprep.subr.bf16.mxu0 %v11320_v6  ;;  %v11336_v6 = vld [vmem:[%s16121_s1 + $0x978] sm:$0xff]  }
 0x1e6   :  { %10650 = vmatpush3.bf16.msra.mxu1 %v11319_v3  ;;  %v11335_v3 = vld [vmem:[%s16121_s1 + $0x9b0] sm:$0xff]  }
 0x1e7   :  { %10651 = vmatprep.subr.bf16.mxu1 %v11322_v12 }
 0x1e8   :  { %10630 = vmatpush3.bf16.msra.mxu0 %v11321_v9  ;;  %v11338_v9 = vld [vmem:[%s16121_s1 + $0x9f8] sm:$0xff]  }
 0x1e9   :  { %10631 = vmatprep.subr.bf16.mxu0 %v11324_v19  ;;  %v13836_v19 = vld [vmem:[%s16120_s0 + $0x138] sm:$0xff] }
 0x1ea   :  { %10652 = vmatpush3.bf16.msra.mxu1 %v11323_v17  ;;  %16256 = vst [vmem:[#allocation34_spill] sm:$0xff] %v13836_v19 }
 0x1eb   :  { %10653 = vmatprep.subr.bf16.mxu1 %v11326_v38  ;;  %v11342_v38 = vld [vmem:[%s16121_s1 + $0xac0] sm:$0xff]  }
 0x1ec   :  { %10632 = vmatpush3.bf16.msra.mxu0 %v11325_v25  ;;  %v13846_v25 = vld [vmem:[%s16120_s0 + $0x130] sm:$0xff] }
 0x1ed   :  { %10633 = vmatprep.subr.bf16.mxu0 %v11328_v49  ;;  %16257 = vst [vmem:[#allocation35_spill] sm:$0xff] %v13846_v25  ;;  %v11347_v49 = vld [vmem:[%s16121_s1 + $0xa88] sm:$0xff]  }
 0x1ee   :  { %v10331_v8 = vpop.f32.mrb[8].mxu0  ;;  %10654 = vmatpush3.bf16.msra.mxu1 %v11327_v47  ;;  %v11345_v47 = vld [vmem:[%s16121_s1 + $0xa08] sm:$0xff]  }
 0x1ef   :  { %v10332_v11 = vpop.f32.mrb[9].mxu0  ;;  %10655 = vmatprep.subr.bf16.mxu1 %v11330_v58  ;;  %v11349_v58 = vld [vmem:[%s16121_s1 + $0xa10] sm:$0xff]  }
 0x1f0   :  { %v10333_v14 = vadd.f32 %v10332_v11, %v10331_v8  ;;  %v10334_v15 = vpop.f32.mrb[10].mxu0  ;;  %v10353_v18 = vpop.f32.mrb[8].mxu1  ;;  %10634 = vmatpush3.bf16.msra.mxu0 %v11329_v53  ;;  %v11337_v8 = vld [vmem:[%s16121_s1 + $0x938] sm:$0xff]   ;;  %v13816_v11 = vld [vmem:[%s16120_s0 + $0x128] sm:$0xff]  ;;  %v11348_v53 = vld [vmem:[%s16121_s1 + $0xa50] sm:$0xff]  }
 0x1f1   :  { %v10335_v22 = vpop.f32.mrb[11].mxu0  ;;  %v10354_v29 = vpop.f32.mrb[9].mxu1  ;;  %10635 = vmatprep.subr.bf16.mxu0 %v11332_v63  ;;  %16254 = vst [vmem:[#allocation32_spill] sm:$0xff] %v13816_v11  ;;  %v1317_v12 = vpack.c.bf16 %v13816_v11, %v13816_v11  ;;  %v13826_v15 = vld [vmem:[%s16120_s0 + $0x120] sm:$0xff]  ;;  %v11351_v63 = vld [vmem:[%s16121_s1 + $0xa90] sm:$0xff]  }
 0x1f2   :  { %v5841_v21 = vadd.f32 %v10333_v14, %v13654_v4  ;;  %v10355_v43 = vadd.f32 %v10354_v29, %v10353_v18  ;;  %v10356_v46 = vpop.f32.mrb[10].mxu1  ;;  %10656 = vmatpush3.bf16.msra.mxu1 %v11331_v59  ;;  %v11339_v14 = vld [vmem:[%s16121_s1 + $0x9b8] sm:$0xff]   ;;  %16255 = vst [vmem:[#allocation33_spill] sm:$0xff] %v13826_v15  ;;  %v1316_v17 = vpack.c.bf16 %v13826_v15, %v13826_v15  ;;  %v11340_v18 = vld [vmem:[%s16121_s1 + $0xa40] sm:$0xff]   ;;  %v11350_v59 = vld [vmem:[%s16121_s1 + $0xad0] sm:$0xff]  }
 0x1f3   :  { %v10357_v4 = vpop.f32.mrb[11].mxu1  ;;  %10657 = vmatprep.subr.bf16.mxu1 %v11334_v31  ;;  %6398 = vmatprep.mubr.bf16.mxu0 %v1317_v12  ;;  %v11341_v22 = vld [vmem:[%s16121_s1 + $0xa00] sm:$0xff]   ;;  %v1318_v29 = vpack.c.bf16 %v13846_v25, %v13846_v25  ;;  %v11344_v46 = vld [vmem:[%s16121_s1 + $0xa48] sm:$0xff]  }
 0x1f4   :  { %v13781_v50 = vadd.f32 %v10355_v43, %v5841_v21  ;;  %10636 = vmatpush3.bf16.msra.mxu0 %v11333_v1  ;;  %v1319_v21 = vpack.c.bf16 %v13836_v19, %v13836_v19  ;;  %v11343_v43 = vld [vmem:[%s16121_s1 + $0xa80] sm:$0xff]   ;;  %v11346_v4 = vld [vmem:[%s16121_s1 + $0xac8] sm:$0xff]   ;;  %v11352_v1 = vld [vmem:[%s16121_s1 + $0xa58] sm:$0xff]  }
 0x1f5   :  { %10637 = vmatprep.subr.bf16.mxu0 %v11336_v6 }
 0x1f6   :  { %10658 = vmatpush3.bf16.msra.mxu1 %v11335_v3  ;;  %6438 = vmatprep.mubr.bf16.mxu1 %v1319_v21  ;;  %v11353_v3 = vld [vmem:[%s16121_s1 + $0xa18] sm:$0xff]  }
 0x1f7   :  { %10659 = vmatprep.subr.bf16.mxu1 %v11338_v9 }
 0x1f8   :  { %10638 = vmatpush3.bf16.msra.mxu0 %v11337_v8  ;;  %v11354_v8 = vld [vmem:[%s16121_s1 + $0xad8] sm:$0xff]  }
 0x1f9   :  { %10667 = vmatprep.subr.bf16.mxu0 %v11340_v18  ;;  %v11356_v18 = vld [vmem:[%s16121_s1 + $0xa60] sm:$0xff]  }
 0x1fa   :  { %10660 = vmatpush3.bf16.msra.mxu1 %v11339_v14  ;;  %v11355_v14 = vld [vmem:[%s16121_s1 + $0xa98] sm:$0xff]  }
 0x1fb   :  { %6399 = vmatmul.mubr.bf16.vlgmr.msra.gmra.mrb[36].mxu0 %v1316_v17  ;;  %10689 = vmatprep.subr.bf16.mxu1 %v11342_v38 }
 0x1fc   :  { %10668 = vmatpush3.bf16.msra.mxu0 %v11341_v22 }
 0x1fd   :  { %6439 = vmatmul.mubr.bf16.vlgmr.msra.gmra.mrb[36].mxu1 %v1318_v29  ;;  %10669 = vmatprep.subr.bf16.mxu0 %v11344_v46  ;;  %v11357_v29 = vld [vmem:[%s16121_s1 + $0xa20] sm:$0xff]  }
 0x1fe   :  { %10690 = vmatpush3.bf16.msra.mxu1 %v11343_v43  ;;  %v11358_v43 = vld [vmem:[%s16121_s1 + $0xae0] sm:$0xff]  }
 0x1ff   :  { %10691 = vmatprep.subr.bf16.mxu1 %v11346_v4  ;;  %v11359_v4 = vld [vmem:[%s16121_s1 + $0xaa0] sm:$0xff]  }
 0x200   :  { %10670 = vmatpush3.bf16.msra.mxu0 %v11345_v47 }
 0x201   :  { %10671 = vmatprep.subr.bf16.mxu0 %v11348_v53 }
 0x202   :  { %10692 = vmatpush3.bf16.msra.mxu1 %v11347_v49  ;;  %v11360_v49 = vld [vmem:[%s16121_s1 + $0xa68] sm:$0xff]  }
 0x203   :  { %10693 = vmatprep.subr.bf16.mxu1 %v11350_v59  ;;  %v11362_v59 = vld [vmem:[%s16121_s1 + $0xae8] sm:$0xff]  }
 0x204   :  { %10672 = vmatpush3.bf16.msra.mxu0 %v11349_v58  ;;  %v11361_v58 = vld [vmem:[%s16121_s1 + $0xa28] sm:$0xff]  }
 0x205   :  { %10673 = vmatprep.subr.bf16.mxu0 %v11352_v1  ;;  %v11364_v1 = vld [vmem:[%s16121_s1 + $0xa70] sm:$0xff]  }
 0x206   :  { %10694 = vmatpush3.bf16.msra.mxu1 %v11351_v63  ;;  %v11363_v63 = vld [vmem:[%s16121_s1 + $0xaa8] sm:$0xff]  }
 0x207   :  { %10695 = vmatprep.subr.bf16.mxu1 %v11354_v8  ;;  %v11368_v8 = vld [vmem:[%s16121_s1 + $0xa78] sm:$0xff]  }
 0x208   :  { %10674 = vmatpush3.bf16.msra.mxu0 %v11353_v3  ;;  %v11366_v3 = vld [vmem:[%s16121_s1 + $0xaf0] sm:$0xff]  }
 0x209   :  { %10675 = vmatprep.subr.bf16.mxu0 %v11356_v18  ;;  %v11371_v18 = vld [vmem:[%s16121_s1 + $0xab8] sm:$0xff]  }
 0x20a   :  { %10696 = vmatpush3.bf16.msra.mxu1 %v11355_v14  ;;  %v13943_v14 = vld [vmem:[%s16120_s0 + $0x148] sm:$0xff] }
 0x20b   :  { %10697 = vmatprep.subr.bf16.mxu1 %v11358_v43  ;;  %16258 = vst [vmem:[#allocation36_spill] sm:$0xff] %v13943_v14 }
 0x20c   :  { %10676 = vmatpush3.bf16.msra.mxu0 %v11357_v29  ;;  %v11372_v29 = vld [vmem:[%s16121_s1 + $0xb40] sm:$0xff]  }
 0x20d   :  { %10677 = vmatprep.subr.bf16.mxu0 %v11360_v49  ;;  %v11375_v49 = vld [vmem:[%s16121_s1 + $0xb80] sm:$0xff]  }
 0x20e   :  { %v10375_v31 = vpop.f32.mrb[12].mxu0  ;;  %10698 = vmatpush3.bf16.msra.mxu1 %v11359_v4 }
 0x20f   :  { %v10376_v6 = vpop.f32.mrb[13].mxu0  ;;  %10699 = vmatprep.subr.bf16.mxu1 %v11362_v59  ;;  %v11377_v59 = vld [vmem:[%s16121_s1 + $0xb08] sm:$0xff]  }
 0x210   :  { %v10377_v9 = vadd.f32 %v10376_v6, %v10375_v31  ;;  %v10378_v12 = vpop.f32.mrb[14].mxu0  ;;  %v10397_v17 = vpop.f32.mrb[12].mxu1  ;;  %10678 = vmatpush3.bf16.msra.mxu0 %v11361_v58  ;;  %v11365_v31 = vld [vmem:[%s16121_s1 + $0xa30] sm:$0xff]   ;;  %v11376_v58 = vld [vmem:[%s16121_s1 + $0xb48] sm:$0xff]  }
 0x211   :  { %v10379_v22 = vpop.f32.mrb[15].mxu0  ;;  %v10398_v38 = vpop.f32.mrb[13].mxu1  ;;  %10679 = vmatprep.subr.bf16.mxu0 %v11364_v1  ;;  %v11367_v6 = vld [vmem:[%s16121_s1 + $0xab0] sm:$0xff]   ;;  %v11370_v12 = vld [vmem:[%s16121_s1 + $0xaf8] sm:$0xff]   ;;  %v11379_v1 = vld [vmem:[%s16121_s1 + $0xb88] sm:$0xff]  }
 0x212   :  { %v5921_v21 = vadd.f32 %v10377_v9, %v13781_v50  ;;  %v10399_v46 = vadd.f32 %v10398_v38, %v10397_v17  ;;  %v10400_v47 = vpop.f32.mrb[14].mxu1  ;;  %10700 = vmatpush3.bf16.msra.mxu1 %v11363_v63  ;;  %v11369_v9 = vld [vmem:[%s16121_s1 + $0xa38] sm:$0xff]   ;;  %v1321_v17 = vpack.c.bf16 %v13943_v14, %v13943_v14  ;;  %v11378_v63 = vld [vmem:[%s16121_s1 + $0xbc8] sm:$0xff]  }
 0x213   :  { %v10401_v50 = vpop.f32.mrb[15].mxu1  ;;  %10701 = vmatprep.subr.bf16.mxu1 %v11366_v3  ;;  %v13963_v38 = vld [vmem:[%s16120_s0 + $0x158] sm:$0xff]  ;;  %v13973_v47 = vld [vmem:[%s16120_s0 + $0x150] sm:$0xff] }
 0x214   :  { %v13908_v53 = vadd.f32 %v10399_v46, %v5921_v21  ;;  %10680 = vmatpush3.bf16.msra.mxu0 %v11365_v31  ;;  %v13953_v21 = vld [vmem:[%s16120_s0 + $0x140] sm:$0xff]  ;;  %16260 = vst [vmem:[#allocation38_spill] sm:$0xff] %v13963_v38  ;;  %6478 = vmatprep.mubr.bf16.mxu0 %v1321_v17  ;;  %v1323_v43 = vpack.c.bf16 %v13963_v38, %v13963_v38  ;;  %16261 = vst [vmem:[#allocation39_spill] sm:$0xff] %v13973_v47  ;;  %v11380_v31 = vld [vmem:[%s16121_s1 + $0xb50] sm:$0xff]  }
 0x215   :  { %10681 = vmatprep.subr.bf16.mxu0 %v11368_v8  ;;  %16259 = vst [vmem:[#allocation37_spill] sm:$0xff] %v13953_v21  ;;  %v1320_v22 = vpack.c.bf16 %v13953_v21, %v13953_v21  ;;  %v11373_v46 = vld [vmem:[%s16121_s1 + $0xb00] sm:$0xff]   ;;  %v1322_v4 = vpack.c.bf16 %v13973_v47, %v13973_v47  ;;  %v11381_v3 = vld [vmem:[%s16121_s1 + $0xb10] sm:$0xff]   ;;  %v11385_v17 = vld [vmem:[%s16121_s1 + $0xb18] sm:$0xff]  }
 0x216   :  { %10702 = vmatpush3.bf16.msra.mxu1 %v11367_v6  ;;  %6518 = vmatprep.mubr.bf16.mxu1 %v1323_v43  ;;  %v11374_v50 = vld [vmem:[%s16121_s1 + $0xbc0] sm:$0xff]   ;;  %v11382_v6 = vld [vmem:[%s16121_s1 + $0xbd0] sm:$0xff]  }
 0x217   :  { %10703 = vmatprep.subr.bf16.mxu1 %v11370_v12  ;;  %v11383_v8 = vld [vmem:[%s16121_s1 + $0xb90] sm:$0xff]  }
 0x218   :  { %10682 = vmatpush3.bf16.msra.mxu0 %v11369_v9  ;;  %v11384_v9 = vld [vmem:[%s16121_s1 + $0xb58] sm:$0xff]  }
 0x219   :  { %10711 = vmatprep.subr.bf16.mxu0 %v11372_v29 }
 0x21a   :  { %10704 = vmatpush3.bf16.msra.mxu1 %v11371_v18 }
 0x21b   :  { %6479 = vmatmul.mubr.bf16.vlgmr.msra.gmra.mrb[40].mxu0 %v1320_v22  ;;  %10733 = vmatprep.subr.bf16.mxu1 %v11374_v50  ;;  %v11386_v22 = vld [vmem:[%s16121_s1 + $0xbd8] sm:$0xff]   ;;  %v11388_v50 = vld [vmem:[%s16121_s1 + $0xb60] sm:$0xff]  }
 0x21c   :  { %10712 = vmatpush3.bf16.msra.mxu0 %v11373_v46  ;;  %v11387_v46 = vld [vmem:[%s16121_s1 + $0xb98] sm:$0xff]  }
 0x21d   :  { %6519 = vmatmul.mubr.bf16.vlgmr.msra.gmra.mrb[40].mxu1 %v1322_v4  ;;  %10713 = vmatprep.subr.bf16.mxu0 %v11376_v58 }
 0x21e   :  { %10734 = vmatpush3.bf16.msra.mxu1 %v11375_v49 }
 0x21f   :  { %10735 = vmatprep.subr.bf16.mxu1 %v11378_v63 }
 0x220   :  { %10714 = vmatpush3.bf16.msra.mxu0 %v11377_v59  ;;  %v11389_v59 = vld [vmem:[%s16121_s1 + $0xb20] sm:$0xff]  }
 0x221   :  { %10715 = vmatprep.subr.bf16.mxu0 %v11380_v31 }
 0x222   :  { %10736 = vmatpush3.bf16.msra.mxu1 %v11379_v1  ;;  %v11390_v1 = vld [vmem:[%s16121_s1 + $0xbe0] sm:$0xff]  }
 0x223   :  { %10737 = vmatprep.subr.bf16.mxu1 %v11382_v6  ;;  %v11391_v6 = vld [vmem:[%s16121_s1 + $0xba0] sm:$0xff]  }
 0x224   :  { %10716 = vmatpush3.bf16.msra.mxu0 %v11381_v3 }
 0x225   :  { %10717 = vmatprep.subr.bf16.mxu0 %v11384_v9 }
 0x226   :  { %10738 = vmatpush3.bf16.msra.mxu1 %v11383_v8  ;;  %v11392_v8 = vld [vmem:[%s16121_s1 + $0xb68] sm:$0xff]  }
 0x227   :  { %10739 = vmatprep.subr.bf16.mxu1 %v11386_v22  ;;  %v11396_v22 = vld [vmem:[%s16121_s1 + $0xb70] sm:$0xff]  }
 0x228   :  { %10718 = vmatpush3.bf16.msra.mxu0 %v11385_v17  ;;  %v11394_v17 = vld [vmem:[%s16121_s1 + $0xbe8] sm:$0xff]  }
 0x229   :  { %10719 = vmatprep.subr.bf16.mxu0 %v11388_v50  ;;  %v11401_v50 = vld [vmem:[%s16121_s1 + $0xb38] sm:$0xff]  }
 0x22a   :  { %10740 = vmatpush3.bf16.msra.mxu1 %v11387_v46  ;;  %v11399_v46 = vld [vmem:[%s16121_s1 + $0xbb0] sm:$0xff]  }
 0x22b   :  { %10741 = vmatprep.subr.bf16.mxu1 %v11390_v1  ;;  %v14080_v1 = vld [vmem:[%s16120_s0 + $0x160] sm:$0xff] }
 0x22c   :  { %10720 = vmatpush3.bf16.msra.mxu0 %v11389_v59  ;;  %16263 = vst [vmem:[#allocation41_spill] sm:$0xff] %v14080_v1 }
 0x22d   :  { %10721 = vmatprep.subr.bf16.mxu0 %v11392_v8  ;;  %v11405_v8 = vld [vmem:[%s16121_s1 + $0xc00] sm:$0xff]  }
 0x22e   :  { %v10419_v12 = vpop.f32.mrb[16].mxu0  ;;  %10742 = vmatpush3.bf16.msra.mxu1 %v11391_v6  ;;  %v14090_v6 = vld [vmem:[%s16120_s0 + $0x178] sm:$0xff] }
 0x22f   :  { %v10420_v18 = vpop.f32.mrb[17].mxu0  ;;  %10743 = vmatprep.subr.bf16.mxu1 %v11394_v17  ;;  %16264 = vst [vmem:[#allocation42_spill] sm:$0xff] %v14090_v6 }
 0x230   :  { %v10421_v29 = vadd.f32 %v10420_v18, %v10419_v12  ;;  %v10422_v43 = vpop.f32.mrb[18].mxu0  ;;  %v10441_v4 = vpop.f32.mrb[16].mxu1  ;;  %v11393_v12 = vld [vmem:[%s16121_s1 + $0xb28] sm:$0xff]  }
 0x231   :  { %v10423_v58 = vpop.f32.mrb[19].mxu0  ;;  %v10442_v63 = vpop.f32.mrb[17].mxu1  ;;  %10722 = vmatpush3.bf16.msra.mxu0 %v11393_v12  ;;  %v11395_v18 = vld [vmem:[%s16121_s1 + $0xba8] sm:$0xff]   ;;  %v11398_v43 = vld [vmem:[%s16121_s1 + $0xbf0] sm:$0xff]  }
 0x232   :  { %v6001_v49 = vadd.f32 %v10421_v29, %v13908_v53  ;;  %v10443_v31 = vadd.f32 %v10442_v63, %v10441_v4  ;;  %v10444_v3 = vpop.f32.mrb[18].mxu1  ;;  %10744 = vmatpush3.bf16.msra.mxu1 %v11395_v18  ;;  %v11397_v29 = vld [vmem:[%s16121_s1 + $0xb30] sm:$0xff]   ;;  %10723 = vmatprep.subr.bf16.mxu0 %v11396_v22  ;;  %v11400_v4 = vld [vmem:[%s16121_s1 + $0xb78] sm:$0xff]   ;;  %v14070_v58 = vld [vmem:[%s16120_s0 + $0x168] sm:$0xff] }
 0x233   :  { %v10445_v53 = vpop.f32.mrb[19].mxu1  ;;  %10745 = vmatprep.subr.bf16.mxu1 %v11398_v43  ;;  %16262 = vst [vmem:[#allocation40_spill] sm:$0xff] %v14070_v58  ;;  %v1325_v59 = vpack.c.bf16 %v14070_v58, %v14070_v58  ;;  %v11403_v63 = vld [vmem:[%s16121_s1 + $0xbb8] sm:$0xff]   ;;  %v11404_v3 = vld [vmem:[%s16121_s1 + $0xc40] sm:$0xff]   ;;  %v14100_v12 = vld [vmem:[%s16120_s0 + $0x170] sm:$0xff] }
 0x234   :  { %v14035_v9 = vadd.f32 %v10443_v31, %v6001_v49  ;;  %v11402_v49 = vld [vmem:[%s16121_s1 + $0xbf8] sm:$0xff]   ;;  %v1324_v31 = vpack.c.bf16 %v14080_v1, %v14080_v1  ;;  %v1327_v53 = vpack.c.bf16 %v14090_v6, %v14090_v6  ;;  %16265 = vst [vmem:[#allocation43_spill] sm:$0xff] %v14100_v12  ;;  %v1326_v17 = vpack.c.bf16 %v14100_v12, %v14100_v12  ;;  %v11406_v18 = vld [vmem:[%s16121_s1 + $0xcc0] sm:$0xff]   ;;  %v11409_v43 = vld [vmem:[%s16121_s1 + $0xc08] sm:$0xff]  }
 0x235   :  { %10724 = vmatpush3.bf16.msra.mxu0 %v11397_v29  ;;  %6558 = vmatprep.mubr.bf16.mxu0 %v1325_v59  ;;  %v11407_v22 = vld [vmem:[%s16121_s1 + $0xc80] sm:$0xff]   ;;  %v11408_v29 = vld [vmem:[%s16121_s1 + $0xc48] sm:$0xff]   ;;  %v11414_v59 = vld [vmem:[%s16121_s1 + $0xcd0] sm:$0xff]  }
 0x236   :  { %10746 = vmatpush3.bf16.msra.mxu1 %v11399_v46  ;;  %10725 = vmatprep.subr.bf16.mxu0 %v11400_v4  ;;  %v11410_v46 = vld [vmem:[%s16121_s1 + $0xcc8] sm:$0xff]  }
 0x237   :  { %10747 = vmatprep.subr.bf16.mxu1 %v11402_v49  ;;  %6598 = vmatprep.mubr.bf16.mxu1 %v1327_v53  ;;  %v11411_v4 = vld [vmem:[%s16121_s1 + $0xc88] sm:$0xff]   ;;  %v11413_v49 = vld [vmem:[%s16121_s1 + $0xc10] sm:$0xff]   ;;  %v11417_v53 = vld [vmem:[%s16121_s1 + $0xc18] sm:$0xff]  }
 0x239   :  { %10726 = vmatpush3.bf16.msra.mxu0 %v11401_v50  ;;  %v11412_v50 = vld [vmem:[%s16121_s1 + $0xc50] sm:$0xff]  }
 0x23a   :  { %10748 = vmatpush3.bf16.msra.mxu1 %v11403_v63  ;;  %10755 = vmatprep.subr.bf16.mxu0 %v11404_v3  ;;  %v11415_v63 = vld [vmem:[%s16121_s1 + $0xc90] sm:$0xff]  }
 0x23b   :  { %10777 = vmatprep.subr.bf16.mxu1 %v11406_v18 }
 0x23c   :  { %6559 = vmatmul.mubr.bf16.vlgmr.msra.gmra.mrb[44].mxu0 %v1324_v31  ;;  %v11416_v31 = vld [vmem:[%s16121_s1 + $0xc58] sm:$0xff]  }
 0x23d   :  { %10756 = vmatpush3.bf16.msra.mxu0 %v11405_v8  ;;  %6599 = vmatmul.mubr.bf16.vlgmr.msra.gmra.mrb[44].mxu1 %v1326_v17  ;;  %v11418_v17 = vld [vmem:[%s16121_s1 + $0xcd8] sm:$0xff]  }
 0x23e   :  { %10778 = vmatpush3.bf16.msra.mxu1 %v11407_v22  ;;  %10757 = vmatprep.subr.bf16.mxu0 %v11408_v29  ;;  %v11419_v29 = vld [vmem:[%s16121_s1 + $0xc98] sm:$0xff]  }
 0x23f   :  { %10779 = vmatprep.subr.bf16.mxu1 %v11410_v46  ;;  %v11420_v46 = vld [vmem:[%s16121_s1 + $0xc60] sm:$0xff]  }
 0x241   :  { %10758 = vmatpush3.bf16.msra.mxu0 %v11409_v43 }
 0x242   :  { %10780 = vmatpush3.bf16.msra.mxu1 %v11411_v4  ;;  %10759 = vmatprep.subr.bf16.mxu0 %v11412_v50 }
 0x243   :  { %10781 = vmatprep.subr.bf16.mxu1 %v11414_v59 }
 0x245   :  { %10760 = vmatpush3.bf16.msra.mxu0 %v11413_v49  ;;  %v11421_v49 = vld [vmem:[%s16121_s1 + $0xc20] sm:$0xff]  }
 0x246   :  { %10782 = vmatpush3.bf16.msra.mxu1 %v11415_v63  ;;  %10761 = vmatprep.subr.bf16.mxu0 %v11416_v31  ;;  %v11422_v63 = vld [vmem:[%s16121_s1 + $0xce0] sm:$0xff]  }
 0x247   :  { %10783 = vmatprep.subr.bf16.mxu1 %v11418_v17 }
 0x249   :  { %10762 = vmatpush3.bf16.msra.mxu0 %v11417_v53  ;;  %v11423_v53 = vld [vmem:[%s16121_s1 + $0xca0] sm:$0xff]  }
 0x24a   :  { %10784 = vmatpush3.bf16.msra.mxu1 %v11419_v29  ;;  %10763 = vmatprep.subr.bf16.mxu0 %v11420_v46  ;;  %v11427_v29 = vld [vmem:[%s16121_s1 + $0xca8] sm:$0xff]   ;;  %v11429_v46 = vld [vmem:[%s16121_s1 + $0xc30] sm:$0xff]  }
 0x24b   :  { %10785 = vmatprep.subr.bf16.mxu1 %v11422_v63  ;;  %v11434_v63 = vld [vmem:[%s16121_s1 + $0xcf8] sm:$0xff]  }
 0x24d   :  { %10764 = vmatpush3.bf16.msra.mxu0 %v11421_v49  ;;  %v11432_v49 = vld [vmem:[%s16121_s1 + $0xc78] sm:$0xff]  }
 0x24e   :  { %v10463_v3 = vpop.f32.mrb[20].mxu0  ;;  %10786 = vmatpush3.bf16.msra.mxu1 %v11423_v53  ;;  %v11435_v53 = vld [vmem:[%s16121_s1 + $0xcb8] sm:$0xff]  }
 0x24f   :  { %v10464_v8 = vpop.f32.mrb[21].mxu0 }
 0x250   :  { %v10465_v18 = vadd.f32 %v10464_v8, %v10463_v3  ;;  %v10466_v22 = vpop.f32.mrb[22].mxu0  ;;  %v10485_v43 = vpop.f32.mrb[20].mxu1  ;;  %v11424_v8 = vld [vmem:[%s16121_s1 + $0xc68] sm:$0xff]  }
 0x251   :  { %v10467_v50 = vpop.f32.mrb[23].mxu0  ;;  %v10486_v59 = vpop.f32.mrb[21].mxu1  ;;  %10765 = vmatprep.subr.bf16.mxu0 %v11424_v8  ;;  %v11426_v22 = vld [vmem:[%s16121_s1 + $0xce8] sm:$0xff]  }
 0x252   :  { %v6081_v4 = vadd.f32 %v10465_v18, %v14035_v9  ;;  %v10487_v31 = vadd.f32 %v10486_v59, %v10485_v43  ;;  %v10488_v3 = vpop.f32.mrb[22].mxu1  ;;  %v11425_v18 = vld [vmem:[%s16121_s1 + $0xc28] sm:$0xff]   ;;  %10787 = vmatprep.subr.bf16.mxu1 %v11426_v22  ;;  %v11428_v43 = vld [vmem:[%s16121_s1 + $0xc70] sm:$0xff]   ;;  %v11433_v59 = vld [vmem:[%s16121_s1 + $0xc38] sm:$0xff]  }
 0x253   :  { %v10489_v9 = vpop.f32.mrb[23].mxu1  ;;  %10766 = vmatpush3.bf16.msra.mxu0 %v11425_v18  ;;  %10788 = vmatpush3.bf16.msra.mxu1 %v11427_v29  ;;  %v11431_v50 = vld [vmem:[%s16121_s1 + $0xcb0] sm:$0xff]   ;;  %v11436_v18 = vld [vmem:[%s16121_s1 + $0xd40] sm:$0xff]   ;;  %v14217_v22 = vld [vmem:[%s16120_s0 + $0x198] sm:$0xff] }
 0x254   :  { %v14162_v17 = vadd.f32 %v10487_v31, %v6081_v4  ;;  %10767 = vmatprep.subr.bf16.mxu0 %v11428_v43  ;;  %v11430_v4 = vld [vmem:[%s16121_s1 + $0xcf0] sm:$0xff]   ;;  %v14197_v31 = vld [vmem:[%s16120_s0 + $0x188] sm:$0xff]  ;;  %v14207_v9 = vld [vmem:[%s16120_s0 + $0x180] sm:$0xff]  ;;  %16268 = vst [vmem:[#allocation46_spill] sm:$0xff] %v14217_v22  ;;  %v1331_v29 = vpack.c.bf16 %v14217_v22, %v14217_v22 }
 0x255   :  { %10789 = vmatprep.subr.bf16.mxu1 %v11430_v4  ;;  %16266 = vst [vmem:[#allocation44_spill] sm:$0xff] %v14197_v31  ;;  %v1329_v3 = vpack.c.bf16 %v14197_v31, %v14197_v31  ;;  %16267 = vst [vmem:[#allocation45_spill] sm:$0xff] %v14207_v9  ;;  %v1328_v8 = vpack.c.bf16 %v14207_v9, %v14207_v9  ;;  %v11437_v43 = vld [vmem:[%s16121_s1 + $0xd00] sm:$0xff]  }
 0x256   :  { %6678 = vmatprep.mubr.bf16.mxu1 %v1331_v29  ;;  %v11446_v29 = vld [vmem:[%s16121_s1 + $0xdd0] sm:$0xff]   ;;  %v11455_v22 = vld [vmem:[%s16121_s1 + $0xda0] sm:$0xff]  }
 0x257   :  { %10768 = vmatpush3.bf16.msra.mxu0 %v11429_v46  ;;  %10790 = vmatpush3.bf16.msra.mxu1 %v11431_v50  ;;  %v14227_v46 = vld [vmem:[%s16120_s0 + $0x190] sm:$0xff]  ;;  %v11438_v50 = vld [vmem:[%s16121_s1 + $0xdc0] sm:$0xff]  }
 0x258   :  { %10769 = vmatprep.subr.bf16.mxu0 %v11432_v49  ;;  %10791 = vmatprep.subr.bf16.mxu1 %v11434_v63  ;;  %16269 = vst [vmem:[#allocation47_spill] sm:$0xff] %v14227_v46  ;;  %v1330_v4 = vpack.c.bf16 %v14227_v46, %v14227_v46  ;;  %v11439_v49 = vld [vmem:[%s16121_s1 + $0xd80] sm:$0xff]   ;;  %v11441_v63 = vld [vmem:[%s16121_s1 + $0xd08] sm:$0xff]  }
 0x259   :  { %6638 = vmatprep.mubr.bf16.mxu0 %v1329_v3  ;;  %v11442_v3 = vld [vmem:[%s16121_s1 + $0xdc8] sm:$0xff]  }
 0x25b   :  { %10770 = vmatpush3.bf16.msra.mxu0 %v11433_v59  ;;  %10792 = vmatpush3.bf16.msra.mxu1 %v11435_v53  ;;  %v11440_v59 = vld [vmem:[%s16121_s1 + $0xd48] sm:$0xff]  }
 0x25c   :  { %10799 = vmatprep.subr.bf16.mxu0 %v11436_v18  ;;  %10821 = vmatprep.subr.bf16.mxu1 %v11438_v50  ;;  %v11443_v53 = vld [vmem:[%s16121_s1 + $0xd88] sm:$0xff]   ;;  %v11445_v18 = vld [vmem:[%s16121_s1 + $0xd10] sm:$0xff]  }
 0x25e   :  { %6639 = vmatmul.mubr.bf16.vlgmr.msra.gmra.mrb[48].mxu0 %v1328_v8  ;;  %6679 = vmatmul.mubr.bf16.vlgmr.msra.gmra.mrb[48].mxu1 %v1330_v4  ;;  %v11444_v8 = vld [vmem:[%s16121_s1 + $0xd50] sm:$0xff]   ;;  %v11448_v4 = vld [vmem:[%s16121_s1 + $0xd58] sm:$0xff]  }
 0x25f   :  { %10800 = vmatpush3.bf16.msra.mxu0 %v11437_v43  ;;  %10822 = vmatpush3.bf16.msra.mxu1 %v11439_v49  ;;  %v11447_v43 = vld [vmem:[%s16121_s1 + $0xd90] sm:$0xff]   ;;  %v11449_v49 = vld [vmem:[%s16121_s1 + $0xd18] sm:$0xff]  }
 0x260   :  { %10801 = vmatprep.subr.bf16.mxu0 %v11440_v59  ;;  %10823 = vmatprep.subr.bf16.mxu1 %v11442_v3 }
 0x263   :  { %10802 = vmatpush3.bf16.msra.mxu0 %v11441_v63  ;;  %10824 = vmatpush3.bf16.msra.mxu1 %v11443_v53  ;;  %v11450_v63 = vld [vmem:[%s16121_s1 + $0xdd8] sm:$0xff]  }
 0x264   :  { %10803 = vmatprep.subr.bf16.mxu0 %v11444_v8  ;;  %10825 = vmatprep.subr.bf16.mxu1 %v11446_v29  ;;  %v11451_v8 = vld [vmem:[%s16121_s1 + $0xd98] sm:$0xff]   ;;  %v11452_v29 = vld [vmem:[%s16121_s1 + $0xd60] sm:$0xff]  }
 0x267   :  { %10804 = vmatpush3.bf16.msra.mxu0 %v11445_v18  ;;  %10826 = vmatpush3.bf16.msra.mxu1 %v11447_v43 }
 0x268   :  { %10805 = vmatprep.subr.bf16.mxu0 %v11448_v4  ;;  %10827 = vmatprep.subr.bf16.mxu1 %v11450_v63 }
 0x26b   :  { %10806 = vmatpush3.bf16.msra.mxu0 %v11449_v49  ;;  %10828 = vmatpush3.bf16.msra.mxu1 %v11451_v8  ;;  %v11454_v49 = vld [vmem:[%s16121_s1 + $0xde0] sm:$0xff]  }
 0x26c   :  { %10807 = vmatprep.subr.bf16.mxu0 %v11452_v29  ;;  %10829 = vmatprep.subr.bf16.mxu1 %v11454_v49  ;;  %v11457_v29 = vld [vmem:[%s16121_s1 + $0xd28] sm:$0xff]   ;;  %v11464_v49 = vld [vmem:[%s16121_s1 + $0xd78] sm:$0xff]  }
 0x26e   :  { %v10507_v50 = vpop.f32.mrb[24].mxu0 }
 0x26f   :  { %v10508_v59 = vpop.f32.mrb[25].mxu0  ;;  %10830 = vmatpush3.bf16.msra.mxu1 %v11455_v22  ;;  %v11461_v22 = vld [vmem:[%s16121_s1 + $0xd30] sm:$0xff]  }
 0x270   :  { %v10509_v3 = vadd.f32 %v10508_v59, %v10507_v50  ;;  %v10510_v53 = vpop.f32.mrb[26].mxu0  ;;  %v10529_v18 = vpop.f32.mrb[24].mxu1  ;;  %v11453_v50 = vld [vmem:[%s16121_s1 + $0xd20] sm:$0xff]  }
 0x271   :  { %v10511_v4 = vpop.f32.mrb[27].mxu0  ;;  %v10530_v59 = vpop.f32.mrb[25].mxu1  ;;  %10808 = vmatpush3.bf16.msra.mxu0 %v11453_v50  ;;  %v11462_v50 = vld [vmem:[%s16121_s1 + $0xdf0] sm:$0xff]  }
 0x272   :  { %v6161_v43 = vadd.f32 %v10509_v3, %v14162_v17  ;;  %v10531_v53 = vadd.f32 %v10530_v59, %v10529_v18  ;;  %v10532_v63 = vpop.f32.mrb[26].mxu1  ;;  %v11456_v3 = vld [vmem:[%s16121_s1 + $0xd68] sm:$0xff]   ;;  %v11463_v59 = vld [vmem:[%s16121_s1 + $0xdb0] sm:$0xff]  }
 0x273   :  { %v10533_v17 = vpop.f32.mrb[27].mxu1  ;;  %10809 = vmatprep.subr.bf16.mxu0 %v11456_v3  ;;  %v11458_v18 = vld [vmem:[%s16121_s1 + $0xde8] sm:$0xff]   ;;  %v11466_v63 = vld [vmem:[%s16121_s1 + $0xdf8] sm:$0xff]  }
 0x274   :  { %v14289_v8 = vadd.f32 %v10531_v53, %v6161_v43  ;;  %v11459_v4 = vld [vmem:[%s16121_s1 + $0xda8] sm:$0xff]   ;;  %10831 = vmatprep.subr.bf16.mxu1 %v11458_v18  ;;  %v11460_v43 = vld [vmem:[%s16121_s1 + $0xd70] sm:$0xff]   ;;  %v11465_v53 = vld [vmem:[%s16121_s1 + $0xd38] sm:$0xff]  }
 0x275   :  { %10810 = vmatpush3.bf16.msra.mxu0 %v11457_v29  ;;  %10832 = vmatpush3.bf16.msra.mxu1 %v11459_v4  ;;  %v14324_v17 = vld [vmem:[%s16120_s0 + $0x1a8] sm:$0xff]  ;;  %v11467_v29 = vld [vmem:[%s16121_s1 + $0xdb8] sm:$0xff]   ;;  %v14334_v18 = vld [vmem:[%s16120_s0 + $0x1a0] sm:$0xff] }
 0x276   :  { %10811 = vmatprep.subr.bf16.mxu0 %v11460_v43  ;;  %10833 = vmatprep.subr.bf16.mxu1 %v11462_v50  ;;  %16270 = vst [vmem:[#allocation48_spill] sm:$0xff] %v14324_v17  ;;  %v1333_v3 = vpack.c.bf16 %v14324_v17, %v14324_v17  ;;  %16271 = vst [vmem:[#allocation49_spill] sm:$0xff] %v14334_v18  ;;  %v1332_v4 = vpack.c.bf16 %v14334_v18, %v14334_v18  ;;  %v11468_v43 = vld [vmem:[%s16121_s1 + $0xe40] sm:$0xff]  }
 0x277   :  { %v11487_v18 = vld [vmem:[%s16121_s1 + $0xea0] sm:$0xff]  }
 0x278   :  { %6718 = vmatprep.mubr.bf16.mxu0 %v1333_v3  ;;  %v11471_v3 = vld [vmem:[%s16121_s1 + $0xe80] sm:$0xff]  }
 0x279   :  { %10812 = vmatpush3.bf16.msra.mxu0 %v11461_v22  ;;  %10834 = vmatpush3.bf16.msra.mxu1 %v11463_v59  ;;  %v14344_v22 = vld [vmem:[%s16120_s0 + $0x1b8] sm:$0xff]  ;;  %v11469_v59 = vld [vmem:[%s16121_s1 + $0xe00] sm:$0xff]  }
 0x27a   :  { %10813 = vmatprep.subr.bf16.mxu0 %v11464_v49  ;;  %10835 = vmatprep.subr.bf16.mxu1 %v11466_v63  ;;  %16272 = vst [vmem:[#allocation50_spill] sm:$0xff] %v14344_v22  ;;  %v1335_v50 = vpack.c.bf16 %v14344_v22, %v14344_v22  ;;  %v14354_v49 = vld [vmem:[%s16120_s0 + $0x1b0] sm:$0xff]  ;;  %v11470_v63 = vld [vmem:[%s16121_s1 + $0xec0] sm:$0xff]  }
 0x27b   :  { %16273 = vst [vmem:[#allocation51_spill] sm:$0xff] %v14354_v49 }
 0x27c   :  { %6758 = vmatprep.mubr.bf16.mxu1 %v1335_v50  ;;  %v11475_v50 = vld [vmem:[%s16121_s1 + $0xe88] sm:$0xff]  }
 0x27d   :  { %10814 = vmatpush3.bf16.msra.mxu0 %v11465_v53  ;;  %10836 = vmatpush3.bf16.msra.mxu1 %v11467_v29  ;;  %v1334_v53 = vpack.c.bf16 %v14354_v49, %v14354_v49  ;;  %v11472_v29 = vld [vmem:[%s16121_s1 + $0xe48] sm:$0xff]  }
 0x27e   :  { %10843 = vmatprep.subr.bf16.mxu0 %v11468_v43  ;;  %10865 = vmatprep.subr.bf16.mxu1 %v11470_v63  ;;  %v11474_v43 = vld [vmem:[%s16121_s1 + $0xec8] sm:$0xff]   ;;  %v11478_v63 = vld [vmem:[%s16121_s1 + $0xed0] sm:$0xff]  }
 0x280   :  { %6719 = vmatmul.mubr.bf16.vlgmr.msra.gmra.mrb[52].mxu0 %v1332_v4  ;;  %6759 = vmatmul.mubr.bf16.vlgmr.msra.gmra.mrb[52].mxu1 %v1334_v53  ;;  %v11473_v4 = vld [vmem:[%s16121_s1 + $0xe08] sm:$0xff]   ;;  %v11477_v53 = vld [vmem:[%s16121_s1 + $0xe10] sm:$0xff]  }
 0x281   :  { %10844 = vmatpush3.bf16.msra.mxu0 %v11469_v59  ;;  %10866 = vmatpush3.bf16.msra.mxu1 %v11471_v3  ;;  %v11476_v59 = vld [vmem:[%s16121_s1 + $0xe50] sm:$0xff]  }
 0x282   :  { %10845 = vmatprep.subr.bf16.mxu0 %v11472_v29  ;;  %10867 = vmatprep.subr.bf16.mxu1 %v11474_v43  ;;  %v11479_v3 = vld [vmem:[%s16121_s1 + $0xe90] sm:$0xff]   ;;  %v11480_v29 = vld [vmem:[%s16121_s1 + $0xe58] sm:$0xff]  }
 0x283   :  { %v11481_v43 = vld [vmem:[%s16121_s1 + $0xe18] sm:$0xff]  }
 0x285   :  { %10846 = vmatpush3.bf16.msra.mxu0 %v11473_v4  ;;  %10868 = vmatpush3.bf16.msra.mxu1 %v11475_v50 }
 0x286   :  { %10847 = vmatprep.subr.bf16.mxu0 %v11476_v59  ;;  %10869 = vmatprep.subr.bf16.mxu1 %v11478_v63  ;;  %v11482_v59 = vld [vmem:[%s16121_s1 + $0xed8] sm:$0xff]  }
 0x287   :  { %v11483_v63 = vld [vmem:[%s16121_s1 + $0xe98] sm:$0xff]  }
 0x289   :  { %10848 = vmatpush3.bf16.msra.mxu0 %v11477_v53  ;;  %10870 = vmatpush3.bf16.msra.mxu1 %v11479_v3  ;;  %v11484_v3 = vld [vmem:[%s16121_s1 + $0xe60] sm:$0xff]  }
 0x28a   :  { %10849 = vmatprep.subr.bf16.mxu0 %v11480_v29  ;;  %10871 = vmatprep.subr.bf16.mxu1 %v11482_v59 }
 0x28d   :  { %10850 = vmatpush3.bf16.msra.mxu0 %v11481_v43  ;;  %10872 = vmatpush3.bf16.msra.mxu1 %v11483_v63  ;;  %v11486_v43 = vld [vmem:[%s16121_s1 + $0xee0] sm:$0xff]  }
 0x28e   :  { %v10551_v4 = vpop.f32.mrb[28].mxu0  ;;  %10851 = vmatprep.subr.bf16.mxu0 %v11484_v3  ;;  %10873 = vmatprep.subr.bf16.mxu1 %v11486_v43  ;;  %v11489_v3 = vld [vmem:[%s16121_s1 + $0xe28] sm:$0xff]   ;;  %v11496_v43 = vld [vmem:[%s16121_s1 + $0xe78] sm:$0xff]  }
 0x28f   :  { %v10552_v50 = vpop.f32.mrb[29].mxu0 }
 0x290   :  { %v10553_v53 = vadd.f32 %v10552_v50, %v10551_v4  ;;  %v10554_v22 = vpop.f32.mrb[30].mxu0  ;;  %v10573_v17 = vpop.f32.mrb[28].mxu1  ;;  %v11485_v4 = vld [vmem:[%s16121_s1 + $0xe20] sm:$0xff]  }
 0x291   :  { %v10555_v29 = vpop.f32.mrb[31].mxu0  ;;  %v10574_v22 = vpop.f32.mrb[29].mxu1  ;;  %10852 = vmatpush3.bf16.msra.mxu0 %v11485_v4  ;;  %10874 = vmatpush3.bf16.msra.mxu1 %v11487_v18  ;;  %v11493_v18 = vld [vmem:[%s16121_s1 + $0xe30] sm:$0xff]  }
 0x292   :  { %v6241_v49 = vadd.f32 %v10553_v53, %v14289_v8  ;;  %v10575_v50 = vadd.f32 %v10574_v22, %v10573_v17  ;;  %v10576_v59 = vpop.f32.mrb[30].mxu1  ;;  %v11488_v53 = vld [vmem:[%s16121_s1 + $0xe68] sm:$0xff]   ;;  %v11494_v4 = vld [vmem:[%s16121_s1 + $0xef0] sm:$0xff]  }
 0x293   :  { %v10577_v8 = vpop.f32.mrb[31].mxu1  ;;  %10853 = vmatprep.subr.bf16.mxu0 %v11488_v53  ;;  %v11490_v17 = vld [vmem:[%s16121_s1 + $0xee8] sm:$0xff]   ;;  %v11495_v22 = vld [vmem:[%s16121_s1 + $0xeb0] sm:$0xff]   ;;  %v11498_v59 = vld [vmem:[%s16121_s1 + $0xef8] sm:$0xff]  }
 0x294   :  { %v14416_v63 = vadd.f32 %v10575_v50, %v6241_v49  ;;  %v11491_v29 = vld [vmem:[%s16121_s1 + $0xea8] sm:$0xff]   ;;  %10875 = vmatprep.subr.bf16.mxu1 %v11490_v17  ;;  %v11492_v49 = vld [vmem:[%s16121_s1 + $0xe70] sm:$0xff]   ;;  %v11497_v50 = vld [vmem:[%s16121_s1 + $0xe38] sm:$0xff]  }
 0x295   :  { %10854 = vmatpush3.bf16.msra.mxu0 %v11489_v3  ;;  %10876 = vmatpush3.bf16.msra.mxu1 %v11491_v29  ;;  %v14451_v8 = vld [vmem:[%s16120_s0 + $0x1c8] sm:$0xff]  ;;  %v11499_v3 = vld [vmem:[%s16121_s1 + $0xeb8] sm:$0xff]   ;;  %v14461_v17 = vld [vmem:[%s16120_s0 + $0x1c0] sm:$0xff] }
 0x296   :  { %10855 = vmatprep.subr.bf16.mxu0 %v11492_v49  ;;  %10877 = vmatprep.subr.bf16.mxu1 %v11494_v4  ;;  %16274 = vst [vmem:[#allocation52_spill] sm:$0xff] %v14451_v8  ;;  %v1337_v53 = vpack.c.bf16 %v14451_v8, %v14451_v8  ;;  %16275 = vst [vmem:[#allocation53_spill] sm:$0xff] %v14461_v17  ;;  %v1336_v29 = vpack.c.bf16 %v14461_v17, %v14461_v17  ;;  %v11500_v49 = vld [vmem:[%s16121_s1 + $0xf40] sm:$0xff]  }
 0x297   :  { %v11519_v17 = vld [vmem:[%s16121_s1 + $0xfa0] sm:$0xff]  }
 0x298   :  { %6798 = vmatprep.mubr.bf16.mxu0 %v1337_v53  ;;  %v11503_v53 = vld [vmem:[%s16121_s1 + $0xf80] sm:$0xff]  }
 0x299   :  { %10856 = vmatpush3.bf16.msra.mxu0 %v11493_v18  ;;  %10878 = vmatpush3.bf16.msra.mxu1 %v11495_v22  ;;  %v14471_v18 = vld [vmem:[%s16120_s0 + $0x1d8] sm:$0xff]  ;;  %v11501_v22 = vld [vmem:[%s16121_s1 + $0xf00] sm:$0xff]  }
 0x29a   :  { %10857 = vmatprep.subr.bf16.mxu0 %v11496_v43  ;;  %10879 = vmatprep.subr.bf16.mxu1 %v11498_v59  ;;  %16276 = vst [vmem:[#allocation54_spill] sm:$0xff] %v14471_v18  ;;  %v1339_v4 = vpack.c.bf16 %v14471_v18, %v14471_v18  ;;  %v14481_v43 = vld [vmem:[%s16120_s0 + $0x1d0] sm:$0xff]  ;;  %v11502_v59 = vld [vmem:[%s16121_s1 + $0xfc0] sm:$0xff]  }
 0x29b   :  { %16277 = vst [vmem:[#allocation55_spill] sm:$0xff] %v14481_v43 }
 0x29c   :  { %6838 = vmatprep.mubr.bf16.mxu1 %v1339_v4  ;;  %v11507_v4 = vld [vmem:[%s16121_s1 + $0xf88] sm:$0xff]  }
 0x29d   :  { %10858 = vmatpush3.bf16.msra.mxu0 %v11497_v50  ;;  %10880 = vmatpush3.bf16.msra.mxu1 %v11499_v3  ;;  %v1338_v50 = vpack.c.bf16 %v14481_v43, %v14481_v43  ;;  %v11504_v3 = vld [vmem:[%s16121_s1 + $0xf48] sm:$0xff]  }
 0x29e   :  { %10887 = vmatprep.subr.bf16.mxu0 %v11500_v49  ;;  %10909 = vmatprep.subr.bf16.mxu1 %v11502_v59  ;;  %v11506_v49 = vld [vmem:[%s16121_s1 + $0xfc8] sm:$0xff]   ;;  %v11510_v59 = vld [vmem:[%s16121_s1 + $0xfd0] sm:$0xff]  }
 0x2a0   :  { %6799 = vmatmul.mubr.bf16.vlgmr.msra.gmra.mrb[56].mxu0 %v1336_v29  ;;  %6839 = vmatmul.mubr.bf16.vlgmr.msra.gmra.mrb[56].mxu1 %v1338_v50  ;;  %v11505_v29 = vld [vmem:[%s16121_s1 + $0xf08] sm:$0xff]   ;;  %v11509_v50 = vld [vmem:[%s16121_s1 + $0xf10] sm:$0xff]  }
 0x2a1   :  { %10888 = vmatpush3.bf16.msra.mxu0 %v11501_v22  ;;  %10910 = vmatpush3.bf16.msra.mxu1 %v11503_v53  ;;  %v11508_v22 = vld [vmem:[%s16121_s1 + $0xf50] sm:$0xff]  }
 0x2a2   :  { %10889 = vmatprep.subr.bf16.mxu0 %v11504_v3  ;;  %10911 = vmatprep.subr.bf16.mxu1 %v11506_v49  ;;  %v11511_v53 = vld [vmem:[%s16121_s1 + $0xf90] sm:$0xff]   ;;  %v11512_v3 = vld [vmem:[%s16121_s1 + $0xf58] sm:$0xff]  }
 0x2a3   :  { %v11513_v49 = vld [vmem:[%s16121_s1 + $0xf18] sm:$0xff]  }
 0x2a5   :  { %10890 = vmatpush3.bf16.msra.mxu0 %v11505_v29  ;;  %10912 = vmatpush3.bf16.msra.mxu1 %v11507_v4 }
 0x2a6   :  { %10891 = vmatprep.subr.bf16.mxu0 %v11508_v22  ;;  %10913 = vmatprep.subr.bf16.mxu1 %v11510_v59  ;;  %v11514_v22 = vld [vmem:[%s16121_s1 + $0xfd8] sm:$0xff]  }
 0x2a7   :  { %v11515_v59 = vld [vmem:[%s16121_s1 + $0xf98] sm:$0xff]  }
 0x2a9   :  { %10892 = vmatpush3.bf16.msra.mxu0 %v11509_v50  ;;  %10914 = vmatpush3.bf16.msra.mxu1 %v11511_v53  ;;  %v11516_v53 = vld [vmem:[%s16121_s1 + $0xf60] sm:$0xff]  }
 0x2aa   :  { %10893 = vmatprep.subr.bf16.mxu0 %v11512_v3  ;;  %10915 = vmatprep.subr.bf16.mxu1 %v11514_v22 }
 0x2ad   :  { %10894 = vmatpush3.bf16.msra.mxu0 %v11513_v49  ;;  %10916 = vmatpush3.bf16.msra.mxu1 %v11515_v59  ;;  %v11518_v49 = vld [vmem:[%s16121_s1 + $0xfe0] sm:$0xff]  }
 0x2ae   :  { %v10595_v29 = vpop.f32.mrb[32].mxu0  ;;  %10895 = vmatprep.subr.bf16.mxu0 %v11516_v53  ;;  %10917 = vmatprep.subr.bf16.mxu1 %v11518_v49  ;;  %v11521_v53 = vld [vmem:[%s16121_s1 + $0xf28] sm:$0xff]   ;;  %v11528_v49 = vld [vmem:[%s16121_s1 + $0xf78] sm:$0xff]  }
 0x2af   :  { %v10596_v4 = vpop.f32.mrb[33].mxu0 }
 0x2b0   :  { %v10597_v50 = vadd.f32 %v10596_v4, %v10595_v29  ;;  %v10598_v18 = vpop.f32.mrb[34].mxu0  ;;  %v10617_v8 = vpop.f32.mrb[32].mxu1  ;;  %v11517_v29 = vld [vmem:[%s16121_s1 + $0xf20] sm:$0xff]  }
 0x2b1   :  { %v10599_v3 = vpop.f32.mrb[35].mxu0  ;;  %v10618_v18 = vpop.f32.mrb[33].mxu1  ;;  %10896 = vmatpush3.bf16.msra.mxu0 %v11517_v29  ;;  %10918 = vmatpush3.bf16.msra.mxu1 %v11519_v17  ;;  %v11525_v17 = vld [vmem:[%s16121_s1 + $0xf30] sm:$0xff]  }
 0x2b2   :  { %v6321_v43 = vadd.f32 %v10597_v50, %v14416_v63  ;;  %v10619_v4 = vadd.f32 %v10618_v18, %v10617_v8  ;;  %v10620_v22 = vpop.f32.mrb[34].mxu1  ;;  %v11520_v50 = vld [vmem:[%s16121_s1 + $0xf68] sm:$0xff]   ;;  %v11526_v29 = vld [vmem:[%s16121_s1 + $0xff0] sm:$0xff]  }
 0x2b3   :  { %v10621_v63 = vpop.f32.mrb[35].mxu1  ;;  %10897 = vmatprep.subr.bf16.mxu0 %v11520_v50  ;;  %v11522_v8 = vld [vmem:[%s16121_s1 + $0xfe8] sm:$0xff]   ;;  %v11527_v18 = vld [vmem:[%s16121_s1 + $0xfb0] sm:$0xff]   ;;  %v11530_v22 = vld [vmem:[%s16121_s1 + $0xff8] sm:$0xff]  }
 0x2b4   :  { %v14543_v59 = vadd.f32 %v10619_v4, %v6321_v43  ;;  %v11523_v3 = vld [vmem:[%s16121_s1 + $0xfa8] sm:$0xff]   ;;  %10919 = vmatprep.subr.bf16.mxu1 %v11522_v8  ;;  %v11524_v43 = vld [vmem:[%s16121_s1 + $0xf70] sm:$0xff]   ;;  %v11529_v4 = vld [vmem:[%s16121_s1 + $0xf38] sm:$0xff]  }
 0x2b5   :  { %10898 = vmatpush3.bf16.msra.mxu0 %v11521_v53  ;;  %10920 = vmatpush3.bf16.msra.mxu1 %v11523_v3  ;;  %v14578_v63 = vld [vmem:[%s16120_s0 + $0x1e8] sm:$0xff]  ;;  %v11531_v53 = vld [vmem:[%s16121_s1 + $0xfb8] sm:$0xff]   ;;  %v14588_v8 = vld [vmem:[%s16120_s0 + $0x1e0] sm:$0xff] }
 0x2b6   :  { %10899 = vmatprep.subr.bf16.mxu0 %v11524_v43  ;;  %10921 = vmatprep.subr.bf16.mxu1 %v11526_v29  ;;  %16278 = vst [vmem:[#allocation56_spill] sm:$0xff] %v14578_v63  ;;  %v1341_v50 = vpack.c.bf16 %v14578_v63, %v14578_v63  ;;  %16279 = vst [vmem:[#allocation57_spill] sm:$0xff] %v14588_v8  ;;  %v1340_v3 = vpack.c.bf16 %v14588_v8, %v14588_v8  ;;  %v11532_v43 = vld [vmem:[%s16121_s1 + $0x1040] sm:$0xff]  }
 0x2b8   :  { %6878 = vmatprep.mubr.bf16.mxu0 %v1341_v50  ;;  %v11534_v50 = vld [vmem:[%s16121_s1 + $0x1080] sm:$0xff]  }
 0x2b9   :  { %10900 = vmatpush3.bf16.msra.mxu0 %v11525_v17  ;;  %10922 = vmatpush3.bf16.msra.mxu1 %v11527_v18  ;;  %v14598_v17 = vld [vmem:[%s16120_s0 + $0x1f8] sm:$0xff]  ;;  %v11533_v18 = vld [vmem:[%s16121_s1 + $0x1000] sm:$0xff]  }
 0x2ba   :  { %10901 = vmatprep.subr.bf16.mxu0 %v11528_v49  ;;  %10923 = vmatprep.subr.bf16.mxu1 %v11530_v22  ;;  %16280 = vst [vmem:[#allocation58_spill] sm:$0xff] %v14598_v17  ;;  %v1343_v29 = vpack.c.bf16 %v14598_v17, %v14598_v17  ;;  %v14608_v49 = vld [vmem:[%s16120_s0 + $0x1f0] sm:$0xff] }
 0x2bb   :  { %16281 = vst [vmem:[#allocation59_spill] sm:$0xff] %v14608_v49  ;;  %v1342_v22 = vpack.c.bf16 %v14608_v49, %v14608_v49 }
 0x2bc   :  { %6918 = vmatprep.mubr.bf16.mxu1 %v1343_v29  ;;  %v11538_v29 = vld [vmem:[%s16121_s1 + $0x1050] sm:$0xff]  }
 0x2bd   :  { %10902 = vmatpush3.bf16.msra.mxu0 %v11529_v4  ;;  %10924 = vmatpush3.bf16.msra.mxu1 %v11531_v53  ;;  %v16137_v4 = vmov 0.0   ;;  %v11535_v53 = vld [vmem:[%s16121_s1 + $0x1048] sm:$0xff]  }
 0x2be   :  { %10970 = vmatprep.subr.bf16.mxu1 %v16137_v4  ;;  %10931 = vmatprep.subr.bf16.mxu0 %v11532_v43  ;;  %v11536_v4 = vld [vmem:[%s16121_s1 + $0x1008] sm:$0xff]   ;;  %v16282_v43 = vmov 0.0  }
 0x2c0   :  { %6879 = vmatmul.mubr.bf16.vlgmr.msra.gmra.mrb[60].mxu0 %v1340_v3  ;;  %6919 = vmatmul.mubr.bf16.vlgmr.msra.gmra.mrb[60].mxu1 %v1342_v22  ;;  %v11537_v3 = vld [vmem:[%s16121_s1 + $0x1088] sm:$0xff]   ;;  %v11540_v22 = vld [vmem:[%s16121_s1 + $0x1090] sm:$0xff]  }
 0x2c1   :  { %10932 = vmatpush3.bf16.msra.mxu0 %v11533_v18  ;;  %10971 = vmatpush3.bf16.msra.mxu1 %v11534_v50  ;;  %v11539_v18 = vld [vmem:[%s16121_s1 + $0x1010] sm:$0xff]   ;;  %v11541_v50 = vld [vmem:[%s16121_s1 + $0x1058] sm:$0xff]  }
 0x2c2   :  { %10933 = vmatprep.subr.bf16.mxu0 %v11535_v53  ;;  %10972 = vmatprep.subr.bf16.mxu1 %v16282_v43  ;;  %v11544_v53 = vld [vmem:[%s16121_s1 + $0x1060] sm:$0xff]  }
 0x2c3   :  { %10986 = vmatprep.mubr.msk.bf16.mxu1 %vm11721_vm0, %v16282_v43 }
 0x2c5   :  { %10934 = vmatpush3.bf16.msra.mxu0 %v11536_v4  ;;  %10973 = vmatpush3.bf16.msra.mxu1 %v11537_v3  ;;  %v11542_v4 = vld [vmem:[%s16121_s1 + $0x1018] sm:$0xff]  }
 0x2c6   :  { %10935 = vmatprep.subr.bf16.mxu0 %v11538_v29  ;;  %10974 = vmatprep.subr.bf16.mxu1 %v16282_v43  ;;  %v11543_v3 = vld [vmem:[%s16121_s1 + $0x1098] sm:$0xff]  }
 0x2c9   :  { %10936 = vmatpush3.bf16.msra.mxu0 %v11539_v18  ;;  %10975 = vmatpush3.bf16.msra.mxu1 %v11540_v22  ;;  %v11545_v18 = vld [vmem:[%s16121_s1 + $0x1020] sm:$0xff]   ;;  %v11547_v22 = vld [vmem:[%s16121_s1 + $0x1068] sm:$0xff]  }
 0x2ca   :  { %10937 = vmatprep.subr.bf16.mxu0 %v11541_v50  ;;  %10976 = vmatprep.subr.bf16.mxu1 %v16282_v43  ;;  %v11546_v50 = vld [vmem:[%s16121_s1 + $0x10a0] sm:$0xff]  }
 0x2cd   :  { %10938 = vmatpush3.bf16.msra.mxu0 %v11542_v4  ;;  %10977 = vmatpush3.bf16.msra.mxu1 %v11543_v3  ;;  %v11550_v3 = vld [vmem:[%s16121_s1 + $0x1070] sm:$0xff]  }
 0x2ce   :  { %v10639_v29 = vpop.f32.mrb[36].mxu0  ;;  %10939 = vmatprep.subr.bf16.mxu0 %v11544_v53  ;;  %10978 = vmatprep.subr.bf16.mxu1 %v16282_v43 }
 0x2cf   :  { %v10640_v17 = vpop.f32.mrb[37].mxu0 }
 0x2d0   :  { %v10641_v63 = vadd.f32 %v10640_v17, %v10639_v29  ;;  %v10642_v49 = vpop.f32.mrb[38].mxu0  ;;  %v10661_v8 = vpop.f32.mrb[36].mxu1  ;;  %v11548_v17 = vld [vmem:[%s16121_s1 + $0x1028] sm:$0xff]   ;;  %v11554_v29 = vld [vmem:[%s16121_s1 + $0x1038] sm:$0xff]  }
 0x2d1   :  { %v10643_v46 = vpop.f32.mrb[39].mxu0  ;;  %v10662_v9 = vpop.f32.mrb[37].mxu1  ;;  %10940 = vmatpush3.bf16.msra.mxu0 %v11545_v18  ;;  %10979 = vmatpush3.bf16.msra.mxu1 %v11546_v50  ;;  %v14698_v18 = vld [vmem:[%s16120_s0 + $0x200] sm:$0xff]  ;;  %v14703_v50 = vld [vmem:[%s16120_s0 + $0x210] sm:$0xff] }
 0x2d2   :  { %v6401_v31 = vadd.f32 %v10641_v63, %v14543_v59  ;;  %v10663_v4 = vadd.f32 %v10662_v9, %v10661_v8  ;;  %v10664_v6 = vpop.f32.mrb[38].mxu1  ;;  %10941 = vmatprep.subr.bf16.mxu0 %v11547_v22  ;;  %v11549_v46 = vld [vmem:[%s16121_s1 + $0x10a8] sm:$0xff]   ;;  %10980 = vmatprep.subr.bf16.mxu1 %v16282_v43  ;;  %v11553_v9 = vld [vmem:[%s16121_s1 + $0x1078] sm:$0xff]   ;;  %v11552_v63 = vld [vmem:[%s16121_s1 + $0x10b0] sm:$0xff]   ;;  %16284 = vst [vmem:[#allocation61_spill] sm:$0xff] %v14698_v18 }
 0x2d3   :  { %v10665_v49 = vpop.f32.mrb[39].mxu1  ;;  %v11551_v6 = vld [vmem:[%s16121_s1 + $0x1030] sm:$0xff]   ;;  %v11555_v8 = vld [vmem:[%s16121_s1 + $0x10b8] ss:$0 sps:$4 sm:$0xff]   ;;  %16285 = vst [vmem:[#allocation62_spill] sm:$0xff] %v14703_v50 }
 0x2d4   :  { %v6441_v53 = vadd.f32 %v10663_v4, %v6401_v31  ;;  %v14678_v31 = vld [vmem:[%s16120_s0 + $0x208] sm:$0xff]  ;;  %v5644_v22 = vsel %vm5642_vm1, %v11555_v8, 0  ;;  %v1344_v4 = vpack.c.bf16 %v14698_v18, %v14698_v18 }
 0x2d5   :  { %10942 = vmatpush3.bf16.msra.mxu0 %v11548_v17  ;;  %16283 = vst [vmem:[#allocation60_spill] sm:$0xff] %v14678_v31  ;;  %v1345_v59 = vpack.c.bf16 %v14678_v31, %v14678_v31  ;;  %10981 = vmatpush3.bf16.msra.mxu1 %v11549_v46  ;;  %v1346_v17 = vpack.c.bf16 %v14703_v50, %v14703_v50 }
 0x2d6   :  { %10943 = vmatprep.subr.bf16.mxu0 %v11550_v3  ;;  %10982 = vmatprep.subr.bf16.mxu1 %v16282_v43 }
 0x2d7   :  { %6958 = vmatprep.mubr.bf16.mxu0 %v1345_v59 }
 0x2d9   :  { %10944 = vmatpush3.bf16.msra.mxu0 %v11551_v6  ;;  %10983 = vmatpush3.bf16.msra.mxu1 %v11552_v63 }
 0x2da   :  { %10945 = vmatprep.subr.bf16.mxu0 %v11553_v9  ;;  %10984 = vmatprep.subr.bf16.mxu1 %v16282_v43 }
 0x2dd   :  { %10946 = vmatpush3.bf16.msra.mxu0 %v11554_v29  ;;  %10985 = vmatpush3.bf16.msra.mxu1 %v5644_v22 }
 0x2e0   :  { %6959 = vmatmul.mubr.bf16.vlgmr.msra.gmra.mrb[64].mxu0 %v1344_v4  ;;  %10987 = vmatmul.mubr.msk.bf16.vlgmr.msra.gmra.mrb[64].mxu1 %vm5638_vm2, %v1346_v17 }
 0x2e1   :  { %10998 = vmatprep.mubr.msk.f32.mxu0 %vm11721_vm0, %v16282_v43 }
 0x2ee   :  { %v10683_v49 = vpop.f32.mrb[40].mxu0 }
 0x2ef   :  { %v10684_v3 = vpop.f32.mrb[41].mxu0 }
 0x2f0   :  { %v10685_v46 = vadd.f32 %v10684_v3, %v10683_v49  ;;  %v10686_v6 = vpop.f32.mrb[42].mxu0  ;;  %v10705_v9 = vpop.f32.mrb[40].mxu1 }
 0x2f1   :  { %v10687_v59 = vpop.f32.mrb[43].mxu0  ;;  %v10706_v8 = vpop.f32.mrb[41].mxu1 }
 0x2f2   :  { %v6481_v63 = vadd.f32 %v10685_v46, %v6441_v53  ;;  %v10707_v29 = vadd.f32 %v10706_v8, %v10705_v9  ;;  %v10708_v31 = vpop.f32.mrb[42].mxu1 }
 0x2f3   :  { %v10709_v18 = vpop.f32.mrb[43].mxu1 }
 0x2f4   :  { %v6521_v50 = vadd.f32 %v10707_v29, %v6481_v63 }
 0x30f   :  { %v10727_v22 = vpop.f32.mrb[44].mxu0 }
 0x310   :  { %v10728_v58 = vpop.f32.mrb[45].mxu0  ;;  %v10749_v1 = vpop.f32.mrb[44].mxu1 }
 0x311   :  { %v10729_v4 = vadd.f32 %v10728_v58, %v10727_v22  ;;  %v10730_v12 = vpop.f32.mrb[46].mxu0  ;;  %v10750_v17 = vpop.f32.mrb[45].mxu1 }
 0x312   :  { %v10731_v38 = vpop.f32.mrb[47].mxu0  ;;  %v10751_v47 = vadd.f32 %v10750_v17, %v10749_v1  ;;  %v10752_v21 = vpop.f32.mrb[46].mxu1  ;;  %v11722_v1 = vmov 0.0|0.0   ;;  %v7009_v12 = vld [vmem:[%s16123_s3 + $0x10] sm:$0xff] }
 0x313   :  { %v6561_v14 = vadd.f32 %v10729_v4, %v6521_v50  ;;  %v10753_v49 = vpop.f32.mrb[47].mxu1  ;;  %v7007_v38 = vld [vmem:[%s16123_s3] sm:$0xff]  ;;  %v7008_v21 = vld [vmem:[%s16123_s3 + $0x8] sm:$0xff]  ;;  %11009 = vmatprep.subr.bf16.mxu0 %v11722_v1  ;;  %v7010_v50 = vld [vmem:[%s16123_s3 + $0x18] sm:$0xff] }
 0x314   :  { %v11013_v22 = vpack.c.bf16 %v7010_v50, %v7009_v12 }
 0x315   :  { %v6601_v3 = vadd.f32 %v10751_v47, %v6561_v14  ;;  %v11010_v14 = vpack.c.bf16 %v7008_v21, %v7007_v38 }
 0x317   :  { %11011 = vmatpush3.bf16.msra.mxu0 %v11010_v14 }
 0x318   :  { %11012 = vmatprep.subr.bf16.mxu0 %v11722_v1 }
 0x31b   :  { %11014 = vmatpush3.bf16.msra.mxu0 %v11013_v22 }
 0x331   :  { %v10771_v6 = vpop.f32.mrb[48].mxu0  ;;  %v10793_v9 = vpop.f32.mrb[48].mxu1 }
 0x332   :  { %v10772_v59 = vpop.f32.mrb[49].mxu0  ;;  %v10794_v18 = vpop.f32.mrb[49].mxu1 }
 0x333   :  { %v10773_v53 = vadd.f32 %v10772_v59, %v10771_v6  ;;  %v10774_v46 = vpop.f32.mrb[50].mxu0  ;;  %v10795_v8 = vadd.f32 %v10794_v18, %v10793_v9  ;;  %v10796_v29 = vpop.f32.mrb[50].mxu1 }
 0x334   :  { %v10775_v31 = vpop.f32.mrb[51].mxu0  ;;  %v10797_v58 = vpop.f32.mrb[51].mxu1 }
 0x335   :  { %v6641_v63 = vadd.f32 %v10773_v53, %v6601_v3 }
 0x337   :  { %v6681_v47 = vadd.f32 %v10795_v8, %v6641_v63 }
 0x353   :  { %v10815_v4 = vpop.f32.mrb[52].mxu0  ;;  %v10837_v6 = vpop.f32.mrb[52].mxu1 }
 0x354   :  { %v10816_v17 = vpop.f32.mrb[53].mxu0  ;;  %v10838_v46 = vpop.f32.mrb[53].mxu1 }
 0x355   :  { %v10817_v49 = vadd.f32 %v10816_v17, %v10815_v4  ;;  %v10818_v3 = vpop.f32.mrb[54].mxu0  ;;  %v10839_v9 = vadd.f32 %v10838_v46, %v10837_v6  ;;  %v10840_v31 = vpop.f32.mrb[54].mxu1 }
 0x356   :  { %v10819_v59 = vpop.f32.mrb[55].mxu0  ;;  %v10841_v18 = vpop.f32.mrb[55].mxu1 }
 0x357   :  { %v6721_v53 = vadd.f32 %v10817_v49, %v6681_v47 }
 0x359   :  { %v6761_v63 = vadd.f32 %v10839_v9, %v6721_v53 }
 0x373   :  { %v10859_v8 = vpop.f32.mrb[56].mxu0  ;;  %v10881_v58 = vpop.f32.mrb[56].mxu1 }
 0x374   :  { %v10860_v29 = vpop.f32.mrb[57].mxu0  ;;  %v10882_v12 = vpop.f32.mrb[57].mxu1 }
 0x375   :  { %v10861_v38 = vadd.f32 %v10860_v29, %v10859_v8  ;;  %v10862_v21 = vpop.f32.mrb[58].mxu0  ;;  %v10883_v50 = vadd.f32 %v10882_v12, %v10881_v58  ;;  %v10884_v22 = vpop.f32.mrb[58].mxu1 }
 0x376   :  { %v10863_v14 = vpop.f32.mrb[59].mxu0  ;;  %v10885_v4 = vpop.f32.mrb[59].mxu1 }
 0x377   :  { %v6801_v1 = vadd.f32 %v10861_v38, %v6761_v63 }
 0x379   :  { %v6841_v17 = vadd.f32 %v10883_v50, %v6801_v1 }
 0x393   :  { %v10903_v3 = vpop.f32.mrb[60].mxu0  ;;  %v10925_v6 = vpop.f32.mrb[60].mxu1 }
 0x394   :  { %v10904_v59 = vpop.f32.mrb[61].mxu0  ;;  %v10926_v31 = vpop.f32.mrb[61].mxu1 }
 0x395   :  { %v10905_v47 = vadd.f32 %v10904_v59, %v10903_v3  ;;  %v10906_v49 = vpop.f32.mrb[62].mxu0  ;;  %v10927_v9 = vadd.f32 %v10926_v31, %v10925_v6  ;;  %v10928_v18 = vpop.f32.mrb[62].mxu1 }
 0x396   :  { %v10907_v46 = vpop.f32.mrb[63].mxu0  ;;  %v10929_v8 = vpop.f32.mrb[63].mxu1 }
 0x397   :  { %v6881_v53 = vadd.f32 %v10905_v47, %v6841_v17  ;;  %v10189_v17 = vld [vmem:[%s16124_s4] ss:$0 sm:$0xff] }
 0x399   :  { %v6921_v29 = vadd.f32 %v10927_v9, %v6881_v53 }
 0x3b3   :  { %v10947_v21 = vpop.f32.mrb[64].mxu0  ;;  %v7000_v58 = vpop.f32.mrb[64].mxu1 }
 0x3b4   :  { %v10948_v14 = vpop.f32.mrb[65].mxu0  ;;  %v10988_v22 = vpop.f32.mrb[65].mxu1 }
 0x3b5   :  { %v10949_v63 = vadd.f32 %v10948_v14, %v10947_v21  ;;  %v10950_v38 = vpop.f32.mrb[66].mxu0  ;;  %v7003_v50 = vpop.f32.mrb[66].mxu1 }
 0x3b6   :  { %v10951_v12 = vpop.f32.mrb[67].mxu0  ;;  %v10989_v4 = vpop.f32.mrb[67].mxu1 }
 0x3b7   :  { %v6961_v1 = vadd.f32 %v10949_v63, %v6921_v29 }
 0x3b9   :  { %v7001_v3 = vadd.f32 %v7000_v58, %v6961_v1 }
 0x3bb   :  { %v7006_v59 = vmax.f32 %v7001_v3, 0.0 }
 0x3bd   :  { %10999 = vmatmul.mubr.msk.f32.vlgmr.msra.gmra.mrb[68].mxu0 %vm7018_vm3, %v7006_v59 }
 0x490   :  { %v7088_v47 = vpop.f32.mrb[68].mxu0 }
 0x491   :  { %v7089_v49 = vadd.f32 %v10189_v17, %v7088_v47  ;;  %v11000_v6 = vpop.f32.mrb[69].mxu0 }
 0x493   :  { %v7092_v46 = vmax.f32 %v7089_v49, 0.0 }
 0x494   :  { %11714 = dma.done.wait [#allocation4], 17152 }
 0x495   :  { %11715 = vsyncadd [#allocation4], 4294950144 }
 0x496   :  { %11716 = dma.done.wait [#allocation4 + $0x1], 1072 }
 0x497   :  { %11717 = vsyncadd [#allocation4 + $0x1], 4294966224  ;;  %v11723_v31 = vmov 0   ;;  %v7102_v53 = vld [vmem:[#allocation2 + $0x8] sm:$0xff]  ;;  %v7104_v9 = vld [vmem:[#allocation2 + $0x18] sm:$0xff]  ;;  %v14731_v12 = vpack.c.bf16 %v7092_v46, %v7092_v46  ;;  %v7253_v35 = vlaneseq  ;;  %s11724_s4 = smov [#allocation5]  }
 0x498   :  { %7623 = vmatprep.mubr.bf16.mxu1 %v11723_v31  ;;  %7664 = vmatprep.mubr.bf16.mxu0 %v11723_v31  ;;  %v7101_v18 = vld [vmem:[#allocation2] sm:$0xff]  ;;  %v7103_v8 = vld [vmem:[#allocation2 + $0x10] sm:$0xff]  ;;  %v7168_v14 = vld [vmem:[#allocation2 + $0x218] sm:$0xff]  ;;  %s9601_s13 = sshll.u32 %s11724_s4, 4  ;;  %s9602_s13 = int_to_ptr.vmem [resolvable:$true] %s9601_s13 }
 0x499   :  { %7591 = vmatprep.subr.bf16.mxu1 %v7102_v53  ;;  %7632 = vmatprep.subr.bf16.mxu0 %v7104_v9  ;;  %v7169_v29 = vld [vmem:[#allocation2 + $0x220] sm:$0xff]  ;;  %v7171_v21 = vld [vmem:[#allocation2 + $0x230] sm:$0xff]  ;;  %v7170_v63 = vld [vmem:[#allocation2 + $0x228] sm:$0xff]  ;;  %v7254_v55 = vshrl.u32 %v7253_v35, 7  ;;  %s11692_s5 = scalar_lea.vmem %s9602_s13, 8576  ;;  %p11697_p1 = scmp.lt.s32.totalorder %s9602_s13, %s9602_s13 }
 0x49a   :  { %7592 = vmatpush1.bf16.msra.mxu1 %v7101_v18  ;;  %7633 = vmatpush1.bf16.msra.mxu0 %v7103_v8  ;;  %v7106_v38 = vld [vmem:[#allocation2 + $0x28] sm:$0xff]  ;;  %v7108_v58 = vld [vmem:[#allocation2 + $0x38] sm:$0xff]  ;;  %v7105_v22 = vld [vmem:[#allocation2 + $0x20] sm:$0xff]  ;;  %p11693_p0 = scmp.ne.s32.totalorder %s9602_s13, %s11692_s5  ;;  %p11698_p2 = scmp.lt.s32.totalorder %s11692_s5, %s11692_s5 }
 0x49b   :  { %7593 = vmatprep.subr.bf16.mxu1 %v7169_v29  ;;  %7634 = vmatprep.subr.bf16.mxu0 %v7171_v21  ;;  %v7107_v1 = vld [vmem:[#allocation2 + $0x30] sm:$0xff]  ;;  %v7173_v50 = vld [vmem:[#allocation2 + $0x240] sm:$0xff]  ;;  %v7172_v3 = vld [vmem:[#allocation2 + $0x238] sm:$0xff]  ;;  %v14884_v5 = vsub.s32 0, %v7254_v55  ;;  %v14894_v62 = vsub.s32 1, %v7254_v55  ;;  %v14896_v34 = vsub.s32 3, %v7254_v55 }
 0x49c   :  { %v7175_v4 = vld [vmem:[#allocation2 + $0x250] sm:$0xff]  ;;  %v7174_v59 = vld [vmem:[#allocation2 + $0x248] sm:$0xff]  ;;  %v7112_v47 = vld [vmem:[#allocation2 + $0x58] sm:$0xff]  ;;  %v14906_v35 = vsub.s32 5, %v7254_v55  ;;  %p11699_p3 = por %p11698_p2, %p11697_p1 }
 0x49d   :  { %v7110_v17 = vld [vmem:[#allocation2 + $0x48] sm:$0xff]  ;;  %v7109_v49 = vld [vmem:[#allocation2 + $0x40] sm:$0xff]  ;;  %v7111_v6 = vld [vmem:[#allocation2 + $0x50] sm:$0xff] }
 0x49e   :  { %7594 = vmatpush1.bf16.msra.mxu1 %v7168_v14  ;;  %7635 = vmatpush1.bf16.msra.mxu0 %v7170_v63  ;;  %v7177_v46 = vld [vmem:[#allocation2 + $0x260] sm:$0xff]  ;;  %v7179_v53 = vld [vmem:[#allocation2 + $0x270] sm:$0xff]  ;;  %v7176_v9 = vld [vmem:[#allocation2 + $0x258] sm:$0xff]  ;;  %p11700_p4 = pnand %p11699_p3, %p11693_p0 }
 0x49f   :  { %7673 = vmatprep.subr.bf16.mxu1 %v7106_v38  ;;  %7714 = vmatprep.subr.bf16.mxu0 %v7108_v58  ;;  %v7178_v18 = vld [vmem:[#allocation2 + $0x268] sm:$0xff]  ;;  %v7116_v29 = vld [vmem:[#allocation2 + $0x78] sm:$0xff]  ;;  %v7113_v21 = vld [vmem:[#allocation2 + $0x60] sm:$0xff] }
 0x4a0   :  { %v7114_v8 = vld [vmem:[#allocation2 + $0x68] sm:$0xff]  ;;  %v7115_v14 = vld [vmem:[#allocation2 + $0x70] sm:$0xff]  ;;  %v7181_v63 = vld [vmem:[#allocation2 + $0x280] sm:$0xff] }
 0x4a1   :  { %10191 = vmatmul.mubr.msk.bf16.vlgmr.msra.gmra.mrb[68].mxu1 %vm7018_vm3, %v14731_v12  ;;  %10192 = vmatmul.mubr.msk.bf16.vlgmr.msra.gmra.mrb[72].mxu0 %vm7018_vm3, %v14731_v12  ;;  %v7183_v38 = vld [vmem:[#allocation2 + $0x290] sm:$0xff]  ;;  %v7180_v58 = vld [vmem:[#allocation2 + $0x278] sm:$0xff] }
 0x4a2   :  { %7674 = vmatpush1.bf16.msra.mxu1 %v7105_v22  ;;  %7715 = vmatpush1.bf16.msra.mxu0 %v7107_v1  ;;  %v7182_v22 = vld [vmem:[#allocation2 + $0x288] sm:$0xff]  ;;  %v14910_v41 = vld [vmem:[#allocation3 + $0x8] sm:$0xff] }
 0x4a3   :  { %7675 = vmatprep.subr.bf16.mxu1 %v7173_v50  ;;  %7716 = vmatprep.subr.bf16.mxu0 %v7175_v4  ;;  %v7118_v1 = vld [vmem:[#allocation2 + $0x88] sm:$0xff]  ;;  %v7120_v50 = vld [vmem:[#allocation2 + $0x98] sm:$0xff]  ;;  %v7117_v4 = vld [vmem:[#allocation2 + $0x80] sm:$0xff] }
 0x4a4   :  { %7705 = vmatprep.mubr.bf16.mxu1 %v11723_v31  ;;  %7746 = vmatprep.mubr.bf16.mxu0 %v11723_v31 }
 0x4a6   :  { %7676 = vmatpush1.bf16.msra.mxu1 %v7172_v3  ;;  %7717 = vmatpush1.bf16.msra.mxu0 %v7174_v59  ;;  %v7119_v3 = vld [vmem:[#allocation2 + $0x90] sm:$0xff]  ;;  %v7185_v59 = vld [vmem:[#allocation2 + $0x2a0] sm:$0xff] }
 0x4a7   :  { %7755 = vmatprep.subr.bf16.mxu1 %v7110_v17  ;;  %7796 = vmatprep.subr.bf16.mxu0 %v7112_v47  ;;  %v7187_v17 = vld [vmem:[#allocation2 + $0x2b0] sm:$0xff]  ;;  %v7184_v47 = vld [vmem:[#allocation2 + $0x298] sm:$0xff] }
 0x4a9   :  { %10193 = vmatmul.mubr.msk.bf16.vlgmr.msra.gmra.mrb[72].mxu1 %vm7018_vm3, %v14731_v12  ;;  %10194 = vmatmul.mubr.msk.bf16.vlgmr.msra.gmra.mrb[76].mxu0 %vm7018_vm3, %v14731_v12 }
 0x4aa   :  { %7756 = vmatpush1.bf16.msra.mxu1 %v7109_v49  ;;  %7797 = vmatpush1.bf16.msra.mxu0 %v7111_v6  ;;  %v7186_v49 = vld [vmem:[#allocation2 + $0x2a8] sm:$0xff] }
 0x4ab   :  { %7757 = vmatprep.subr.bf16.mxu1 %v7177_v46  ;;  %7798 = vmatprep.subr.bf16.mxu0 %v7179_v53  ;;  %v7122_v6 = vld [vmem:[#allocation2 + $0xa8] sm:$0xff]  ;;  %v7124_v46 = vld [vmem:[#allocation2 + $0xb8] sm:$0xff]  ;;  %v7121_v53 = vld [vmem:[#allocation2 + $0xa0] sm:$0xff] }
 0x4ac   :  { %7787 = vmatprep.mubr.bf16.mxu1 %v11723_v31  ;;  %7828 = vmatprep.mubr.bf16.mxu0 %v11723_v31 }
 0x4ae   :  { %7758 = vmatpush1.bf16.msra.mxu1 %v7176_v9  ;;  %7799 = vmatpush1.bf16.msra.mxu0 %v7178_v18  ;;  %v7123_v9 = vld [vmem:[#allocation2 + $0xb0] sm:$0xff]  ;;  %v7189_v18 = vld [vmem:[#allocation2 + $0x2c0] sm:$0xff] }
 0x4af   :  { %7837 = vmatprep.subr.bf16.mxu1 %v7114_v8  ;;  %7878 = vmatprep.subr.bf16.mxu0 %v7116_v29  ;;  %v7191_v8 = vld [vmem:[#allocation2 + $0x2d0] sm:$0xff]  ;;  %v7188_v29 = vld [vmem:[#allocation2 + $0x2b8] sm:$0xff] }
 0x4b1   :  { %10195 = vmatmul.mubr.msk.bf16.vlgmr.msra.gmra.mrb[76].mxu1 %vm7018_vm3, %v14731_v12  ;;  %10196 = vmatmul.mubr.msk.bf16.vlgmr.msra.gmra.mrb[80].mxu0 %vm7018_vm3, %v14731_v12 }
 0x4b2   :  { %7838 = vmatpush1.bf16.msra.mxu1 %v7113_v21  ;;  %7879 = vmatpush1.bf16.msra.mxu0 %v7115_v14  ;;  %v7190_v21 = vld [vmem:[#allocation2 + $0x2c8] sm:$0xff] }
 0x4b3   :  { %7839 = vmatprep.subr.bf16.mxu1 %v7181_v63  ;;  %7880 = vmatprep.subr.bf16.mxu0 %v7183_v38  ;;  %v7126_v14 = vld [vmem:[#allocation2 + $0xc8] sm:$0xff]  ;;  %v7128_v63 = vld [vmem:[#allocation2 + $0xd8] sm:$0xff]  ;;  %v7125_v38 = vld [vmem:[#allocation2 + $0xc0] sm:$0xff] }
 0x4b4   :  { %7869 = vmatprep.mubr.bf16.mxu1 %v11723_v31  ;;  %7910 = vmatprep.mubr.bf16.mxu0 %v11723_v31 }
 0x4b6   :  { %7840 = vmatpush1.bf16.msra.mxu1 %v7180_v58  ;;  %7881 = vmatpush1.bf16.msra.mxu0 %v7182_v22  ;;  %v7127_v58 = vld [vmem:[#allocation2 + $0xd0] sm:$0xff]  ;;  %v7193_v22 = vld [vmem:[#allocation2 + $0x2e0] sm:$0xff] }
 0x4b7   :  { %7919 = vmatprep.subr.bf16.mxu1 %v7118_v1  ;;  %7960 = vmatprep.subr.bf16.mxu0 %v7120_v50  ;;  %v7195_v1 = vld [vmem:[#allocation2 + $0x2f0] sm:$0xff]  ;;  %v7192_v50 = vld [vmem:[#allocation2 + $0x2d8] sm:$0xff] }
 0x4b9   :  { %10197 = vmatmul.mubr.msk.bf16.vlgmr.msra.gmra.mrb[80].mxu1 %vm7018_vm3, %v14731_v12  ;;  %10198 = vmatmul.mubr.msk.bf16.vlgmr.msra.gmra.mrb[84].mxu0 %vm7018_vm3, %v14731_v12 }
 0x4ba   :  { %7920 = vmatpush1.bf16.msra.mxu1 %v7117_v4  ;;  %7961 = vmatpush1.bf16.msra.mxu0 %v7119_v3  ;;  %v7194_v4 = vld [vmem:[#allocation2 + $0x2e8] sm:$0xff] }
 0x4bb   :  { %7921 = vmatprep.subr.bf16.mxu1 %v7185_v59  ;;  %7962 = vmatprep.subr.bf16.mxu0 %v7187_v17  ;;  %v7130_v3 = vld [vmem:[#allocation2 + $0xe8] sm:$0xff]  ;;  %v7132_v59 = vld [vmem:[#allocation2 + $0xf8] sm:$0xff]  ;;  %v7129_v17 = vld [vmem:[#allocation2 + $0xe0] sm:$0xff] }
 0x4bc   :  { %7951 = vmatprep.mubr.bf16.mxu1 %v11723_v31  ;;  %7992 = vmatprep.mubr.bf16.mxu0 %v11723_v31 }
 0x4be   :  { %7922 = vmatpush1.bf16.msra.mxu1 %v7184_v47  ;;  %7963 = vmatpush1.bf16.msra.mxu0 %v7186_v49  ;;  %v7131_v47 = vld [vmem:[#allocation2 + $0xf0] sm:$0xff]  ;;  %v7197_v49 = vld [vmem:[#allocation2 + $0x300] sm:$0xff] }
 0x4bf   :  { %8001 = vmatprep.subr.bf16.mxu1 %v7122_v6  ;;  %8042 = vmatprep.subr.bf16.mxu0 %v7124_v46  ;;  %v7199_v6 = vld [vmem:[#allocation2 + $0x310] sm:$0xff]  ;;  %v7196_v46 = vld [vmem:[#allocation2 + $0x2f8] sm:$0xff] }
 0x4c1   :  { %10199 = vmatmul.mubr.msk.bf16.vlgmr.msra.gmra.mrb[84].mxu1 %vm7018_vm3, %v14731_v12  ;;  %10200 = vmatmul.mubr.msk.bf16.vlgmr.msra.gmra.mrb[88].mxu0 %vm7018_vm3, %v14731_v12 }
 0x4c2   :  { %8002 = vmatpush1.bf16.msra.mxu1 %v7121_v53  ;;  %8043 = vmatpush1.bf16.msra.mxu0 %v7123_v9  ;;  %v7198_v53 = vld [vmem:[#allocation2 + $0x308] sm:$0xff] }
 0x4c3   :  { %8003 = vmatprep.subr.bf16.mxu1 %v7189_v18  ;;  %8044 = vmatprep.subr.bf16.mxu0 %v7191_v8  ;;  %v7134_v9 = vld [vmem:[#allocation2 + $0x108] sm:$0xff]  ;;  %v7136_v18 = vld [vmem:[#allocation2 + $0x118] sm:$0xff]  ;;  %v7133_v8 = vld [vmem:[#allocation2 + $0x100] sm:$0xff] }
 0x4c4   :  { %8033 = vmatprep.mubr.bf16.mxu1 %v11723_v31  ;;  %8074 = vmatprep.mubr.bf16.mxu0 %v11723_v31 }
 0x4c6   :  { %8004 = vmatpush1.bf16.msra.mxu1 %v7188_v29  ;;  %8045 = vmatpush1.bf16.msra.mxu0 %v7190_v21  ;;  %v7135_v29 = vld [vmem:[#allocation2 + $0x110] sm:$0xff]  ;;  %v7201_v21 = vld [vmem:[#allocation2 + $0x320] sm:$0xff] }
 0x4c7   :  { %8083 = vmatprep.subr.bf16.mxu1 %v7126_v14  ;;  %8124 = vmatprep.subr.bf16.mxu0 %v7128_v63  ;;  %v7203_v14 = vld [vmem:[#allocation2 + $0x330] sm:$0xff]  ;;  %v7200_v63 = vld [vmem:[#allocation2 + $0x318] sm:$0xff] }
 0x4c9   :  { %10201 = vmatmul.mubr.msk.bf16.vlgmr.msra.gmra.mrb[88].mxu1 %vm7018_vm3, %v14731_v12  ;;  %10202 = vmatmul.mubr.msk.bf16.vlgmr.msra.gmra.mrb[92].mxu0 %vm7018_vm3, %v14731_v12 }
 0x4ca   :  { %8084 = vmatpush1.bf16.msra.mxu1 %v7125_v38  ;;  %8125 = vmatpush1.bf16.msra.mxu0 %v7127_v58  ;;  %v7202_v38 = vld [vmem:[#allocation2 + $0x328] sm:$0xff] }
 0x4cb   :  { %8085 = vmatprep.subr.bf16.mxu1 %v7193_v22  ;;  %8126 = vmatprep.subr.bf16.mxu0 %v7195_v1  ;;  %v7138_v58 = vld [vmem:[#allocation2 + $0x128] sm:$0xff]  ;;  %v7140_v22 = vld [vmem:[#allocation2 + $0x138] sm:$0xff]  ;;  %v7137_v1 = vld [vmem:[#allocation2 + $0x120] sm:$0xff] }
 0x4cc   :  { %8115 = vmatprep.mubr.bf16.mxu1 %v11723_v31  ;;  %8156 = vmatprep.mubr.bf16.mxu0 %v11723_v31 }
 0x4ce   :  { %8086 = vmatpush1.bf16.msra.mxu1 %v7192_v50  ;;  %8127 = vmatpush1.bf16.msra.mxu0 %v7194_v4  ;;  %v7139_v50 = vld [vmem:[#allocation2 + $0x130] sm:$0xff]  ;;  %v7205_v4 = vld [vmem:[#allocation2 + $0x340] sm:$0xff] }
 0x4cf   :  { %8165 = vmatprep.subr.bf16.mxu1 %v7130_v3  ;;  %8206 = vmatprep.subr.bf16.mxu0 %v7132_v59  ;;  %v7207_v3 = vld [vmem:[#allocation2 + $0x350] sm:$0xff]  ;;  %v7204_v59 = vld [vmem:[#allocation2 + $0x338] sm:$0xff] }
 0x4d1   :  { %10203 = vmatmul.mubr.msk.bf16.vlgmr.msra.gmra.mrb[92].mxu1 %vm7018_vm3, %v14731_v12  ;;  %10204 = vmatmul.mubr.msk.bf16.vlgmr.msra.gmra.mrb[96].mxu0 %vm7018_vm3, %v14731_v12 }
 0x4d2   :  { %8166 = vmatpush1.bf16.msra.mxu1 %v7129_v17  ;;  %8207 = vmatpush1.bf16.msra.mxu0 %v7131_v47  ;;  %v7206_v17 = vld [vmem:[#allocation2 + $0x348] sm:$0xff] }
 0x4d3   :  { %8167 = vmatprep.subr.bf16.mxu1 %v7197_v49  ;;  %8208 = vmatprep.subr.bf16.mxu0 %v7199_v6  ;;  %v7142_v47 = vld [vmem:[#allocation2 + $0x148] sm:$0xff]  ;;  %v7144_v49 = vld [vmem:[#allocation2 + $0x158] sm:$0xff]  ;;  %v7141_v6 = vld [vmem:[#allocation2 + $0x140] sm:$0xff] }
 0x4d4   :  { %8197 = vmatprep.mubr.bf16.mxu1 %v11723_v31  ;;  %8238 = vmatprep.mubr.bf16.mxu0 %v11723_v31 }
 0x4d6   :  { %8168 = vmatpush1.bf16.msra.mxu1 %v7196_v46  ;;  %8209 = vmatpush1.bf16.msra.mxu0 %v7198_v53  ;;  %v7143_v46 = vld [vmem:[#allocation2 + $0x150] sm:$0xff]  ;;  %v7209_v53 = vld [vmem:[#allocation2 + $0x360] sm:$0xff] }
 0x4d7   :  { %8247 = vmatprep.subr.bf16.mxu1 %v7134_v9  ;;  %8288 = vmatprep.subr.bf16.mxu0 %v7136_v18  ;;  %v7211_v9 = vld [vmem:[#allocation2 + $0x370] sm:$0xff]  ;;  %v7208_v18 = vld [vmem:[#allocation2 + $0x358] sm:$0xff] }
 0x4d9   :  { %10205 = vmatmul.mubr.msk.bf16.vlgmr.msra.gmra.mrb[96].mxu1 %vm7018_vm3, %v14731_v12  ;;  %10206 = vmatmul.mubr.msk.bf16.vlgmr.msra.gmra.mrb[100].mxu0 %vm7018_vm3, %v14731_v12 }
 0x4da   :  { %8248 = vmatpush1.bf16.msra.mxu1 %v7133_v8  ;;  %8289 = vmatpush1.bf16.msra.mxu0 %v7135_v29  ;;  %v7210_v8 = vld [vmem:[#allocation2 + $0x368] sm:$0xff] }
 0x4db   :  { %8249 = vmatprep.subr.bf16.mxu1 %v7201_v21  ;;  %8290 = vmatprep.subr.bf16.mxu0 %v7203_v14  ;;  %v7146_v29 = vld [vmem:[#allocation2 + $0x168] sm:$0xff]  ;;  %v7148_v21 = vld [vmem:[#allocation2 + $0x178] sm:$0xff]  ;;  %v7145_v14 = vld [vmem:[#allocation2 + $0x160] sm:$0xff] }
 0x4dc   :  { %8279 = vmatprep.mubr.bf16.mxu1 %v11723_v31  ;;  %8320 = vmatprep.mubr.bf16.mxu0 %v11723_v31 }
 0x4de   :  { %8250 = vmatpush1.bf16.msra.mxu1 %v7200_v63  ;;  %8291 = vmatpush1.bf16.msra.mxu0 %v7202_v38  ;;  %v7147_v63 = vld [vmem:[#allocation2 + $0x170] sm:$0xff]  ;;  %v7213_v38 = vld [vmem:[#allocation2 + $0x380] sm:$0xff] }
 0x4df   :  { %8329 = vmatprep.subr.bf16.mxu1 %v7138_v58  ;;  %8370 = vmatprep.subr.bf16.mxu0 %v7140_v22  ;;  %v7215_v58 = vld [vmem:[#allocation2 + $0x390] sm:$0xff]  ;;  %v7212_v22 = vld [vmem:[#allocation2 + $0x378] sm:$0xff] }
 0x4e1   :  { %10207 = vmatmul.mubr.msk.bf16.vlgmr.msra.gmra.mrb[100].mxu1 %vm7018_vm3, %v14731_v12  ;;  %10208 = vmatmul.mubr.msk.bf16.vlgmr.msra.gmra.mrb[104].mxu0 %vm7018_vm3, %v14731_v12 }
 0x4e2   :  { %8330 = vmatpush1.bf16.msra.mxu1 %v7137_v1  ;;  %8371 = vmatpush1.bf16.msra.mxu0 %v7139_v50  ;;  %v7214_v1 = vld [vmem:[#allocation2 + $0x388] sm:$0xff] }
 0x4e3   :  { %8331 = vmatprep.subr.bf16.mxu1 %v7205_v4  ;;  %8372 = vmatprep.subr.bf16.mxu0 %v7207_v3  ;;  %v7150_v50 = vld [vmem:[#allocation2 + $0x188] sm:$0xff]  ;;  %v7152_v4 = vld [vmem:[#allocation2 + $0x198] sm:$0xff]  ;;  %v7149_v3 = vld [vmem:[#allocation2 + $0x180] sm:$0xff] }
 0x4e4   :  { %8361 = vmatprep.mubr.bf16.mxu1 %v11723_v31  ;;  %8402 = vmatprep.mubr.bf16.mxu0 %v11723_v31 }
 0x4e6   :  { %8332 = vmatpush1.bf16.msra.mxu1 %v7204_v59  ;;  %8373 = vmatpush1.bf16.msra.mxu0 %v7206_v17  ;;  %v7151_v59 = vld [vmem:[#allocation2 + $0x190] sm:$0xff]  ;;  %v7217_v17 = vld [vmem:[#allocation2 + $0x3a0] sm:$0xff] }
 0x4e7   :  { %8411 = vmatprep.subr.bf16.mxu1 %v7142_v47  ;;  %8452 = vmatprep.subr.bf16.mxu0 %v7144_v49  ;;  %v7219_v47 = vld [vmem:[#allocation2 + $0x3b0] sm:$0xff]  ;;  %v7216_v49 = vld [vmem:[#allocation2 + $0x398] sm:$0xff] }
 0x4e9   :  { %10209 = vmatmul.mubr.msk.bf16.vlgmr.msra.gmra.mrb[104].mxu1 %vm7018_vm3, %v14731_v12  ;;  %10210 = vmatmul.mubr.msk.bf16.vlgmr.msra.gmra.mrb[108].mxu0 %vm7018_vm3, %v14731_v12 }
 0x4ea   :  { %8412 = vmatpush1.bf16.msra.mxu1 %v7141_v6  ;;  %8453 = vmatpush1.bf16.msra.mxu0 %v7143_v46  ;;  %v7218_v6 = vld [vmem:[#allocation2 + $0x3a8] sm:$0xff] }
 0x4eb   :  { %8413 = vmatprep.subr.bf16.mxu1 %v7209_v53  ;;  %8454 = vmatprep.subr.bf16.mxu0 %v7211_v9  ;;  %v7154_v46 = vld [vmem:[#allocation2 + $0x1a8] sm:$0xff]  ;;  %v7156_v53 = vld [vmem:[#allocation2 + $0x1b8] sm:$0xff]  ;;  %v7153_v9 = vld [vmem:[#allocation2 + $0x1a0] sm:$0xff] }
 0x4ec   :  { %8443 = vmatprep.mubr.bf16.mxu1 %v11723_v31  ;;  %8484 = vmatprep.mubr.bf16.mxu0 %v11723_v31 }
 0x4ee   :  { %8414 = vmatpush1.bf16.msra.mxu1 %v7208_v18  ;;  %8455 = vmatpush1.bf16.msra.mxu0 %v7210_v8  ;;  %v7155_v18 = vld [vmem:[#allocation2 + $0x1b0] sm:$0xff]  ;;  %v7221_v8 = vld [vmem:[#allocation2 + $0x3c0] sm:$0xff] }
 0x4ef   :  { %8493 = vmatprep.subr.bf16.mxu1 %v7146_v29  ;;  %8534 = vmatprep.subr.bf16.mxu0 %v7148_v21  ;;  %v7223_v29 = vld [vmem:[#allocation2 + $0x3d0] sm:$0xff]  ;;  %v7220_v21 = vld [vmem:[#allocation2 + $0x3b8] sm:$0xff] }
 0x4f1   :  { %10211 = vmatmul.mubr.msk.bf16.vlgmr.msra.gmra.mrb[108].mxu1 %vm7018_vm3, %v14731_v12  ;;  %10212 = vmatmul.mubr.msk.bf16.vlgmr.msra.gmra.mrb[112].mxu0 %vm7018_vm3, %v14731_v12 }
 0x4f2   :  { %8494 = vmatpush1.bf16.msra.mxu1 %v7145_v14  ;;  %8535 = vmatpush1.bf16.msra.mxu0 %v7147_v63  ;;  %v7222_v14 = vld [vmem:[#allocation2 + $0x3c8] sm:$0xff] }
 0x4f3   :  { %8495 = vmatprep.subr.bf16.mxu1 %v7213_v38  ;;  %8536 = vmatprep.subr.bf16.mxu0 %v7215_v58  ;;  %v7158_v63 = vld [vmem:[#allocation2 + $0x1c8] sm:$0xff]  ;;  %v7160_v38 = vld [vmem:[#allocation2 + $0x1d8] sm:$0xff]  ;;  %v7157_v58 = vld [vmem:[#allocation2 + $0x1c0] sm:$0xff] }
 0x4f4   :  { %8525 = vmatprep.mubr.bf16.mxu1 %v11723_v31  ;;  %8566 = vmatprep.mubr.bf16.mxu0 %v11723_v31 }
 0x4f6   :  { %8496 = vmatpush1.bf16.msra.mxu1 %v7212_v22  ;;  %8537 = vmatpush1.bf16.msra.mxu0 %v7214_v1  ;;  %v7159_v22 = vld [vmem:[#allocation2 + $0x1d0] sm:$0xff]  ;;  %v7225_v1 = vld [vmem:[#allocation2 + $0x3e0] sm:$0xff] }
 0x4f7   :  { %8575 = vmatprep.subr.bf16.mxu1 %v7150_v50  ;;  %8616 = vmatprep.subr.bf16.mxu0 %v7152_v4  ;;  %v7227_v50 = vld [vmem:[#allocation2 + $0x3f0] sm:$0xff]  ;;  %v7224_v4 = vld [vmem:[#allocation2 + $0x3d8] sm:$0xff] }
 0x4f9   :  { %10213 = vmatmul.mubr.msk.bf16.vlgmr.msra.gmra.mrb[112].mxu1 %vm7018_vm3, %v14731_v12  ;;  %10214 = vmatmul.mubr.msk.bf16.vlgmr.msra.gmra.mrb[116].mxu0 %vm7018_vm3, %v14731_v12 }
 0x4fa   :  { %8576 = vmatpush1.bf16.msra.mxu1 %v7149_v3  ;;  %8617 = vmatpush1.bf16.msra.mxu0 %v7151_v59  ;;  %v7226_v3 = vld [vmem:[#allocation2 + $0x3e8] sm:$0xff] }
 0x4fb   :  { %8577 = vmatprep.subr.bf16.mxu1 %v7217_v17  ;;  %8618 = vmatprep.subr.bf16.mxu0 %v7219_v47  ;;  %v7162_v59 = vld [vmem:[#allocation2 + $0x1e8] sm:$0xff]  ;;  %v7164_v17 = vld [vmem:[#allocation2 + $0x1f8] sm:$0xff]  ;;  %v7161_v47 = vld [vmem:[#allocation2 + $0x1e0] sm:$0xff] }
 0x4fc   :  { %8607 = vmatprep.mubr.bf16.mxu1 %v11723_v31  ;;  %8648 = vmatprep.mubr.bf16.mxu0 %v11723_v31 }
 0x4fe   :  { %8578 = vmatpush1.bf16.msra.mxu1 %v7216_v49  ;;  %8619 = vmatpush1.bf16.msra.mxu0 %v7218_v6  ;;  %v7163_v49 = vld [vmem:[#allocation2 + $0x1f0] sm:$0xff]  ;;  %v7229_v6 = vld [vmem:[#allocation2 + $0x400] sm:$0xff] }
 0x4ff   :  { %8657 = vmatprep.subr.bf16.mxu1 %v7154_v46  ;;  %8698 = vmatprep.subr.bf16.mxu0 %v7156_v53  ;;  %v7231_v46 = vld [vmem:[#allocation2 + $0x410] sm:$0xff]  ;;  %v7228_v53 = vld [vmem:[#allocation2 + $0x3f8] sm:$0xff] }
 0x501   :  { %10215 = vmatmul.mubr.msk.bf16.vlgmr.msra.gmra.mrb[116].mxu1 %vm7018_vm3, %v14731_v12  ;;  %10216 = vmatmul.mubr.msk.bf16.vlgmr.msra.gmra.mrb[120].mxu0 %vm7018_vm3, %v14731_v12 }
 0x502   :  { %8658 = vmatpush1.bf16.msra.mxu1 %v7153_v9  ;;  %8699 = vmatpush1.bf16.msra.mxu0 %v7155_v18  ;;  %v7230_v9 = vld [vmem:[#allocation2 + $0x408] sm:$0xff] }
 0x503   :  { %8659 = vmatprep.subr.bf16.mxu1 %v7221_v8  ;;  %8700 = vmatprep.subr.bf16.mxu0 %v7223_v29  ;;  %v7166_v18 = vld [vmem:[#allocation2 + $0x208] sm:$0xff]  ;;  %v7165_v8 = vld [vmem:[#allocation2 + $0x200] sm:$0xff]  ;;  %v7167_v29 = vld [vmem:[#allocation2 + $0x210] sm:$0xff] }
 0x504   :  { %8689 = vmatprep.mubr.bf16.mxu1 %v11723_v31  ;;  %8730 = vmatprep.mubr.bf16.mxu0 %v11723_v31 }
 0x506   :  { %8660 = vmatpush1.bf16.msra.mxu1 %v7220_v21  ;;  %8701 = vmatpush1.bf16.msra.mxu0 %v7222_v14  ;;  %v7233_v21 = vld [vmem:[#allocation2 + $0x420] sm:$0xff]  ;;  %v7232_v14 = vld [vmem:[#allocation2 + $0x418] sm:$0xff] }
 0x507   :  { %8739 = vmatprep.subr.bf16.mxu1 %v7158_v63  ;;  %8780 = vmatprep.subr.bf16.mxu0 %v7160_v38  ;;  %v7234_v63 = vld [vmem:[#allocation2 + $0x428] sm:$0xff] }
 0x509   :  { %10217 = vmatmul.mubr.msk.bf16.vlgmr.msra.gmra.mrb[120].mxu1 %vm7018_vm3, %v14731_v12  ;;  %10218 = vmatmul.mubr.msk.bf16.vlgmr.msra.gmra.mrb[124].mxu0 %vm7018_vm3, %v14731_v12 }
 0x50a   :  { %8740 = vmatpush1.bf16.msra.mxu1 %v7157_v58  ;;  %8781 = vmatpush1.bf16.msra.mxu0 %v7159_v22 }
 0x50b   :  { %8741 = vmatprep.subr.bf16.mxu1 %v7225_v1  ;;  %8782 = vmatprep.subr.bf16.mxu0 %v7227_v50 }
 0x50c   :  { %8771 = vmatprep.mubr.bf16.mxu1 %v11723_v31  ;;  %8812 = vmatprep.mubr.bf16.mxu0 %v11723_v31 }
 0x50e   :  { %8742 = vmatpush1.bf16.msra.mxu1 %v7224_v4  ;;  %8783 = vmatpush1.bf16.msra.mxu0 %v7226_v3 }
 0x50f   :  { %8821 = vmatprep.subr.bf16.mxu1 %v7162_v59  ;;  %8862 = vmatprep.subr.bf16.mxu0 %v7164_v17 }
 0x511   :  { %10219 = vmatmul.mubr.msk.bf16.vlgmr.msra.gmra.mrb[124].mxu1 %vm7018_vm3, %v14731_v12  ;;  %10220 = vmatmul.mubr.msk.bf16.vlgmr.msra.gmra.mrb[128].mxu0 %vm7018_vm3, %v14731_v12 }
 0x512   :  { %8822 = vmatpush1.bf16.msra.mxu1 %v7161_v47  ;;  %8863 = vmatpush1.bf16.msra.mxu0 %v7163_v49 }
 0x513   :  { %8823 = vmatprep.subr.bf16.mxu1 %v7229_v6  ;;  %8864 = vmatprep.subr.bf16.mxu0 %v7231_v46 }
 0x514   :  { %8853 = vmatprep.mubr.bf16.mxu1 %v11723_v31  ;;  %8894 = vmatprep.mubr.bf16.mxu0 %v11723_v31 }
 0x516   :  { %8824 = vmatpush1.bf16.msra.mxu1 %v7228_v53  ;;  %8865 = vmatpush1.bf16.msra.mxu0 %v7230_v9 }
 0x517   :  { %8903 = vmatprep.subr.bf16.mxu1 %v7166_v18  ;;  %11001 = vmatprep.subr.bf16.mxu0 %v16282_v43 }
 0x519   :  { %10221 = vmatmul.mubr.msk.bf16.vlgmr.msra.gmra.mrb[128].mxu1 %vm7018_vm3, %v14731_v12  ;;  %10222 = vmatmul.mubr.msk.bf16.vlgmr.msra.gmra.mrb[132].mxu0 %vm7018_vm3, %v14731_v12 }
 0x51a   :  { %8904 = vmatpush1.bf16.msra.mxu1 %v7165_v8  ;;  %11002 = vmatpush3.bf16.msra.mxu0 %v7167_v29 }
 0x51b   :  { %8905 = vmatprep.subr.bf16.mxu1 %v7233_v21  ;;  %11003 = vmatprep.subr.bf16.mxu0 %v16282_v43 }
 0x51c   :  { %8935 = vmatprep.mubr.bf16.mxu1 %v11723_v31  ;;  %11005 = vmatprep.mubr.msk.bf16.mxu0 %vm11721_vm0, %v16282_v43 }
 0x51e   :  { %8906 = vmatpush1.bf16.msra.mxu1 %v7232_v14  ;;  %11004 = vmatpush3.bf16.msra.mxu0 %v7234_v63 }
 0x521   :  { %10223 = vmatmul.mubr.msk.bf16.vlgmr.msra.gmra.mrb[132].mxu1 %vm7018_vm3, %v14731_v12  ;;  %11006 = vmatmul.mubr.msk.bf16.vlgmr.msra.gmra.mrb[136].mxu0 %vm7018_vm3, %v14731_v12 }
 0x574   :  { %v14836_v38 = vpop.f32.mrb[68].mxu1  ;;  %v14838_v58 = vpop.f32.mrb[72].mxu0 }
 0x575   :  { %v14840_v22 = vpop.f32.mrb[69].mxu1  ;;  %v14842_v1 = vpop.f32.mrb[73].mxu0 }
 0x576   :  { %v7629_v31 = vpop.f32.mrb[70].mxu1  ;;  %v7670_v50 = vpop.f32.mrb[74].mxu0 }
 0x577   :  { %v7630_v4 = vpop.f32.mrb[71].mxu1  ;;  %v7671_v43 = vpop.f32.mrb[75].mxu0 }
 0x57c   :  { %v14844_v3 = vpop.f32.mrb[72].mxu1  ;;  %v14846_v59 = vpop.f32.mrb[76].mxu0 }
 0x57d   :  { %v14848_v17 = vpop.f32.mrb[73].mxu1  ;;  %v14850_v47 = vpop.f32.mrb[77].mxu0 }
 0x57e   :  { %v7711_v12 = vpop.f32.mrb[74].mxu1  ;;  %v7752_v49 = vpop.f32.mrb[78].mxu0 }
 0x57f   :  { %v7712_v6 = vpop.f32.mrb[75].mxu1  ;;  %v7753_v46 = vpop.f32.mrb[79].mxu0 }
 0x584   :  { %v14852_v53 = vpop.f32.mrb[76].mxu1  ;;  %v14854_v9 = vpop.f32.mrb[80].mxu0 }
 0x585   :  { %v14856_v18 = vpop.f32.mrb[77].mxu1  ;;  %v14858_v8 = vpop.f32.mrb[81].mxu0 }
 0x586   :  { %v7793_v29 = vpop.f32.mrb[78].mxu1  ;;  %v7834_v21 = vpop.f32.mrb[82].mxu0 }
 0x587   :  { %v7794_v14 = vpop.f32.mrb[79].mxu1  ;;  %v7835_v63 = vpop.f32.mrb[83].mxu0 }
 0x58c   :  { %v14860_v31 = vpop.f32.mrb[80].mxu1  ;;  %v14862_v50 = vpop.f32.mrb[84].mxu0 }
 0x58d   :  { %v14864_v4 = vpop.f32.mrb[81].mxu1  ;;  %v14866_v43 = vpop.f32.mrb[85].mxu0 }
 0x58e   :  { %v7875_v12 = vpop.f32.mrb[82].mxu1  ;;  %v7916_v49 = vpop.f32.mrb[86].mxu0 }
 0x58f   :  { %v7876_v6 = vpop.f32.mrb[83].mxu1  ;;  %v7917_v46 = vpop.f32.mrb[87].mxu0 }
 0x594   :  { %v14868_v19 = vpop.f32.mrb[84].mxu1  ;;  %v14870_v11 = vpop.f32.mrb[88].mxu0 }
 0x595   :  { %v14872_v29 = vpop.f32.mrb[85].mxu1  ;;  %v14874_v21 = vpop.f32.mrb[89].mxu0 }
 0x596   :  { %v7957_v14 = vpop.f32.mrb[86].mxu1  ;;  %v7998_v63 = vpop.f32.mrb[90].mxu0 }
 0x597   :  { %v7958_v25 = vpop.f32.mrb[87].mxu1  ;;  %v7999_v15 = vpop.f32.mrb[91].mxu0  ;;  %v14892_v63 = vsub.s32 2, %v7254_v55 }
 0x598   :  { %v14890_v15 = vld [vmem:[#allocation3] sm:$0xff] }
 0x59c   :  { %v14876_v20 = vpop.f32.mrb[88].mxu1  ;;  %v14878_v44 = vpop.f32.mrb[92].mxu0 }
 0x59d   :  { %v14880_v12 = vpop.f32.mrb[89].mxu1  ;;  %v14882_v49 = vpop.f32.mrb[93].mxu0 }
 0x59e   :  { %v8039_v6 = vpop.f32.mrb[90].mxu1  ;;  %v8080_v46 = vpop.f32.mrb[94].mxu0 }
 0x59f   :  { %v8040_v24 = vpop.f32.mrb[91].mxu1  ;;  %v8081_v2 = vpop.f32.mrb[95].mxu0  ;;  %v14908_v46 = vsub.s32 7, %v7254_v55 }
 0x5a0   :  { %v14902_v2 = vsub.s32 4, %v7254_v55  ;;  %v14904_v24 = vsub.s32 6, %v7254_v55  ;;  %v14928_v55 = vld [vmem:[#allocation3 + $0x10] sm:$0xff] }
 0x5a4   :  { %v14886_v14 = vpop.f32.mrb[92].mxu1  ;;  %v14888_v25 = vpop.f32.mrb[96].mxu0 }
 0x5a5   :  { %16286 = vst [vmem:[#allocation63_spill] sm:$0xff] %v14886_v14  ;;  %16287 = vst [vmem:[#allocation64_spill] sm:$0xff] %v14888_v25  ;;  %v14898_v23 = vpop.f32.mrb[93].mxu1  ;;  %v14900_v6 = vpop.f32.mrb[97].mxu0 }
 0x5a6   :  { %16288 = vst [vmem:[#allocation65_spill] sm:$0xff] %v14898_v23  ;;  %16289 = vst [vmem:[#allocation66_spill] sm:$0xff] %v14900_v6  ;;  %v8121_v40 = vpop.f32.mrb[94].mxu1  ;;  %v8162_v26 = vpop.f32.mrb[98].mxu0  ;;  %v14972_v23 = vld [vmem:[#allocation3 + $0x20] sm:$0xff] }
 0x5a7   :  { %v8122_v37 = vpop.f32.mrb[95].mxu1  ;;  %v8163_v28 = vpop.f32.mrb[99].mxu0  ;;  %v14946_v40 = vld [vmem:[#allocation3 + $0x18] sm:$0xff]  ;;  %16295 = vst [vmem:[#allocation72_spill] sm:$0xff] %v14972_v23  ;;  %v16303_v23 = vrot.slane %v14890_v15, %v14902_v2 }
 0x5a8   :  { %16290 = vst [vmem:[#allocation67_spill] sm:$0xff] %v14946_v40  ;;  %v14990_v37 = vld [vmem:[#allocation3 + $0x28] sm:$0xff]  ;;  %v15030_v28 = vld [vmem:[#allocation3 + $0x38] sm:$0xff] }
 0x5a9   :  { %16296 = vst [vmem:[#allocation73_spill] sm:$0xff] %v14990_v37  ;;  %16300 = vst [vmem:[#allocation77_spill] sm:$0xff] %v15030_v28  ;;  %v16307_v37 = vrot.slane %v14890_v15, %v14892_v63 }
 0x5ac   :  { %v14948_v6 = vpop.f32.mrb[96].mxu1  ;;  %v14950_v45 = vpop.f32.mrb[100].mxu0 }
 0x5ad   :  { %16291 = vst [vmem:[#allocation68_spill] sm:$0xff] %v14948_v6  ;;  %16292 = vst [vmem:[#allocation69_spill] sm:$0xff] %v14950_v45  ;;  %v14960_v48 = vpop.f32.mrb[97].mxu1  ;;  %v14962_v39 = vpop.f32.mrb[101].mxu0  ;;  %v15008_v45 = vld [vmem:[#allocation3 + $0x30] sm:$0xff]  ;;  %v16305_v6 = vrot.slane %v14890_v15, %v14904_v24 }
 0x5ae   :  { %16293 = vst [vmem:[#allocation70_spill] sm:$0xff] %v14960_v48  ;;  %16294 = vst [vmem:[#allocation71_spill] sm:$0xff] %v14962_v39  ;;  %v8203_v26 = vpop.f32.mrb[98].mxu1  ;;  %v8244_v42 = vpop.f32.mrb[102].mxu0 }
 0x5af   :  { %v8204_v32 = vpop.f32.mrb[99].mxu1  ;;  %v8245_v48 = vpop.f32.mrb[103].mxu0  ;;  %16297 = vst [vmem:[#allocation74_spill] sm:$0xff] %v15008_v45  ;;  %v7749_v45 = vadd.f32 %v14846_v59, %v16305_v6  ;;  %v16308_v59 = vrot.slane %v14890_v15, %v14906_v35 }
 0x5b1   :  { %v7710_v6 = vadd.f32 %v14848_v17, %v16308_v59  ;;  %v16310_v17 = vrot.slane %v14890_v15, %v14896_v34 }
 0x5b4   :  { %v15018_v48 = vpop.f32.mrb[100].mxu1  ;;  %v15020_v26 = vpop.f32.mrb[104].mxu0 }
 0x5b5   :  { %16298 = vst [vmem:[#allocation75_spill] sm:$0xff] %v15018_v48  ;;  %16299 = vst [vmem:[#allocation76_spill] sm:$0xff] %v15020_v26  ;;  %v15032_v25 = vpop.f32.mrb[101].mxu1  ;;  %v15034_v39 = vpop.f32.mrb[105].mxu0  ;;  %v15062_v26 = vld [vmem:[#allocation3 + $0x40] sm:$0x7] }
 0x5b6   :  { %16301 = vst [vmem:[#allocation78_spill] sm:$0xff] %v15032_v25  ;;  %16302 = vst [vmem:[#allocation79_spill] sm:$0xff] %v15034_v39  ;;  %v8285_v48 = vpop.f32.mrb[102].mxu1  ;;  %v8326_v42 = vpop.f32.mrb[106].mxu0  ;;  %v7708_v25 = vadd.f32 %v14844_v3, %v16303_v23  ;;  %v16311_v23 = vrot.slane %v14890_v15, %v14908_v46 }
 0x5b7   :  { %v8286_v32 = vpop.f32.mrb[103].mxu1  ;;  %v8327_v48 = vpop.f32.mrb[107].mxu0  ;;  %16304 = vst [vmem:[#allocation80_spill] sm:$0xff] %v15062_v26  ;;  %v7667_v42 = vadd.f32 %v14838_v58, %v16307_v37  ;;  %v7669_v37 = vadd.f32 %v14842_v1, %v16310_v17  ;;  %v16313_v58 = vrot.slane %v14910_v41, %v14892_v63  ;;  %v16314_v1 = vrot.slane %v14910_v41, %v14894_v62 }
 0x5b8   :  { %v16306_v48 = vrot.slane %v14890_v15, %v14884_v5  ;;  %v16309_v32 = vrot.slane %v14890_v15, %v14894_v62  ;;  %v8988_v59 = vmax.f32 %v7708_v25, 0.0 }
 0x5b9   :  { %v7831_v28 = vadd.f32 %v14854_v9, %v16313_v58  ;;  %v7792_v25 = vadd.f32 %v14856_v18, %v16314_v1  ;;  %v16320_v1 = vrot.slane %v14910_v41, %v14902_v2  ;;  %v8987_v26 = vmax.f32 %v7669_v37, 0.0 }
 0x5ba   :  { %v7626_v39 = vadd.f32 %v14836_v38, %v16306_v48  ;;  %v7628_v3 = vadd.f32 %v14840_v22, %v16309_v32  ;;  %v7751_v22 = vadd.f32 %v14850_v47, %v16311_v23  ;;  %v16312_v32 = vrot.slane %v14910_v41, %v14884_v5 }
 0x5bb   :  { %v8990_v48 = vmax.f32 %v7749_v45, 0.0  ;;  %v8989_v45 = vmax.f32 %v7710_v6, 0.0  ;;  %v16322_v6 = vrot.slane %v14910_v41, %v14906_v35  ;;  %v8994_v40 = vmax.f32 %v7831_v28, 0.0 }
 0x5bc   :  { %v7790_v38 = vadd.f32 %v14852_v53, %v16312_v32  ;;  %v15118_v17 = vpop.f32.mrb[104].mxu1  ;;  %v15120_v15 = vpop.f32.mrb[108].mxu0  ;;  %v8984_v23 = vmax.f32 %v7626_v39, 0.0  ;;  %v8986_v53 = vmax.f32 %v7667_v42, 0.0  ;;  %v16317_v32 = vrot.slane %v14910_v41, %v14896_v34 }
 0x5bd   :  { %16315 = vst [vmem:[#allocation81_spill] sm:$0xff] %v15118_v17  ;;  %16316 = vst [vmem:[#allocation82_spill] sm:$0xff] %v15120_v15  ;;  %v15128_v58 = vpop.f32.mrb[105].mxu1  ;;  %v15130_v14 = vpop.f32.mrb[109].mxu0  ;;  %v8985_v18 = vmax.f32 %v7628_v3, 0.0  ;;  %v7872_v15 = vadd.f32 %v14860_v31, %v16320_v1  ;;  %v16321_v39 = vrot.slane %v14910_v41, %v14904_v24  ;;  %v15145_v3 = vadd.f32 %v8988_v59, %v12823_v30 }
 0x5be   :  { %v7833_v9 = vadd.f32 %v14858_v8, %v16317_v32  ;;  %16318 = vst [vmem:[#allocation83_spill] sm:$0xff] %v15128_v58  ;;  %16319 = vst [vmem:[#allocation84_spill] sm:$0xff] %v15130_v14  ;;  %v7874_v8 = vadd.f32 %v14864_v4, %v16322_v6  ;;  %v8367_v32 = vpop.f32.mrb[106].mxu1  ;;  %v8408_v47 = vpop.f32.mrb[110].mxu0  ;;  %v8991_v14 = vmax.f32 %v7751_v22, 0.0  ;;  %v8992_v58 = vmax.f32 %v7790_v38, 0.0 }
 0x5bf   :  { %v7913_v42 = vadd.f32 %v14862_v50, %v16321_v39  ;;  %v8368_v17 = vpop.f32.mrb[107].mxu1  ;;  %v8409_v31 = vpop.f32.mrb[111].mxu0  ;;  %v15148_v1 = vadd.f32 %v8990_v48, %v12843_v36  ;;  %v8993_v50 = vmax.f32 %v7792_v25, 0.0  ;;  %v16323_v39 = vrot.slane %v14910_v41, %v14908_v46 }
 0x5c0   :  { %v15155_v47 = vadd.f32 %v8984_v23, %v12699_v54  ;;  %v15158_v30 = vadd.f32 %v8986_v53, %v12719_v60  ;;  %v15161_v38 = vadd.f32 %v8989_v45, %v12813_v27  ;;  %v8995_v37 = vmax.f32 %v7833_v9, 0.0 }
 0x5c1   :  { %v7915_v4 = vadd.f32 %v14866_v43, %v16323_v39  ;;  %v15164_v36 = vadd.f32 %v8985_v18, %v12689_v51  ;;  %v8996_v28 = vmax.f32 %v7872_v15, 0.0  ;;  %v8998_v48 = vmax.f32 %v7913_v42, 0.0 }
 0x5c2   :  { %v8997_v59 = vmax.f32 %v7874_v8, 0.0  ;;  %v15167_v41 = vadd.f32 %v8987_v26, %v12709_v57  ;;  %v9118_v54 = vmax.f32 %v15155_v47, %v15145_v3  ;;  %v15172_v43 = vadd.f32 %v8991_v14, %v12833_v33 }
 0x5c3   :  { %v15175_v60 = vadd.f32 %v8992_v58, %v12947_v10  ;;  %v9120_v27 = vmax.f32 %v15158_v30, %v15148_v1  ;;  %v15180_v51 = vadd.f32 %v8994_v40, %v12967_v16  ;;  %v15183_v22 = vadd.f32 %v8993_v50, %v12937_v7 }
 0x5c4   :  { %v8999_v57 = vmax.f32 %v7915_v4, 0.0  ;;  %v15185_v26 = vpop.f32.mrb[108].mxu1  ;;  %v15187_v25 = vpop.f32.mrb[112].mxu0  ;;  %v9119_v33 = vmax.f32 %v15164_v36, %v15161_v38  ;;  %v15192_v10 = vadd.f32 %v8995_v37, %v12957_v13  ;;  %v16325_v14 = vrot.slane %v14928_v55, %v14884_v5 }
 0x5c5   :  { %v16326_v7 = vrot.slane %v14928_v55, %v14892_v63  ;;  %v15202_v17 = vpop.f32.mrb[109].mxu1  ;;  %v15204_v15 = vpop.f32.mrb[113].mxu0  ;;  %v15207_v23 = vadd.f32 %v8996_v28, %v13071_v56  ;;  %v15210_v13 = vadd.f32 %v8998_v48, %v13091_v0  ;;  %v15213_v53 = vadd.f32 %v8997_v59, %v13061_v52 }
 0x5c6   :  { %16324 = vst [vmem:[#allocation85_spill] sm:$0xff] %v15192_v10  ;;  %v7954_v16 = vadd.f32 %v14868_v19, %v16325_v14  ;;  %v16330_v19 = vrot.slane %v14928_v55, %v14894_v62  ;;  %v8449_v9 = vpop.f32.mrb[110].mxu1  ;;  %v9121_v58 = vmax.f32 %v15167_v41, %v15172_v43  ;;  %v9122_v18 = vmax.f32 %v9118_v54, %v15175_v60  ;;  %v16337_v14 = vld [vmem:[#allocation67_spill] sm:$0xff] }
 0x5c7   :  { %v7995_v40 = vadd.f32 %v14870_v11, %v16326_v7  ;;  %16327 = vst [vmem:[#allocation86_spill] sm:$0xff] %v15207_v23  ;;  %16328 = vst [vmem:[#allocation87_spill] sm:$0xff] %v15210_v13  ;;  %v8490_v11 = vpop.f32.mrb[114].mxu0  ;;  %v16331_v56 = vrot.slane %v14928_v55, %v14896_v34  ;;  %v16332_v52 = vrot.slane %v14928_v55, %v14902_v2  ;;  %v8450_v6 = vpop.f32.mrb[111].mxu1  ;;  %v16339_v7 = vld [vmem:[#allocation63_spill] sm:$0xff] }
 0x5c8   :  { %16329 = vst [vmem:[#allocation88_spill] sm:$0xff] %v15213_v53  ;;  %v7956_v45 = vadd.f32 %v14872_v29, %v16330_v19  ;;  %v8491_v8 = vpop.f32.mrb[115].mxu0  ;;  %v9124_v29 = vmax.f32 %v9120_v27, %v15180_v51  ;;  %v9123_v32 = vmax.f32 %v9119_v33, %v15183_v22  ;;  %v15233_v31 = vadd.f32 %v8999_v57, %v13081_v61  ;;  %v16341_v11 = vld [vmem:[#allocation64_spill] sm:$0xff] }
 0x5c9   :  { %v7997_v0 = vadd.f32 %v14874_v21, %v16331_v56  ;;  %v8036_v42 = vadd.f32 %v14876_v20, %v16332_v52  ;;  %v16334_v50 = vrot.slane %v14928_v55, %v14904_v24  ;;  %v9125_v21 = vmax.f32 %v9121_v58, %v15192_v10 }
 0x5ca   :  { %16333 = vst [vmem:[#allocation89_spill] sm:$0xff] %v15233_v31  ;;  %v9000_v4 = vmax.f32 %v7954_v16, 0.0  ;;  %v9002_v37 = vmax.f32 %v7995_v40, 0.0  ;;  %v16335_v20 = vrot.slane %v14928_v55, %v14906_v35  ;;  %v9126_v48 = vmax.f32 %v9122_v18, %v15207_v23  ;;  %v16343_v18 = vld [vmem:[#allocation65_spill] sm:$0xff] }
 0x5cb   :  { %v8077_v39 = vadd.f32 %v14878_v44, %v16334_v50  ;;  %v9128_v59 = vmax.f32 %v9124_v29, %v15210_v13  ;;  %v9127_v61 = vmax.f32 %v9123_v32, %v15213_v53  ;;  %v9001_v54 = vmax.f32 %v7956_v45, 0.0  ;;  %v16349_v32 = vld [vmem:[#allocation66_spill] sm:$0xff]  ;;  %v16362_v53 = vld [vmem:[#allocation19_spill] sm:$0xff] }
 0x5cc   :  { %v8038_v28 = vadd.f32 %v14880_v12, %v16335_v20  ;;  %v9003_v27 = vmax.f32 %v7997_v0, 0.0  ;;  %v9004_v57 = vmax.f32 %v8036_v42, 0.0  ;;  %v16336_v44 = vrot.slane %v14928_v55, %v14908_v46  ;;  %v15264_v56 = vpop.f32.mrb[112].mxu1  ;;  %v16344_v0 = vld [vmem:[#allocation13_spill] sm:$0xff]  ;;  %v16346_v42 = vld [vmem:[#allocation15_spill] sm:$0xff]  ;;  %v16350_v20 = vld [vmem:[#allocation12_spill] sm:$0xff] }
 0x5cd   :  { %v16338_v16 = vrot.slane %v16337_v14, %v14884_v5  ;;  %v9129_v12 = vmax.f32 %v9125_v21, %v15233_v31  ;;  %v9006_v19 = vmax.f32 %v8077_v39, 0.0  ;;  %v16340_v9 = vrot.slane %v16337_v14, %v14892_v63  ;;  %v15278_v39 = vpop.f32.mrb[113].mxu1 }
 0x5ce   :  { %v8079_v33 = vadd.f32 %v14882_v49, %v16336_v44  ;;  %v16342_v58 = vrot.slane %v16337_v14, %v14894_v62  ;;  %v15266_v49 = vpop.f32.mrb[116].mxu0  ;;  %v15269_v52 = vadd.f32 %v9000_v4, %v16344_v0  ;;  %v15272_v6 = vadd.f32 %v9002_v37, %v16346_v42  ;;  %v8531_v0 = vpop.f32.mrb[114].mxu1 }
 0x5cf   :  { %v8118_v40 = vadd.f32 %v16339_v7, %v16338_v16  ;;  %v8159_v45 = vadd.f32 %v16341_v11, %v16340_v9  ;;  %v9005_v8 = vmax.f32 %v8038_v28, 0.0  ;;  %v16348_v29 = vrot.slane %v16337_v14, %v14896_v34  ;;  %v15280_v21 = vpop.f32.mrb[117].mxu0  ;;  %v16353_v16 = vld [vmem:[#allocation68_spill] sm:$0xff]  ;;  %v16355_v28 = vld [vmem:[#allocation69_spill] sm:$0xff] }
 0x5d0   :  { %v8120_v55 = vadd.f32 %v16343_v18, %v16342_v58  ;;  %16345 = vst [vmem:[#allocation67_spill] sm:$0xff] %v15269_v52  ;;  %16347 = vst [vmem:[#allocation63_spill] sm:$0xff] %v15272_v6  ;;  %v15283_v44 = vadd.f32 %v9001_v54, %v16350_v20  ;;  %v16352_v4 = vrot.slane %v16337_v14, %v14902_v2  ;;  %v16357_v58 = vld [vmem:[#allocation70_spill] sm:$0xff]  ;;  %v8572_v42 = vpop.f32.mrb[118].mxu0  ;;  %v9007_v31 = vmax.f32 %v8079_v33, 0.0 }
 0x5d1   :  { %v8161_v50 = vadd.f32 %v16349_v32, %v16348_v29  ;;  %v16354_v37 = vrot.slane %v16337_v14, %v14904_v24  ;;  %v16356_v11 = vrot.slane %v16337_v14, %v14906_v35  ;;  %v16358_v29 = vld [vmem:[#allocation14_spill] sm:$0xff]  ;;  %v16360_v32 = vld [vmem:[#allocation17_spill] sm:$0xff]  ;;  %v8573_v13 = vpop.f32.mrb[119].mxu0  ;;  %v15304_v23 = vadd.f32 %v9006_v19, %v16362_v53 }
 0x5d2   :  { %16351 = vst [vmem:[#allocation64_spill] sm:$0xff] %v15283_v44  ;;  %v8200_v7 = vadd.f32 %v16353_v16, %v16352_v4  ;;  %v15298_v54 = vadd.f32 %v9003_v27, %v16358_v29  ;;  %v15301_v20 = vadd.f32 %v9004_v57, %v16360_v32  ;;  %v9008_v4 = vmax.f32 %v8118_v40, 0.0  ;;  %v8532_v16 = vpop.f32.mrb[115].mxu1  ;;  %v16366_v57 = vld [vmem:[#allocation16_spill] sm:$0xff] }
 0x5d3   :  { %v8241_v9 = vadd.f32 %v16355_v28, %v16354_v37  ;;  %v8202_v18 = vadd.f32 %v16357_v58, %v16356_v11  ;;  %16363 = vst [vmem:[#allocation15_spill] sm:$0xff] %v15304_v23  ;;  %v9010_v37 = vmax.f32 %v8159_v45, 0.0  ;;  %v9009_v28 = vmax.f32 %v8120_v55, 0.0  ;;  %v16365_v58 = vld [vmem:[#allocation71_spill] sm:$0xff]  ;;  %v16370_v16 = vld [vmem:[#allocation21_spill] sm:$0xff] }
 0x5d4   :  { %16359 = vst [vmem:[#allocation65_spill] sm:$0xff] %v15298_v54  ;;  %16361 = vst [vmem:[#allocation13_spill] sm:$0xff] %v15301_v20  ;;  %v16364_v11 = vrot.slane %v16337_v14, %v14908_v46  ;;  %v9130_v27 = vmax.f32 %v9126_v48, %v15269_v52  ;;  %v9132_v42 = vmax.f32 %v9128_v59, %v15272_v6  ;;  %v9011_v33 = vmax.f32 %v8161_v50, 0.0  ;;  %v16368_v14 = vld [vmem:[#allocation18_spill] sm:$0xff]  ;;  %v16374_v50 = vld [vmem:[#allocation20_spill] sm:$0xff] }
 0x5d5   :  { %v15313_v29 = vadd.f32 %v9005_v8, %v16366_v57  ;;  %v9131_v13 = vmax.f32 %v9127_v61, %v15283_v44  ;;  %v9012_v40 = vmax.f32 %v8200_v7, 0.0  ;;  %v9014_v53 = vmax.f32 %v8241_v9, 0.0  ;;  %v16372_v8 = vld [vmem:[#allocation23_spill] sm:$0xff]  ;;  %v15331_v9 = vpop.f32.mrb[116].mxu1 }
 0x5d6   :  { %v8243_v0 = vadd.f32 %v16365_v58, %v16364_v11  ;;  %v9013_v19 = vmax.f32 %v8202_v18, 0.0  ;;  %v9133_v45 = vmax.f32 %v9129_v12, %v15298_v54  ;;  %v9134_v55 = vmax.f32 %v9130_v27, %v15301_v20  ;;  %v15333_v12 = vpop.f32.mrb[120].mxu0  ;;  %v16416_v52 = vld [vmem:[#allocation35_spill] sm:$0xff] }
 0x5d7   :  { %16367 = vst [vmem:[#allocation66_spill] sm:$0xff] %v15313_v29  ;;  %v15319_v32 = vadd.f32 %v9007_v31, %v16368_v14  ;;  %v15322_v48 = vadd.f32 %v9008_v4, %v16370_v16  ;;  %v9136_v59 = vmax.f32 %v9132_v42, %v15304_v23  ;;  %v15326_v11 = vadd.f32 %v9010_v37, %v16372_v8  ;;  %v16376_v31 = vld [vmem:[#allocation22_spill] sm:$0xff]  ;;  %v16378_v4 = vld [vmem:[#allocation72_spill] sm:$0xff]  ;;  %v16380_v42 = vld [vmem:[#allocation75_spill] sm:$0xff]  ;;  %v15349_v16 = vpop.f32.mrb[121].mxu0 }
 0x5d8   :  { %v15329_v61 = vadd.f32 %v9009_v28, %v16374_v50  ;;  %v9015_v7 = vmax.f32 %v8243_v0, 0.0  ;;  %v9135_v18 = vmax.f32 %v9131_v13, %v15313_v29  ;;  %v15337_v58 = vadd.f32 %v9011_v33, %v16376_v31  ;;  %v16382_v28 = vld [vmem:[#allocation76_spill] sm:$0xff]  ;;  %v15347_v0 = vpop.f32.mrb[117].mxu1  ;;  %v16383_v8 = vld [vmem:[#allocation25_spill] sm:$0xff]  ;;  %v16385_v13 = vld [vmem:[#allocation27_spill] sm:$0xff] }
 0x5d9   :  { %16369 = vst [vmem:[#allocation12_spill] sm:$0xff] %v15319_v32  ;;  %16371 = vst [vmem:[#allocation68_spill] sm:$0xff] %v15322_v48  ;;  %v16379_v27 = vrot.slane %v16378_v4, %v14884_v5  ;;  %v16381_v37 = vrot.slane %v16378_v4, %v14892_v63  ;;  %v15352_v50 = vadd.f32 %v9012_v40, %v16383_v8  ;;  %v16387_v31 = vld [vmem:[#allocation24_spill] sm:$0xff]  ;;  %v8613_v20 = vpop.f32.mrb[118].mxu1  ;;  %v16392_v8 = vld [vmem:[#allocation79_spill] sm:$0xff] }
 0x5da   :  { %16373 = vst [vmem:[#allocation69_spill] sm:$0xff] %v15326_v11  ;;  %16375 = vst [vmem:[#allocation70_spill] sm:$0xff] %v15329_v61  ;;  %v15355_v33 = vadd.f32 %v9014_v53, %v16385_v13  ;;  %v15358_v23 = vadd.f32 %v9013_v19, %v16387_v31  ;;  %v9138_v54 = vmax.f32 %v9134_v55, %v15322_v48  ;;  %v16394_v13 = vld [vmem:[#allocation81_spill] sm:$0xff]  ;;  %v8614_v6 = vpop.f32.mrb[119].mxu1 }
 0x5db   :  { %16377 = vst [vmem:[#allocation14_spill] sm:$0xff] %v15337_v58  ;;  %v8282_v57 = vadd.f32 %v16380_v42, %v16379_v27  ;;  %v8323_v14 = vadd.f32 %v16382_v28, %v16381_v37  ;;  %16384 = vst [vmem:[#allocation17_spill] sm:$0xff] %v15352_v50  ;;  %v16389_v27 = vrot.slane %v16378_v4, %v14894_v62  ;;  %v16390_v42 = vld [vmem:[#allocation78_spill] sm:$0xff]  ;;  %v8654_v37 = vpop.f32.mrb[122].mxu0 }
 0x5dc   :  { %16386 = vst [vmem:[#allocation19_spill] sm:$0xff] %v15355_v33  ;;  %16388 = vst [vmem:[#allocation71_spill] sm:$0xff] %v15358_v23  ;;  %v9137_v28 = vmax.f32 %v9133_v45, %v15319_v32  ;;  %v16391_v40 = vrot.slane %v16378_v4, %v14896_v34  ;;  %v16393_v19 = vrot.slane %v16378_v4, %v14902_v2  ;;  %v8655_v44 = vpop.f32.mrb[123].mxu0  ;;  %v16398_v37 = vld [vmem:[#allocation82_spill] sm:$0xff] }
 0x5dd   :  { %v8284_v29 = vadd.f32 %v16390_v42, %v16389_v27  ;;  %v9140_v27 = vmax.f32 %v9136_v59, %v15326_v11  ;;  %v9139_v20 = vmax.f32 %v9135_v18, %v15329_v61  ;;  %v16395_v42 = vld [vmem:[#allocation26_spill] sm:$0xff]  ;;  %v16397_v55 = vrot.slane %v16378_v4, %v14904_v24  ;;  %v16400_v44 = vld [vmem:[#allocation83_spill] sm:$0xff] }
 0x5de   :  { %v8325_v53 = vadd.f32 %v16392_v8, %v16391_v40  ;;  %v8364_v31 = vadd.f32 %v16394_v13, %v16393_v19  ;;  %v15377_v45 = vadd.f32 %v9015_v7, %v16395_v42  ;;  %v9141_v40 = vmax.f32 %v9137_v28, %v15337_v58  ;;  %v16402_v28 = vld [vmem:[#allocation84_spill] sm:$0xff] }
 0x5df   :  { %v8405_v48 = vadd.f32 %v16398_v37, %v16397_v55  ;;  %v9016_v8 = vmax.f32 %v8282_v57, 0.0  ;;  %v9018_v32 = vmax.f32 %v8323_v14, 0.0  ;;  %v16399_v6 = vrot.slane %v16378_v4, %v14906_v35  ;;  %v16403_v14 = vld [vmem:[#allocation73_spill] sm:$0xff] }
 0x5e0   :  { %16396 = vst [vmem:[#allocation16_spill] sm:$0xff] %v15377_v45  ;;  %v9142_v59 = vmax.f32 %v9138_v54, %v15352_v50  ;;  %v9144_v18 = vmax.f32 %v9140_v27, %v15355_v33  ;;  %v9143_v7 = vmax.f32 %v9139_v20, %v15358_v23  ;;  %v9017_v13 = vmax.f32 %v8284_v29, 0.0  ;;  %v8732_v20 = vpop.f32.mrb[124].mxu0 }
 0x5e1   :  { %v8366_v19 = vadd.f32 %v16400_v44, %v16399_v6  ;;  %v9019_v42 = vmax.f32 %v8325_v53, 0.0  ;;  %v9020_v11 = vmax.f32 %v8364_v31, 0.0  ;;  %v16401_v55 = vrot.slane %v16378_v4, %v14908_v46  ;;  %v8691_v31 = vpop.f32.mrb[120].mxu1  ;;  %v16407_v44 = vld [vmem:[#allocation29_spill] sm:$0xff] }
 0x5e2   :  { %v16404_v37 = vrot.slane %v16403_v14, %v14884_v5  ;;  %v9145_v6 = vmax.f32 %v9141_v40, %v15377_v45  ;;  %v9022_v54 = vmax.f32 %v8405_v48, 0.0  ;;  %v16405_v27 = vrot.slane %v16403_v14, %v14892_v63  ;;  %v16410_v45 = vld [vmem:[#allocation28_spill] sm:$0xff] }
 0x5e3   :  { %v8407_v57 = vadd.f32 %v16402_v28, %v16401_v55  ;;  %v16406_v53 = vrot.slane %v16403_v14, %v14894_v62  ;;  %v15409_v55 = vadd.f32 %v9016_v8, %v16407_v44  ;;  %v16408_v28 = vld [vmem:[#allocation31_spill] sm:$0xff]  ;;  %v9021_v40 = vmax.f32 %v8366_v19, 0.0 }
 0x5e4   :  { %v8446_v58 = vadd.f32 %v15185_v26, %v16404_v37  ;;  %v8487_v29 = vadd.f32 %v15187_v25, %v16405_v27  ;;  %v15412_v26 = vadd.f32 %v9018_v32, %v16408_v28  ;;  %v16409_v48 = vrot.slane %v16403_v14, %v14896_v34  ;;  %v8693_v25 = vpop.f32.mrb[121].mxu1  ;;  %v15418_v27 = vpop.f32.mrb[125].mxu0 }
 0x5e5   :  { %v8448_v4 = vadd.f32 %v15202_v17, %v16406_v53  ;;  %v15421_v33 = vadd.f32 %v9017_v13, %v16410_v45  ;;  %v16411_v17 = vrot.slane %v16403_v14, %v14902_v2  ;;  %v16412_v32 = vrot.slane %v16403_v14, %v14904_v24  ;;  %v8695_v44 = vpop.f32.mrb[122].mxu1  ;;  %v8736_v28 = vpop.f32.mrb[126].mxu0  ;;  %v16415_v13 = vld [vmem:[#allocation33_spill] sm:$0xff] }
 0x5e6   :  { %v8489_v37 = vadd.f32 %v15204_v15, %v16409_v48  ;;  %v16413_v53 = vrot.slane %v16403_v14, %v14906_v35  ;;  %v16414_v48 = vld [vmem:[#allocation30_spill] sm:$0xff]  ;;  %v15439_v23 = vadd.f32 %v9020_v11, %v16415_v13  ;;  %v9023_v50 = vmax.f32 %v8407_v57, 0.0  ;;  %v8737_v61 = vpop.f32.mrb[127].mxu0  ;;  %v16419_v11 = vld [vmem:[#allocation32_spill] sm:$0xff] }
 0x5e7   :  { %v8528_v8 = vadd.f32 %v15264_v56, %v16411_v17  ;;  %v8569_v19 = vadd.f32 %v15266_v49, %v16412_v32  ;;  %v15436_v45 = vadd.f32 %v9019_v42, %v16414_v48  ;;  %v9024_v56 = vmax.f32 %v8446_v58, 0.0  ;;  %v8696_v17 = vpop.f32.mrb[123].mxu1 }
 0x5e8   :  { %v8530_v15 = vadd.f32 %v15278_v39, %v16413_v53  ;;  %v15442_v10 = vadd.f32 %v9022_v54, %v16416_v52  ;;  %v9026_v49 = vmax.f32 %v8487_v29, 0.0  ;;  %v9025_v32 = vmax.f32 %v8448_v4, 0.0  ;;  %v16424_v17 = vld [vmem:[#allocation38_spill] sm:$0xff] }
 0x5e9   :  { %v16418_v39 = vrot.slane %v16403_v14, %v14908_v46  ;;  %v9146_v42 = vmax.f32 %v9142_v59, %v15409_v55  ;;  %v9148_v44 = vmax.f32 %v9144_v18, %v15412_v26  ;;  %v15451_v28 = vadd.f32 %v9021_v40, %v16419_v11  ;;  %v16420_v14 = vld [vmem:[#allocation34_spill] sm:$0xff]  ;;  %v16422_v40 = vld [vmem:[#allocation39_spill] sm:$0xff] }
 0x5ea   :  { %16417 = vst [vmem:[#allocation18_spill] sm:$0xff] %v15442_v10  ;;  %v9027_v58 = vmax.f32 %v8489_v37, 0.0  ;;  %v9147_v61 = vmax.f32 %v9143_v7, %v15421_v33  ;;  %v9028_v57 = vmax.f32 %v8528_v8, 0.0  ;;  %v9030_v52 = vmax.f32 %v8569_v19, 0.0  ;;  %v16423_v37 = vld [vmem:[#allocation36_spill] sm:$0xff]  ;;  %v8773_v19 = vpop.f32.mrb[124].mxu1 }
 0x5eb   :  { %v8571_v53 = vadd.f32 %v15280_v21, %v16418_v39  ;;  %v9029_v54 = vmax.f32 %v8530_v15, 0.0  ;;  %v9149_v29 = vmax.f32 %v9145_v6, %v15436_v45  ;;  %v9150_v4 = vmax.f32 %v9146_v42, %v15439_v23  ;;  %v16421_v21 = vld [vmem:[#allocation37_spill] sm:$0xff]  ;;  %v8814_v15 = vpop.f32.mrb[128].mxu0 }
 0x5ec   :  { %v15457_v48 = vadd.f32 %v9023_v50, %v16420_v14  ;;  %v15460_v59 = vadd.f32 %v9024_v56, %v16421_v21  ;;  %v9152_v18 = vmax.f32 %v9148_v44, %v15442_v10  ;;  %v15464_v13 = vadd.f32 %v9026_v49, %v16422_v40  ;;  %v16426_v50 = vld [vmem:[#allocation74_spill] sm:$0xff]  ;;  %v8816_v11 = vpop.f32.mrb[129].mxu0  ;;  %v16431_v21 = vld [vmem:[#allocation43_spill] sm:$0xff] }
 0x5ed   :  { %v15467_v7 = vadd.f32 %v9025_v32, %v16423_v37  ;;  %v9031_v8 = vmax.f32 %v8571_v53, 0.0  ;;  %v9151_v6 = vmax.f32 %v9147_v61, %v15451_v28  ;;  %v15471_v39 = vadd.f32 %v9027_v58, %v16424_v17  ;;  %v8775_v32 = vpop.f32.mrb[125].mxu1  ;;  %v16429_v53 = vld [vmem:[#allocation41_spill] sm:$0xff]  ;;  %v16433_v58 = vld [vmem:[#allocation40_spill] sm:$0xff] }
 0x5ee   :  { %v16427_v56 = vrot.slane %v16426_v50, %v14884_v5  ;;  %v16428_v49 = vrot.slane %v16426_v50, %v14892_v63  ;;  %v15482_v14 = vadd.f32 %v9028_v57, %v16429_v53  ;;  %v15485_v61 = vadd.f32 %v9030_v52, %v16431_v21  ;;  %v8777_v17 = vpop.f32.mrb[126].mxu1 }
 0x5ef   :  { %16425 = vst [vmem:[#allocation21_spill] sm:$0xff] %v15471_v39  ;;  %v15488_v40 = vadd.f32 %v9029_v54, %v16433_v58  ;;  %v16435_v37 = vrot.slane %v16426_v50, %v14894_v62  ;;  %v16436_v57 = vrot.slane %v16426_v50, %v14896_v34  ;;  %v16437_v54 = vrot.slane %v16426_v50, %v14902_v2  ;;  %v8778_v21 = vpop.f32.mrb[127].mxu1 }
 0x5f0   :  { %v8610_v42 = vadd.f32 %v15331_v9, %v16427_v56  ;;  %v8651_v44 = vadd.f32 %v15333_v12, %v16428_v49  ;;  %16430 = vst [vmem:[#allocation23_spill] sm:$0xff] %v15482_v14  ;;  %16432 = vst [vmem:[#allocation20_spill] sm:$0xff] %v15485_v61  ;;  %v8818_v56 = vpop.f32.mrb[130].mxu0  ;;  %v9153_v12 = vmax.f32 %v9149_v29, %v15457_v48 }
 0x5f1   :  { %16434 = vst [vmem:[#allocation22_spill] sm:$0xff] %v15488_v40  ;;  %v8612_v9 = vadd.f32 %v15347_v0, %v16435_v37  ;;  %v9154_v49 = vmax.f32 %v9150_v4, %v15460_v59  ;;  %v8653_v52 = vadd.f32 %v15349_v16, %v16436_v57  ;;  %v8692_v53 = vadd.f32 %v8691_v31, %v16437_v54  ;;  %v8819_v58 = vpop.f32.mrb[131].mxu0  ;;  %v16438_v37 = vld [vmem:[#allocation42_spill] sm:$0xff] }
 0x5f2   :  { %v9156_v10 = vmax.f32 %v9152_v18, %v15464_v13  ;;  %v9155_v0 = vmax.f32 %v9151_v6, %v15467_v7  ;;  %v15506_v17 = vadd.f32 %v9031_v8, %v16438_v37  ;;  %v16440_v29 = vrot.slane %v16426_v50, %v14904_v24 }
 0x5f3   :  { %v9157_v56 = vmax.f32 %v9153_v12, %v15471_v39  ;;  %v9032_v16 = vmax.f32 %v8610_v42, 0.0  ;;  %v9034_v57 = vmax.f32 %v8651_v44, 0.0  ;;  %v16441_v31 = vrot.slane %v16426_v50, %v14906_v35  ;;  %v16443_v42 = vld [vmem:[#allocation77_spill] sm:$0xff] }
 0x5f4   :  { %16439 = vst [vmem:[#allocation72_spill] sm:$0xff] %v15506_v17  ;;  %v8733_v4 = vadd.f32 %v8732_v20, %v16440_v29  ;;  %v9158_v21 = vmax.f32 %v9154_v49, %v15482_v14  ;;  %v9160_v18 = vmax.f32 %v9156_v10, %v15485_v61  ;;  %v9159_v6 = vmax.f32 %v9155_v0, %v15488_v40  ;;  %v8896_v0 = vpop.f32.mrb[132].mxu0  ;;  %v16455_v40 = vld [vmem:[#allocation49_spill] sm:$0xff] }
 0x5f5   :  { %v8694_v54 = vadd.f32 %v8693_v25, %v16441_v31  ;;  %v9033_v8 = vmax.f32 %v8612_v9, 0.0  ;;  %v9035_v58 = vmax.f32 %v8653_v52, 0.0  ;;  %v9036_v37 = vmax.f32 %v8692_v53, 0.0  ;;  %v8855_v53 = vpop.f32.mrb[128].mxu1 }
 0x5f6   :  { %v16442_v20 = vrot.slane %v16426_v50, %v14908_v46  ;;  %v16444_v44 = vrot.slane %v16443_v42, %v14884_v5  ;;  %v9161_v25 = vmax.f32 %v9157_v56, %v15506_v17  ;;  %v9038_v31 = vmax.f32 %v8733_v4, 0.0  ;;  %v16447_v50 = vld [vmem:[#allocation45_spill] sm:$0xff]  ;;  %v8898_v17 = vpop.f32.mrb[133].mxu0 }
 0x5f7   :  { %v16445_v10 = vrot.slane %v16443_v42, %v14892_v63  ;;  %v16446_v9 = vrot.slane %v16443_v42, %v14894_v62  ;;  %v15533_v61 = vadd.f32 %v9032_v16, %v16447_v50  ;;  %v16449_v4 = vrot.slane %v16443_v42, %v14902_v2  ;;  %v8900_v2 = vpop.f32.mrb[134].mxu0 }
 0x5f8   :  { %v8735_v12 = vadd.f32 %v15418_v27, %v16442_v20  ;;  %v8774_v29 = vadd.f32 %v8773_v19, %v16444_v44  ;;  %v16448_v27 = vld [vmem:[#allocation47_spill] sm:$0xff]  ;;  %v9037_v19 = vmax.f32 %v8694_v54, 0.0  ;;  %v8857_v44 = vpop.f32.mrb[129].mxu1  ;;  %v16452_v16 = vrot.slane %v16443_v42, %v14904_v24  ;;  %v16459_v2 = vld [vmem:[#allocation50_spill] sm:$0xff] }
 0x5f9   :  { %v8815_v49 = vadd.f32 %v8814_v15, %v16445_v10  ;;  %v8776_v52 = vadd.f32 %v8775_v32, %v16446_v9  ;;  %v15536_v20 = vadd.f32 %v9034_v57, %v16448_v27  ;;  %v8856_v56 = vadd.f32 %v8855_v53, %v16449_v4  ;;  %v16450_v15 = vld [vmem:[#allocation44_spill] sm:$0xff]  ;;  %v8859_v27 = vpop.f32.mrb[130].mxu1  ;;  %v16454_v53 = vld [vmem:[#allocation46_spill] sm:$0xff] }
 0x5fa   :  { %v15542_v10 = vadd.f32 %v9033_v8, %v16450_v15  ;;  %v16451_v32 = vrot.slane %v16443_v42, %v14896_v34  ;;  %v8897_v50 = vadd.f32 %v8896_v0, %v16452_v16  ;;  %v16453_v57 = vrot.slane %v16443_v42, %v14906_v35  ;;  %v8860_v34 = vpop.f32.mrb[131].mxu1 }
 0x5fb   :  { %v15554_v4 = vadd.f32 %v9035_v58, %v16454_v53  ;;  %v15557_v8 = vadd.f32 %v9036_v37, %v16455_v40  ;;  %v9039_v15 = vmax.f32 %v8735_v12, 0.0  ;;  %v9040_v14 = vmax.f32 %v8774_v29, 0.0  ;;  %v16463_v53 = vld [vmem:[#allocation57_spill] sm:$0xff] }
 0x5fc   :  { %v8817_v9 = vadd.f32 %v8816_v11, %v16451_v32  ;;  %v8858_v54 = vadd.f32 %v8857_v44, %v16453_v57  ;;  %v8901_v11 = vpop.f32.mrb[135].mxu0  ;;  %v16456_v32 = vld [vmem:[#allocation51_spill] sm:$0xff]  ;;  %v9042_v24 = vmax.f32 %v8815_v49, 0.0  ;;  %v9041_v0 = vmax.f32 %v8776_v52, 0.0  ;;  %v16458_v57 = vld [vmem:[#allocation48_spill] sm:$0xff] }
 0x5fd   :  { %v15560_v39 = vadd.f32 %v9038_v31, %v16456_v32  ;;  %v16457_v35 = vrot.slane %v16443_v42, %v14908_v46  ;;  %v9162_v16 = vmax.f32 %v9158_v21, %v15533_v61  ;;  %v9164_v58 = vmax.f32 %v9160_v18, %v15536_v20  ;;  %v16461_v42 = vld [vmem:[#allocation55_spill] sm:$0xff] }
 0x5fe   :  { %v15568_v40 = vadd.f32 %v9037_v19, %v16458_v57  ;;  %v9044_v37 = vmax.f32 %v8856_v56, 0.0  ;;  %v9163_v12 = vmax.f32 %v9159_v6, %v15542_v10  ;;  %v9043_v29 = vmax.f32 %v8817_v9, 0.0  ;;  %v16462_v56 = vld [vmem:[#allocation52_spill] sm:$0xff] }
 0x5ff   :  { %v8899_v44 = vadd.f32 %v8898_v17, %v16457_v35  ;;  %v9046_v27 = vmax.f32 %v8897_v50, 0.0  ;;  %v9045_v31 = vmax.f32 %v8858_v54, 0.0  ;;  %v9165_v49 = vmax.f32 %v9161_v25, %v15554_v4  ;;  %v16460_v17 = vld [vmem:[#allocation53_spill] sm:$0xff]  ;;  %v8937_v50 = vpop.f32.mrb[132].mxu1  ;;  %v8978_v54 = vpop.f32.mrb[136].mxu0 }
 0x600   :  { %v9166_v52 = vmax.f32 %v9162_v16, %v15557_v8  ;;  %v15574_v46 = vadd.f32 %v9039_v15, %v16459_v2  ;;  %v15577_v21 = vadd.f32 %v9040_v14, %v16460_v17  ;;  %v9168_v18 = vmax.f32 %v9164_v58, %v15560_v39  ;;  %v16464_v15 = vld [vmem:[#allocation80_spill] sm:$0xff]  ;;  %v8939_v35 = vpop.f32.mrb[133].mxu1  ;;  %v11007_v16 = vpop.f32.mrb[137].mxu0 }
 0x601   :  { %v15581_v19 = vadd.f32 %v9042_v24, %v16461_v42  ;;  %v15584_v6 = vadd.f32 %v9041_v0, %v16462_v56  ;;  %v9047_v9 = vmax.f32 %v8899_v44, 0.0  ;;  %v9167_v25 = vmax.f32 %v9163_v12, %v15568_v40  ;;  %v16467_v0 = vld [vmem:[#allocation54_spill] sm:$0xff]  ;;  %v16468_v44 = vld [vmem:[#allocation59_spill] sm:$0xff]  ;;  %v16469_v12 = vld [vmem:[#allocation56_spill] sm:$0xff]  ;;  %v8941_v17 = vpop.f32.mrb[134].mxu1  ;;  %v8981_v42 = vpop.f32.mrb[138].mxu0 }
 0x602   :  { %v15588_v34 = vadd.f32 %v9044_v37, %v16463_v53  ;;  %v16465_v14 = vrot.slane %v16464_v15, %v14884_v5  ;;  %v16466_v32 = vrot.slane %v16464_v15, %v14892_v63  ;;  %v15597_v58 = vadd.f32 %v9043_v29, %v16467_v0  ;;  %v8942_v29 = vpop.f32.mrb[135].mxu1  ;;  %v11008_v53 = vpop.f32.mrb[139].mxu0 }
 0x603   :  { %v15600_v57 = vadd.f32 %v9046_v27, %v16468_v44  ;;  %v15603_v2 = vadd.f32 %v9045_v31, %v16469_v12  ;;  %v16470_v37 = vrot.slane %v16464_v15, %v14894_v62  ;;  %v9169_v63 = vmax.f32 %v9165_v49, %v15574_v46  ;;  %v16471_v31 = vld [vmem:[#allocation58_spill] sm:$0xff]  ;;  %v16472_v15 = vld [vmem:[#allocation61_spill] sm:$0xff] }
 0x604   :  { %v8938_v11 = vadd.f32 %v8937_v50, %v16465_v14  ;;  %v8979_v24 = vadd.f32 %v8978_v54, %v16466_v32  ;;  %v9170_v56 = vmax.f32 %v9166_v52, %v15577_v21  ;;  %v9172_v27 = vmax.f32 %v9168_v18, %v15581_v19  ;;  %v16473_v49 = vld [vmem:[#allocation62_spill] sm:$0xff] }
 0x605   :  { %v8940_v5 = vadd.f32 %v8939_v35, %v16470_v37  ;;  %v9171_v14 = vmax.f32 %v9167_v25, %v15584_v6  ;;  %v15613_v32 = vadd.f32 %v9047_v9, %v16471_v31  ;;  %v9173_v52 = vmax.f32 %v9169_v63, %v15597_v58 }
 0x606   :  { %v9048_v50 = vmax.f32 %v8938_v11, 0.0  ;;  %v9050_v54 = vmax.f32 %v8979_v24, 0.0  ;;  %v9174_v62 = vmax.f32 %v9170_v56, %v15588_v34  ;;  %v9176_v11 = vmax.f32 %v9172_v27, %v15600_v57  ;;  %v16474_v24 = vld [vmem:[#allocation60_spill] sm:$0xff] }
 0x607   :  { %v9049_v16 = vmax.f32 %v8940_v5, 0.0  ;;  %v9175_v18 = vmax.f32 %v9171_v14, %v15603_v2  ;;  %v9177_v12 = vmax.f32 %v9173_v52, %v15613_v32 }
 0x608   :  { %v15617_v35 = vadd.f32 %v9048_v50, %v16472_v15  ;;  %v15620_v0 = vadd.f32 %v9050_v54, %v16473_v49 }
 0x609   :  { %v15626_v25 = vadd.f32 %v9049_v16, %v16474_v24 }
 0x60a   :  { %v9178_v9 = vmax.f32 %v9174_v62, %v15617_v35  ;;  %v9180_v44 = vsel %vm5638_vm2, %v15620_v0, -inf }
 0x60b   :  { %v9179_v37 = vmax.f32 %v9175_v18, %v15626_v25  ;;  %v9181_v5 = vmax.f32 %v9176_v11, %v9180_v44 }
 0x60d   :  { %v9182_v17 = vmax.f32 %v9178_v9, %v9179_v37  ;;  %v9183_v42 = vmax.f32 %v9181_v5, %v9177_v12  ;;  %v16475_v9 = vld [vmem:[#allocation85_spill] sm:$0xff]  ;;  %v16476_v5 = vld [vmem:[#allocation86_spill] sm:$0xff] }
 0x60f   :  { %v9184_v63 = vmax.f32 %v9182_v17, %v9183_v42 }
 0x611   :  { %9185 = vmax.xlane.f32.xlu0 %v9184_v63 }
 0x69e   :  { %v15633_v56 = vpop.xlane.xlu0 %9185 }
 0x69f   :  { %v9187_v50 = vsub.f32 %v15155_v47, %v15633_v56  ;;  %v9188_v54 = vsub.f32 %v15164_v36, %v15633_v56  ;;  %v9189_v53 = vsub.f32 %v15158_v30, %v15633_v56  ;;  %v9190_v14 = vsub.f32 %v15167_v41, %v15633_v56 }
 0x6a0   :  { %v9191_v31 = vsub.f32 %v15145_v3, %v15633_v56  ;;  %v9192_v47 = vsub.f32 %v15161_v38, %v15633_v56  ;;  %v9193_v36 = vsub.f32 %v15148_v1, %v15633_v56  ;;  %v9194_v30 = vsub.f32 %v15172_v43, %v15633_v56 }
 0x6a1   :  { %v9254_v29 = vmul.f32 1.442695, %v9187_v50  ;;  %v9256_v27 = vmul.f32 1.442695, %v9188_v54  ;;  %v9258_v16 = vmul.f32 1.442695, %v9189_v53  ;;  %v9195_v49 = vsub.f32 %v15175_v60, %v15633_v56 }
 0x6a2   :  { %v9260_v62 = vmul.f32 1.442695, %v9190_v14  ;;  %v9262_v15 = vmul.f32 1.442695, %v9191_v31  ;;  %v9264_v41 = vmul.f32 1.442695, %v9192_v47  ;;  %v9196_v38 = vsub.f32 %v15183_v22, %v15633_v56 }
 0x6a3   :  { %11556 = vpow2.f32 %v9254_v29  ;;  %v9266_v3 = vmul.f32 1.442695, %v9193_v36  ;;  %v9268_v1 = vmul.f32 1.442695, %v9194_v30  ;;  %v9197_v18 = vsub.f32 %v15180_v51, %v15633_v56  ;;  %v16477_v50 = vld [vmem:[#allocation88_spill] sm:$0xff]  ;;  %v16478_v14 = vld [vmem:[#allocation87_spill] sm:$0xff] }
 0x6a4   :  { %11558 = vpow2.f32 %v9256_v27  ;;  %v9270_v43 = vmul.f32 1.442695, %v9195_v49  ;;  %v9198_v44 = vsub.f32 %v16475_v9, %v15633_v56  ;;  %v9272_v12 = vmul.f32 1.442695, %v9196_v38  ;;  %v16479_v36 = vld [vmem:[#allocation89_spill] sm:$0xff] }
 0x6a5   :  { %11560 = vpow2.f32 %v9258_v16  ;;  %v9199_v17 = vsub.f32 %v16476_v5, %v15633_v56  ;;  %v9274_v51 = vmul.f32 1.442695, %v9197_v18  ;;  %v9200_v54 = vsub.f32 %v16477_v50, %v15633_v56  ;;  %v16482_v5 = vld [vmem:[#allocation63_spill] sm:$0xff] }
 0x6a6   :  { %11562 = vpow2.f32 %v9260_v62  ;;  %v9276_v29 = vmul.f32 1.442695, %v9198_v44  ;;  %v9201_v31 = vsub.f32 %v16478_v14, %v15633_v56 }
 0x6a7   :  { %11564 = vpow2.f32 %v9262_v15  ;;  %v9278_v16 = vmul.f32 1.442695, %v9199_v17  ;;  %v9202_v15 = vsub.f32 %v16479_v36, %v15633_v56  ;;  %v9280_v30 = vmul.f32 1.442695, %v9200_v54  ;;  %v16483_v54 = vld [vmem:[#allocation65_spill] sm:$0xff] }
 0x6a8   :  { %11566 = vpow2.f32 %v9264_v41  ;;  %v9205_v17 = vsub.f32 %v16482_v5, %v15633_v56 }
 0x6a9   :  { %11568 = vpow2.f32 %v9266_v3  ;;  %v16480_v3 = vld [vmem:[#allocation67_spill] sm:$0xff]  ;;  %v9284_v44 = vmul.f32 1.442695, %v9202_v15 }
 0x6aa   :  { %11570 = vpow2.f32 %v9268_v1  ;;  %v9203_v38 = vsub.f32 %v16480_v3, %v15633_v56  ;;  %v9282_v1 = vmul.f32 1.442695, %v9201_v31  ;;  %v9290_v36 = vmul.f32 1.442695, %v9205_v17  ;;  %v16487_v17 = vld [vmem:[#allocation12_spill] sm:$0xff] }
 0x6ab   :  { %11572 = vpow2.f32 %v9270_v43 }
 0x6ac   :  { %11574 = vpow2.f32 %v9272_v12 }
 0x6ad   :  { %v15653_v52 = vpop.eup %11556  ;;  %11576 = vpow2.f32 %v9274_v51  ;;  %v9286_v51 = vmul.f32 1.442695, %v9203_v38 }
 0x6ae   :  { %v15655_v11 = vpop.eup %11558  ;;  %11578 = vpow2.f32 %v9276_v29  ;;  %v9206_v29 = vsub.f32 %v16483_v54, %v15633_v56 }
 0x6af   :  { %v9388_v24 = vadd.f32 %v15655_v11, %v15653_v52  ;;  %v15663_v60 = vpop.eup %11560  ;;  %11580 = vpow2.f32 %v9278_v16  ;;  %v16484_v16 = vld [vmem:[#allocation13_spill] sm:$0xff] }
 0x6b0   :  { %v15668_v22 = vpop.eup %11562  ;;  %11582 = vpow2.f32 %v9280_v30  ;;  %v9292_v38 = vmul.f32 1.442695, %v9206_v29 }
 0x6b1   :  { %v9389_v37 = vadd.f32 %v15663_v60, %v9388_v24  ;;  %v15673_v63 = vpop.eup %11564  ;;  %v16481_v24 = vld [vmem:[#allocation64_spill] sm:$0xff]  ;;  %11584 = vpow2.f32 %v9282_v1 }
 0x6b2   :  { %v15678_v27 = vpop.eup %11566  ;;  %v9204_v9 = vsub.f32 %v16481_v24, %v15633_v56  ;;  %11586 = vpow2.f32 %v9284_v44  ;;  %v16486_v24 = vld [vmem:[#allocation15_spill] sm:$0xff] }
 0x6b3   :  { %v9390_v42 = vadd.f32 %v15668_v22, %v9389_v37  ;;  %v15683_v62 = vpop.eup %11568  ;;  %11588 = vpow2.f32 %v9286_v51  ;;  %v9210_v51 = vsub.f32 %v16487_v17, %v15633_v56 }
 0x6b4   :  { %v15688_v49 = vpop.eup %11570 }
 0x6b5   :  { %v9391_v53 = vadd.f32 %v15673_v63, %v9390_v42  ;;  %v15693_v43 = vpop.eup %11572 }
 0x6b6   :  { %v15698_v37 = vpop.eup %11574 }
 0x6b7   :  { %v9392_v47 = vadd.f32 %v15678_v27, %v9391_v53  ;;  %v15703_v50 = vpop.eup %11576  ;;  %v9288_v53 = vmul.f32 1.442695, %v9204_v9  ;;  %v9209_v9 = vsub.f32 %v16486_v24, %v15633_v56  ;;  %v16492_v24 = vld [vmem:[#allocation69_spill] sm:$0xff] }
 0x6b8   :  { %v15708_v31 = vpop.eup %11578 }
 0x6b9   :  { %v9393_v41 = vadd.f32 %v15683_v62, %v9392_v47  ;;  %v9207_v47 = vsub.f32 %v16484_v16, %v15633_v56  ;;  %v15713_v30 = vpop.eup %11580  ;;  %11590 = vpow2.f32 %v9288_v53  ;;  %v16488_v53 = vld [vmem:[#allocation68_spill] sm:$0xff]  ;;  %v9298_v16 = vmul.f32 1.442695, %v9209_v9 }
 0x6ba   :  { %11592 = vpow2.f32 %v9290_v36 }
 0x6bb   :  { %v9394_v18 = vadd.f32 %v15688_v49, %v9393_v41  ;;  %v16485_v41 = vld [vmem:[#allocation66_spill] sm:$0xff]  ;;  %v9294_v44 = vmul.f32 1.442695, %v9207_v47  ;;  %11594 = vpow2.f32 %v9292_v38 }
 0x6bc   :  { %v9208_v3 = vsub.f32 %v16485_v41, %v15633_v56 }
 0x6bd   :  { %v9395_v12 = vadd.f32 %v15693_v43, %v9394_v18  ;;  %v15718_v18 = vpop.eup %11582  ;;  %11596 = vpow2.f32 %v9294_v44 }
 0x6be   :  { %v15723_v5 = vpop.eup %11584 }
 0x6bf   :  { %v9396_v42 = vadd.f32 %v15698_v37, %v9395_v12  ;;  %v15728_v29 = vpop.eup %11586 }
 0x6c0   :  { %v15733_v36 = vpop.eup %11588 }
 0x6c1   :  { %v9397_v14 = vadd.f32 %v15703_v50, %v9396_v42  ;;  %v9296_v42 = vmul.f32 1.442695, %v9208_v3  ;;  %16489 = vst [vmem:[#allocation75_spill] sm:$0xff] %v15733_v36 }
 0x6c3   :  { %v9398_v15 = vadd.f32 %v15708_v31, %v9397_v14  ;;  %v9211_v14 = vsub.f32 %v16488_v53, %v15633_v56  ;;  %11598 = vpow2.f32 %v9296_v42  ;;  %v15738_v38 = vpop.eup %11590 }
 0x6c4   :  { %16491 = vst [vmem:[#allocation76_spill] sm:$0xff] %v15738_v38  ;;  %11600 = vpow2.f32 %v9298_v16  ;;  %v15743_v44 = vpop.eup %11592 }
 0x6c5   :  { %v9399_v1 = vadd.f32 %v15713_v30, %v9398_v15  ;;  %v16490_v15 = vld [vmem:[#allocation70_spill] sm:$0xff]  ;;  %v9302_v17 = vmul.f32 1.442695, %v9211_v14  ;;  %16493 = vst [vmem:[#allocation25_spill] sm:$0xff] %v15743_v44  ;;  %v15748_v42 = vpop.eup %11594 }
 0x6c6   :  { %v9212_v41 = vsub.f32 %v16490_v15, %v15633_v56  ;;  %16495 = vst [vmem:[#allocation27_spill] sm:$0xff] %v15748_v42 }
 0x6c7   :  { %v9400_v12 = vadd.f32 %v15718_v18, %v9399_v1  ;;  %v9300_v1 = vmul.f32 1.442695, %v9210_v51  ;;  %v15753_v16 = vpop.eup %11596 }
 0x6c8   :  { %v9304_v15 = vmul.f32 1.442695, %v9212_v41 }
 0x6c9   :  { %v9401_v54 = vadd.f32 %v15723_v5, %v9400_v12  ;;  %v9213_v12 = vsub.f32 %v16492_v24, %v15633_v56  ;;  %11602 = vpow2.f32 %v9300_v1 }
 0x6ca   :  { %11604 = vpow2.f32 %v9302_v17 }
 0x6cb   :  { %v9402_v47 = vadd.f32 %v15728_v29, %v9401_v54  ;;  %v16494_v54 = vld [vmem:[#allocation14_spill] sm:$0xff]  ;;  %v9306_v24 = vmul.f32 1.442695, %v9213_v12  ;;  %11606 = vpow2.f32 %v9304_v15 }
 0x6cc   :  { %v9214_v53 = vsub.f32 %v16494_v54, %v15633_v56 }
 0x6cd   :  { %v9403_v3 = vadd.f32 %v15733_v36, %v9402_v47  ;;  %v16496_v47 = vld [vmem:[#allocation17_spill] sm:$0xff]  ;;  %v15758_v1 = vpop.eup %11598  ;;  %11608 = vpow2.f32 %v9306_v24 }
 0x6ce   :  { %v9215_v36 = vsub.f32 %v16496_v47, %v15633_v56  ;;  %v9308_v54 = vmul.f32 1.442695, %v9214_v53  ;;  %v15763_v17 = vpop.eup %11600 }
 0x6cf   :  { %v9404_v9 = vadd.f32 %v15738_v38, %v9403_v3  ;;  %v16497_v3 = vld [vmem:[#allocation71_spill] sm:$0xff] }
 0x6d0   :  { %v9216_v38 = vsub.f32 %v16497_v3, %v15633_v56  ;;  %v9310_v47 = vmul.f32 1.442695, %v9215_v36  ;;  %11610 = vpow2.f32 %v9308_v54 }
 0x6d1   :  { %v9405_v51 = vadd.f32 %v15743_v44, %v9404_v9  ;;  %v16498_v9 = vld [vmem:[#allocation19_spill] sm:$0xff] }
 0x6d2   :  { %v9217_v44 = vsub.f32 %v16498_v9, %v15633_v56  ;;  %v9312_v3 = vmul.f32 1.442695, %v9216_v38  ;;  %11612 = vpow2.f32 %v9310_v47 }
 0x6d3   :  { %v9406_v14 = vadd.f32 %v15748_v42, %v9405_v51  ;;  %v16499_v51 = vld [vmem:[#allocation16_spill] sm:$0xff]  ;;  %v15768_v15 = vpop.eup %11602 }
 0x6d4   :  { %v9218_v42 = vsub.f32 %v16499_v51, %v15633_v56  ;;  %v9314_v9 = vmul.f32 1.442695, %v9217_v44  ;;  %v15773_v24 = vpop.eup %11604  ;;  %11614 = vpow2.f32 %v9312_v3 }
 0x6d5   :  { %v9407_v41 = vadd.f32 %v15753_v16, %v9406_v14  ;;  %v9219_v14 = vsub.f32 %v15409_v55, %v15633_v56  ;;  %v15778_v54 = vpop.eup %11606 }
 0x6d6   :  { %v9316_v51 = vmul.f32 1.442695, %v9218_v42  ;;  %11616 = vpow2.f32 %v9314_v9 }
 0x6d7   :  { %v9408_v12 = vadd.f32 %v15758_v1, %v9407_v41  ;;  %v9220_v41 = vsub.f32 %v15421_v33, %v15633_v56  ;;  %v9318_v55 = vmul.f32 1.442695, %v9219_v14  ;;  %v15783_v47 = vpop.eup %11608 }
 0x6d8   :  { %16500 = vst [vmem:[#allocation24_spill] sm:$0xff] %v15783_v47  ;;  %11618 = vpow2.f32 %v9316_v51 }
 0x6d9   :  { %v9409_v53 = vadd.f32 %v15763_v17, %v9408_v12  ;;  %v9221_v12 = vsub.f32 %v15412_v26, %v15633_v56  ;;  %v9320_v33 = vmul.f32 1.442695, %v9220_v41  ;;  %11620 = vpow2.f32 %v9318_v55 }
 0x6da   :  { %v15788_v3 = vpop.eup %11610 }
 0x6db   :  { %v9410_v36 = vadd.f32 %v15768_v15, %v9409_v53  ;;  %v9222_v53 = vsub.f32 %v15436_v45, %v15633_v56  ;;  %v9322_v26 = vmul.f32 1.442695, %v9221_v12  ;;  %11622 = vpow2.f32 %v9320_v33 }
 0x6dc   :  { %v15793_v9 = vpop.eup %11612 }
 0x6dd   :  { %v9411_v38 = vadd.f32 %v15773_v24, %v9410_v36  ;;  %v9223_v36 = vsub.f32 %v15439_v23, %v15633_v56  ;;  %v9324_v45 = vmul.f32 1.442695, %v9222_v53  ;;  %11624 = vpow2.f32 %v9322_v26 }
 0x6de   :  { %v15798_v51 = vpop.eup %11614 }
 0x6df   :  { %v9412_v44 = vadd.f32 %v15778_v54, %v9411_v38  ;;  %v9224_v38 = vsub.f32 %v15451_v28, %v15633_v56  ;;  %v9326_v23 = vmul.f32 1.442695, %v9223_v36  ;;  %11626 = vpow2.f32 %v9324_v45 }
 0x6e0   :  { %v15803_v55 = vpop.eup %11616 }
 0x6e1   :  { %v9413_v42 = vadd.f32 %v15783_v47, %v9412_v44  ;;  %v16501_v44 = vld [vmem:[#allocation18_spill] sm:$0xff]  ;;  %v9328_v28 = vmul.f32 1.442695, %v9224_v38  ;;  %11628 = vpow2.f32 %v9326_v23 }
 0x6e2   :  { %v9225_v47 = vsub.f32 %v16501_v44, %v15633_v56  ;;  %v15808_v33 = vpop.eup %11618 }
 0x6e3   :  { %v9414_v14 = vadd.f32 %v15788_v3, %v9413_v42  ;;  %v9226_v42 = vsub.f32 %v15457_v48, %v15633_v56  ;;  %16502 = vst [vmem:[#allocation78_spill] sm:$0xff] %v15808_v33  ;;  %v15813_v26 = vpop.eup %11620  ;;  %11630 = vpow2.f32 %v9328_v28 }
 0x6e4   :  { %v9330_v44 = vmul.f32 1.442695, %v9225_v47  ;;  %16503 = vst [vmem:[#allocation79_spill] sm:$0xff] %v15813_v26 }
 0x6e5   :  { %v9415_v41 = vadd.f32 %v15793_v9, %v9414_v14  ;;  %v9227_v14 = vsub.f32 %v15460_v59, %v15633_v56  ;;  %v9332_v48 = vmul.f32 1.442695, %v9226_v42  ;;  %v15818_v45 = vpop.eup %11622 }
 0x6e6   :  { %16504 = vst [vmem:[#allocation81_spill] sm:$0xff] %v15818_v45  ;;  %11632 = vpow2.f32 %v9330_v44 }
 0x6e7   :  { %v9416_v12 = vadd.f32 %v15798_v51, %v9415_v41  ;;  %v9228_v41 = vsub.f32 %v15467_v7, %v15633_v56  ;;  %v9334_v59 = vmul.f32 1.442695, %v9227_v14  ;;  %v15823_v23 = vpop.eup %11624  ;;  %11634 = vpow2.f32 %v9332_v48 }
 0x6e8   :  { %16505 = vst [vmem:[#allocation26_spill] sm:$0xff] %v15823_v23 }
 0x6e9   :  { %v9417_v53 = vadd.f32 %v15803_v55, %v9416_v12  ;;  %v9229_v12 = vsub.f32 %v15464_v13, %v15633_v56  ;;  %v9336_v7 = vmul.f32 1.442695, %v9228_v41  ;;  %v15828_v28 = vpop.eup %11626  ;;  %11636 = vpow2.f32 %v9334_v59 }
 0x6ea   :  { %16507 = vst [vmem:[#allocation82_spill] sm:$0xff] %v15828_v28 }
 0x6eb   :  { %v9418_v36 = vadd.f32 %v15808_v33, %v9417_v53  ;;  %v16506_v53 = vld [vmem:[#allocation21_spill] sm:$0xff]  ;;  %v9338_v13 = vmul.f32 1.442695, %v9229_v12  ;;  %v15833_v44 = vpop.eup %11628  ;;  %11638 = vpow2.f32 %v9336_v7 }
 0x6ec   :  { %v9230_v33 = vsub.f32 %v16506_v53, %v15633_v56 }
 0x6ed   :  { %v9419_v38 = vadd.f32 %v15813_v26, %v9418_v36  ;;  %v16508_v36 = vld [vmem:[#allocation23_spill] sm:$0xff]  ;;  %v15838_v48 = vpop.eup %11630  ;;  %11640 = vpow2.f32 %v9338_v13 }
 0x6ee   :  { %v9231_v26 = vsub.f32 %v16508_v36, %v15633_v56  ;;  %v9340_v53 = vmul.f32 1.442695, %v9230_v33 }
 0x6ef   :  { %v9420_v47 = vadd.f32 %v15818_v45, %v9419_v38  ;;  %v16509_v38 = vld [vmem:[#allocation22_spill] sm:$0xff] }
 0x6f0   :  { %v9232_v45 = vsub.f32 %v16509_v38, %v15633_v56  ;;  %v9342_v36 = vmul.f32 1.442695, %v9231_v26  ;;  %v15843_v59 = vpop.eup %11632  ;;  %11642 = vpow2.f32 %v9340_v53 }
 0x6f1   :  { %v9421_v42 = vadd.f32 %v15823_v23, %v9420_v47  ;;  %v16510_v47 = vld [vmem:[#allocation20_spill] sm:$0xff]  ;;  %v15848_v7 = vpop.eup %11634 }
 0x6f2   :  { %v9233_v23 = vsub.f32 %v16510_v47, %v15633_v56  ;;  %v9344_v38 = vmul.f32 1.442695, %v9232_v45  ;;  %11644 = vpow2.f32 %v9342_v36 }
 0x6f3   :  { %v9422_v14 = vadd.f32 %v15828_v28, %v9421_v42  ;;  %v16511_v42 = vld [vmem:[#allocation72_spill] sm:$0xff]  ;;  %v15853_v13 = vpop.eup %11636 }
 0x6f4   :  { %v9234_v28 = vsub.f32 %v16511_v42, %v15633_v56  ;;  %v9346_v47 = vmul.f32 1.442695, %v9233_v23  ;;  %11646 = vpow2.f32 %v9344_v38 }
 0x6f5   :  { %v9423_v41 = vadd.f32 %v15833_v44, %v9422_v14  ;;  %v9235_v14 = vsub.f32 %v15533_v61, %v15633_v56  ;;  %v15858_v53 = vpop.eup %11638 }
 0x6f6   :  { %v9348_v42 = vmul.f32 1.442695, %v9234_v28  ;;  %11648 = vpow2.f32 %v9346_v47 }
 0x6f7   :  { %v9424_v12 = vadd.f32 %v15838_v48, %v9423_v41  ;;  %v9236_v41 = vsub.f32 %v15542_v10, %v15633_v56  ;;  %v9350_v61 = vmul.f32 1.442695, %v9235_v14  ;;  %v15863_v36 = vpop.eup %11640 }
 0x6f8   :  { %11650 = vpow2.f32 %v9348_v42 }
 0x6f9   :  { %v9425_v33 = vadd.f32 %v15843_v59, %v9424_v12  ;;  %v9237_v12 = vsub.f32 %v15536_v20, %v15633_v56  ;;  %v9352_v10 = vmul.f32 1.442695, %v9236_v41  ;;  %11652 = vpow2.f32 %v9350_v61 }
 0x6fa   :  { %v15868_v38 = vpop.eup %11642 }
 0x6fb   :  { %v9426_v26 = vadd.f32 %v15848_v7, %v9425_v33  ;;  %v9238_v33 = vsub.f32 %v15554_v4, %v15633_v56  ;;  %v9354_v20 = vmul.f32 1.442695, %v9237_v12  ;;  %11654 = vpow2.f32 %v9352_v10 }
 0x6fc   :  { %v15873_v47 = vpop.eup %11644 }
 0x6fd   :  { %v9427_v45 = vadd.f32 %v15853_v13, %v9426_v26  ;;  %v9239_v26 = vsub.f32 %v15557_v8, %v15633_v56  ;;  %v9356_v4 = vmul.f32 1.442695, %v9238_v33  ;;  %11656 = vpow2.f32 %v9354_v20 }
 0x6fe   :  { %v15878_v42 = vpop.eup %11646 }
 0x6ff   :  { %v9428_v23 = vadd.f32 %v15858_v53, %v9427_v45  ;;  %v9240_v45 = vsub.f32 %v15568_v40, %v15633_v56  ;;  %v9358_v8 = vmul.f32 1.442695, %v9239_v26  ;;  %11658 = vpow2.f32 %v9356_v4 }
 0x700   :  { %v15883_v61 = vpop.eup %11648 }
 0x701   :  { %v9429_v28 = vadd.f32 %v15863_v36, %v9428_v23  ;;  %v9241_v23 = vsub.f32 %v15560_v39, %v15633_v56  ;;  %v9360_v40 = vmul.f32 1.442695, %v9240_v45  ;;  %11660 = vpow2.f32 %v9358_v8 }
 0x702   :  { %v15888_v10 = vpop.eup %11650 }
 0x703   :  { %v9430_v14 = vadd.f32 %v15868_v38, %v9429_v28  ;;  %v9242_v28 = vsub.f32 %v15574_v46, %v15633_v56  ;;  %v9362_v39 = vmul.f32 1.442695, %v9241_v23  ;;  %v15893_v20 = vpop.eup %11652  ;;  %11662 = vpow2.f32 %v9360_v40 }
 0x705   :  { %v9431_v41 = vadd.f32 %v15873_v47, %v9430_v14  ;;  %v9243_v14 = vsub.f32 %v15577_v21, %v15633_v56  ;;  %v9364_v46 = vmul.f32 1.442695, %v9242_v28  ;;  %v15898_v4 = vpop.eup %11654  ;;  %11664 = vpow2.f32 %v9362_v39 }
 0x707   :  { %v9432_v12 = vadd.f32 %v15878_v42, %v9431_v41  ;;  %v9244_v41 = vsub.f32 %v15584_v6, %v15633_v56  ;;  %v9366_v21 = vmul.f32 1.442695, %v9243_v14  ;;  %v15903_v8 = vpop.eup %11656  ;;  %11666 = vpow2.f32 %v9364_v46 }
 0x709   :  { %v9433_v33 = vadd.f32 %v15883_v61, %v9432_v12  ;;  %v9245_v12 = vsub.f32 %v15581_v19, %v15633_v56  ;;  %v9368_v6 = vmul.f32 1.442695, %v9244_v41  ;;  %v15908_v40 = vpop.eup %11658  ;;  %11668 = vpow2.f32 %v9366_v21 }
 0x70b   :  { %v9434_v26 = vadd.f32 %v15888_v10, %v9433_v33  ;;  %v9246_v33 = vsub.f32 %v15597_v58, %v15633_v56  ;;  %v9370_v19 = vmul.f32 1.442695, %v9245_v12  ;;  %v15913_v39 = vpop.eup %11660  ;;  %11670 = vpow2.f32 %v9368_v6 }
 0x70d   :  { %v9435_v45 = vadd.f32 %v15893_v20, %v9434_v26  ;;  %v9247_v26 = vsub.f32 %v15588_v34, %v15633_v56  ;;  %v9372_v58 = vmul.f32 1.442695, %v9246_v33  ;;  %v15918_v46 = vpop.eup %11662  ;;  %11672 = vpow2.f32 %v9370_v19 }
 0x70f   :  { %v9436_v23 = vadd.f32 %v15898_v4, %v9435_v45  ;;  %v9248_v45 = vsub.f32 %v15603_v2, %v15633_v56  ;;  %v9374_v34 = vmul.f32 1.442695, %v9247_v26  ;;  %v15923_v21 = vpop.eup %11664  ;;  %11674 = vpow2.f32 %v9372_v58 }
 0x710   :  { %16512 = vst [vmem:[#allocation83_spill] sm:$0xff] %v15923_v21  ;;  %v9253_v26 = vsub.f32 %v15620_v0, %v15633_v56 }
 0x711   :  { %v9437_v28 = vadd.f32 %v15903_v8, %v9436_v23  ;;  %v9249_v23 = vsub.f32 %v15600_v57, %v15633_v56  ;;  %v9376_v2 = vmul.f32 1.442695, %v9248_v45  ;;  %v15928_v6 = vpop.eup %11666  ;;  %11676 = vpow2.f32 %v9374_v34 }
 0x712   :  { %16513 = vst [vmem:[#allocation84_spill] sm:$0xff] %v15928_v6  ;;  %v9386_v34 = vmul.f32 1.442695, %v9253_v26 }
 0x713   :  { %v9438_v14 = vadd.f32 %v15908_v40, %v9437_v28  ;;  %v9250_v28 = vsub.f32 %v15613_v32, %v15633_v56  ;;  %v9378_v57 = vmul.f32 1.442695, %v9249_v23  ;;  %v9252_v32 = vsub.f32 %v15626_v25, %v15633_v56 }
 0x714   :  { %11678 = vpow2.f32 %v9376_v2 }
 0x715   :  { %v9439_v41 = vadd.f32 %v15913_v39, %v9438_v14  ;;  %v9251_v14 = vsub.f32 %v15617_v35, %v15633_v56  ;;  %v9380_v45 = vmul.f32 1.442695, %v9250_v28  ;;  %11680 = vpow2.f32 %v9378_v57 }
 0x716   :  { %v9384_v0 = vmul.f32 1.442695, %v9252_v32 }
 0x717   :  { %v9440_v12 = vadd.f32 %v15918_v46, %v9439_v41  ;;  %v15935_v41 = vpop.eup %11668  ;;  %v9382_v35 = vmul.f32 1.442695, %v9251_v14  ;;  %11682 = vpow2.f32 %v9380_v45 }
 0x719   :  { %v9441_v33 = vadd.f32 %v15923_v21, %v9440_v12  ;;  %v15940_v12 = vpop.eup %11670  ;;  %11684 = vpow2.f32 %v9382_v35 }
 0x71a   :  { %v15943_v21 = vpop.eup %11672  ;;  %11686 = vpow2.f32 %v9386_v34 }
 0x71b   :  { %v9442_v19 = vadd.f32 %v15928_v6, %v9441_v33  ;;  %v15946_v6 = vpop.eup %11674  ;;  %11688 = vpow2.f32 %v9384_v0 }
 0x71c   :  { %v15949_v56 = vpop.eup %11676 }
 0x71d   :  { %v9443_v58 = vadd.f32 %v15935_v41, %v9442_v19 }
 0x71e   :  { %v15952_v2 = vpop.eup %11678 }
 0x71f   :  { %v9444_v23 = vadd.f32 %v15940_v12, %v9443_v58  ;;  %v15955_v57 = vpop.eup %11680 }
 0x720   :  { %16514 = vst [vmem:[#allocation73_spill] sm:$0xff] %v15955_v57 }
 0x721   :  { %v9445_v33 = vadd.f32 %v15943_v21, %v9444_v23  ;;  %v15958_v19 = vpop.eup %11682 }
 0x722   :  { %16515 = vst [vmem:[#allocation29_spill] sm:$0xff] %v15958_v19 }
 0x723   :  { %v9446_v25 = vadd.f32 %v15946_v6, %v9445_v33  ;;  %v15961_v45 = vpop.eup %11684 }
 0x724   :  { %v15963_v58 = vpop.eup %11686 }
 0x725   :  { %v9447_v28 = vadd.f32 %v15949_v56, %v9446_v25  ;;  %v15966_v34 = vpop.eup %11688  ;;  %v9453_v0 = vsel %vm5638_vm2, %v15963_v58, 0.0 }
 0x727   :  { %v9448_v14 = vadd.f32 %v15952_v2, %v9447_v28 }
 0x729   :  { %v9449_v26 = vadd.f32 %v15955_v57, %v9448_v14 }
 0x72b   :  { %v9450_v32 = vadd.f32 %v15958_v19, %v9449_v26 }
 0x72d   :  { %v9451_v35 = vadd.f32 %v15961_v45, %v9450_v32 }
 0x72f   :  { %v9452_v23 = vadd.f32 %v15966_v34, %v9451_v35 }
 0x731   :  { %v9454_v33 = vadd.f32 %v9453_v0, %v9452_v23 }
 0x733   :  { %9455 = vadd.xlane.f32.xlu0 %v9454_v33 }
 0x7c0   :  { %v9456_v25 = vpop.xlane.xlu0 %9455 }
 0x7c1   :  { %11690 = vrcp.f32 %v9456_v25 }
 0x7cb   :  { %v11691_v28 = vpop.eup %11690 }
 0x7cc   :  { %v9458_v14 = vmul.f32 %v11691_v28, %v9456_v25 }
 0x7ce   :  { %v9459_v26 = vsub.f32 2.0, %v9458_v14 }
 0x7d0   :  { %v15971_v19 = vmul.f32 %v11691_v28, %v9459_v26 }
 0x7d2   :  { %v9461_v57 = vmul.f32 %v15653_v52, %v15971_v19  ;;  %v9462_v32 = vmul.f32 %v15655_v11, %v15971_v19  ;;  %v9463_v35 = vmul.f32 %v15663_v60, %v15971_v19  ;;  %v9464_v23 = vmul.f32 %v15668_v22, %v15971_v19 }
 0x7d3   :  { %v9465_v0 = vmul.f32 %v15673_v63, %v15971_v19  ;;  %v9466_v33 = vmul.f32 %v15678_v27, %v15971_v19  ;;  %v9467_v25 = vmul.f32 %v15683_v62, %v15971_v19  ;;  %v9468_v52 = vmul.f32 %v15688_v49, %v15971_v19 }
 0x7d4   :  { %v9469_v11 = vmul.f32 %v15693_v43, %v15971_v19  ;;  %v9470_v60 = vmul.f32 %v15698_v37, %v15971_v19  ;;  %v9471_v22 = vmul.f32 %v15703_v50, %v15971_v19  ;;  %v9472_v63 = vmul.f32 %v15708_v31, %v15971_v19  ;;  %9528 = vst [vmem:[#allocation5] sm:$0xff] %v9461_v57  ;;  %v16516_v37 = vld [vmem:[#allocation75_spill] sm:$0xff]  ;;  %v16517_v31 = vld [vmem:[#allocation76_spill] sm:$0xff] }
 0x7d5   :  { %9529 = vst [vmem:[#allocation5 + $0x8] sm:$0xff] %v9462_v32  ;;  %9530 = vst [vmem:[#allocation5 + $0x10] sm:$0xff] %v9463_v35  ;;  %v9473_v27 = vmul.f32 %v15713_v30, %v15971_v19  ;;  %v9474_v62 = vmul.f32 %v15718_v18, %v15971_v19  ;;  %v9475_v49 = vmul.f32 %v15723_v5, %v15971_v19  ;;  %v16518_v30 = vld [vmem:[#allocation25_spill] sm:$0xff]  ;;  %v16519_v18 = vld [vmem:[#allocation27_spill] sm:$0xff] }
 0x7d6   :  { %9531 = vst [vmem:[#allocation5 + $0x18] sm:$0xff] %v9464_v23  ;;  %v9476_v43 = vmul.f32 %v15728_v29, %v15971_v19  ;;  %9532 = vst [vmem:[#allocation5 + $0x20] sm:$0xff] %v9465_v0  ;;  %v9477_v50 = vmul.f32 %v16516_v37, %v15971_v19  ;;  %v9478_v57 = vmul.f32 %v16517_v31, %v15971_v19 }
 0x7d7   :  { %9533 = vst [vmem:[#allocation5 + $0x28] sm:$0xff] %v9466_v33  ;;  %9534 = vst [vmem:[#allocation5 + $0x30] sm:$0xff] %v9467_v25  ;;  %v9479_v28 = vmul.f32 %v16518_v30, %v15971_v19  ;;  %v9480_v14 = vmul.f32 %v16519_v18, %v15971_v19  ;;  %v9481_v5 = vmul.f32 %v15753_v16, %v15971_v19  ;;  %v16520_v16 = vld [vmem:[#allocation24_spill] sm:$0xff] }
 0x7d8   :  { %9535 = vst [vmem:[#allocation5 + $0x38] sm:$0xff] %v9468_v52  ;;  %9536 = vst [vmem:[#allocation5 + $0x40] sm:$0xff] %v9469_v11  ;;  %v9482_v29 = vmul.f32 %v15758_v1, %v15971_v19  ;;  %v9483_v26 = vmul.f32 %v15763_v17, %v15971_v19  ;;  %v9484_v32 = vmul.f32 %v15768_v15, %v15971_v19  ;;  %v16523_v52 = vld [vmem:[#allocation81_spill] sm:$0xff] }
 0x7d9   :  { %9537 = vst [vmem:[#allocation5 + $0x48] sm:$0xff] %v9470_v60  ;;  %9538 = vst [vmem:[#allocation5 + $0x50] sm:$0xff] %v9471_v22  ;;  %v9485_v35 = vmul.f32 %v15773_v24, %v15971_v19  ;;  %v9486_v23 = vmul.f32 %v15778_v54, %v15971_v19  ;;  %v9487_v0 = vmul.f32 %v16520_v16, %v15971_v19  ;;  %v16521_v54 = vld [vmem:[#allocation78_spill] sm:$0xff] }
 0x7da   :  { %9539 = vst [vmem:[#allocation5 + $0x58] sm:$0xff] %v9472_v63  ;;  %9540 = vst [vmem:[#allocation5 + $0x60] sm:$0xff] %v9473_v27  ;;  %v9488_v1 = vmul.f32 %v15788_v3, %v15971_v19  ;;  %v9489_v17 = vmul.f32 %v15793_v9, %v15971_v19  ;;  %v9490_v15 = vmul.f32 %v15798_v51, %v15971_v19  ;;  %v16522_v3 = vld [vmem:[#allocation79_spill] sm:$0xff]  ;;  %v16524_v9 = vld [vmem:[#allocation26_spill] sm:$0xff] }
 0x7db   :  { %9541 = vst [vmem:[#allocation5 + $0x68] sm:$0xff] %v9474_v62  ;;  %9542 = vst [vmem:[#allocation5 + $0x70] sm:$0xff] %v9475_v49  ;;  %v9491_v24 = vmul.f32 %v15803_v55, %v15971_v19  ;;  %v9492_v33 = vmul.f32 %v16521_v54, %v15971_v19  ;;  %v9493_v25 = vmul.f32 %v16522_v3, %v15971_v19  ;;  %v16525_v51 = vld [vmem:[#allocation82_spill] sm:$0xff] }
 0x7dc   :  { %9543 = vst [vmem:[#allocation5 + $0x78] sm:$0xff] %v9476_v43  ;;  %9544 = vst [vmem:[#allocation5 + $0x80] sm:$0xff] %v9477_v50  ;;  %v9494_v11 = vmul.f32 %v16523_v52, %v15971_v19  ;;  %v9495_v60 = vmul.f32 %v16524_v9, %v15971_v19  ;;  %v9496_v22 = vmul.f32 %v16525_v51, %v15971_v19 }
 0x7dd   :  { %9545 = vst [vmem:[#allocation5 + $0x88] sm:$0xff] %v9478_v57  ;;  %9546 = vst [vmem:[#allocation5 + $0x90] sm:$0xff] %v9479_v28  ;;  %v9497_v55 = vmul.f32 %v15833_v44, %v15971_v19  ;;  %v9498_v63 = vmul.f32 %v15838_v48, %v15971_v19  ;;  %v9499_v27 = vmul.f32 %v15843_v59, %v15971_v19 }
 0x7de   :  { %9547 = vst [vmem:[#allocation5 + $0x98] sm:$0xff] %v9480_v14  ;;  %9548 = vst [vmem:[#allocation5 + $0xa0] sm:$0xff] %v9481_v5  ;;  %v9500_v62 = vmul.f32 %v15848_v7, %v15971_v19  ;;  %v9501_v49 = vmul.f32 %v15853_v13, %v15971_v19  ;;  %v9502_v43 = vmul.f32 %v15858_v53, %v15971_v19 }
 0x7df   :  { %9549 = vst [vmem:[#allocation5 + $0xa8] sm:$0xff] %v9482_v29  ;;  %9550 = vst [vmem:[#allocation5 + $0xb0] sm:$0xff] %v9483_v26  ;;  %v9503_v44 = vmul.f32 %v15863_v36, %v15971_v19  ;;  %v9504_v48 = vmul.f32 %v15868_v38, %v15971_v19  ;;  %v9505_v59 = vmul.f32 %v15873_v47, %v15971_v19 }
 0x7e0   :  { %9551 = vst [vmem:[#allocation5 + $0xb8] sm:$0xff] %v9484_v32  ;;  %9552 = vst [vmem:[#allocation5 + $0xc0] sm:$0xff] %v9485_v35  ;;  %v9506_v7 = vmul.f32 %v15878_v42, %v15971_v19  ;;  %v9507_v13 = vmul.f32 %v15883_v61, %v15971_v19  ;;  %v9508_v53 = vmul.f32 %v15888_v10, %v15971_v19 }
 0x7e1   :  { %9553 = vst [vmem:[#allocation5 + $0xc8] sm:$0xff] %v9486_v23  ;;  %9554 = vst [vmem:[#allocation5 + $0xd0] sm:$0xff] %v9487_v0  ;;  %v9509_v36 = vmul.f32 %v15893_v20, %v15971_v19  ;;  %v9510_v38 = vmul.f32 %v15898_v4, %v15971_v19  ;;  %v9511_v47 = vmul.f32 %v15903_v8, %v15971_v19  ;;  %v16526_v20 = vld [vmem:[#allocation83_spill] sm:$0xff]  ;;  %v16527_v4 = vld [vmem:[#allocation84_spill] sm:$0xff] }
 0x7e2   :  { %9555 = vst [vmem:[#allocation5 + $0xd8] sm:$0xff] %v9488_v1  ;;  %9556 = vst [vmem:[#allocation5 + $0xe0] sm:$0xff] %v9489_v17  ;;  %v9512_v42 = vmul.f32 %v15908_v40, %v15971_v19  ;;  %v9513_v61 = vmul.f32 %v15913_v39, %v15971_v19  ;;  %v9514_v10 = vmul.f32 %v15918_v46, %v15971_v19 }
 0x7e3   :  { %9557 = vst [vmem:[#allocation5 + $0xe8] sm:$0xff] %v9490_v15  ;;  %9558 = vst [vmem:[#allocation5 + $0xf0] sm:$0xff] %v9491_v24  ;;  %v9515_v37 = vmul.f32 %v16526_v20, %v15971_v19  ;;  %v9516_v50 = vmul.f32 %v16527_v4, %v15971_v19  ;;  %v9517_v8 = vmul.f32 %v15935_v41, %v15971_v19  ;;  %v16528_v41 = vld [vmem:[#allocation73_spill] sm:$0xff] }
 0x7e4   :  { %9559 = vst [vmem:[#allocation5 + $0xf8] sm:$0xff] %v9492_v33  ;;  %9560 = vst [vmem:[#allocation5 + $0x100] sm:$0xff] %v9493_v25  ;;  %v9518_v40 = vmul.f32 %v15940_v12, %v15971_v19  ;;  %v9519_v39 = vmul.f32 %v15943_v21, %v15971_v19  ;;  %v9520_v46 = vmul.f32 %v15946_v6, %v15971_v19  ;;  %v16529_v12 = vld [vmem:[#allocation29_spill] sm:$0xff] }
 0x7e5   :  { %9561 = vst [vmem:[#allocation5 + $0x108] sm:$0xff] %v9494_v11  ;;  %9562 = vst [vmem:[#allocation5 + $0x110] sm:$0xff] %v9495_v60  ;;  %v9521_v31 = vmul.f32 %v15949_v56, %v15971_v19  ;;  %v9522_v57 = vmul.f32 %v15952_v2, %v15971_v19  ;;  %v9523_v30 = vmul.f32 %v16528_v41, %v15971_v19 }
 0x7e6   :  { %9563 = vst [vmem:[#allocation5 + $0x118] sm:$0xff] %v9496_v22  ;;  %9564 = vst [vmem:[#allocation5 + $0x120] sm:$0xff] %v9497_v55  ;;  %v9524_v28 = vmul.f32 %v16529_v12, %v15971_v19  ;;  %v9525_v21 = vmul.f32 %v15961_v45, %v15971_v19  ;;  %v9526_v6 = vmul.f32 %v15966_v34, %v15971_v19 }
 0x7e7   :  { %9565 = vst [vmem:[#allocation5 + $0x128] sm:$0xff] %v9498_v63  ;;  %9566 = vst [vmem:[#allocation5 + $0x130] sm:$0xff] %v9499_v27  ;;  %v9527_v56 = vmul.f32 %v15963_v58, %v15971_v19 }
 0x7e8   :  { %9567 = vst [vmem:[#allocation5 + $0x138] sm:$0xff] %v9500_v62  ;;  %9568 = vst [vmem:[#allocation5 + $0x140] sm:$0xff] %v9501_v49 }
 0x7e9   :  { %9569 = vst [vmem:[#allocation5 + $0x148] sm:$0xff] %v9502_v43  ;;  %9570 = vst [vmem:[#allocation5 + $0x150] sm:$0xff] %v9503_v44 }
 0x7ea   :  { %9571 = vst [vmem:[#allocation5 + $0x158] sm:$0xff] %v9504_v48  ;;  %9572 = vst [vmem:[#allocation5 + $0x160] sm:$0xff] %v9505_v59 }
 0x7eb   :  { %9573 = vst [vmem:[#allocation5 + $0x168] sm:$0xff] %v9506_v7  ;;  %9574 = vst [vmem:[#allocation5 + $0x170] sm:$0xff] %v9507_v13 }
 0x7ec   :  { %9575 = vst [vmem:[#allocation5 + $0x178] sm:$0xff] %v9508_v53  ;;  %9576 = vst [vmem:[#allocation5 + $0x180] sm:$0xff] %v9509_v36 }
 0x7ed   :  { %9577 = vst [vmem:[#allocation5 + $0x188] sm:$0xff] %v9510_v38  ;;  %9578 = vst [vmem:[#allocation5 + $0x190] sm:$0xff] %v9511_v47 }
 0x7ee   :  { %9579 = vst [vmem:[#allocation5 + $0x198] sm:$0xff] %v9512_v42  ;;  %9580 = vst [vmem:[#allocation5 + $0x1a0] sm:$0xff] %v9513_v61 }
 0x7ef   :  { %9581 = vst [vmem:[#allocation5 + $0x1a8] sm:$0xff] %v9514_v10  ;;  %9582 = vst [vmem:[#allocation5 + $0x1b0] sm:$0xff] %v9515_v37 }
 0x7f0   :  { %9583 = vst [vmem:[#allocation5 + $0x1b8] sm:$0xff] %v9516_v50  ;;  %9584 = vst [vmem:[#allocation5 + $0x1c0] sm:$0xff] %v9517_v8 }
 0x7f1   :  { %9585 = vst [vmem:[#allocation5 + $0x1c8] sm:$0xff] %v9518_v40  ;;  %9586 = vst [vmem:[#allocation5 + $0x1d0] sm:$0xff] %v9519_v39 }
 0x7f2   :  { %9587 = vst [vmem:[#allocation5 + $0x1d8] sm:$0xff] %v9520_v46  ;;  %9588 = vst [vmem:[#allocation5 + $0x1e0] sm:$0xff] %v9521_v31 }
 0x7f3   :  { %9589 = vst [vmem:[#allocation5 + $0x1e8] sm:$0xff] %v9522_v57  ;;  %9590 = vst [vmem:[#allocation5 + $0x1f0] sm:$0xff] %v9523_v30 }
 0x7f4   :  { %9591 = vst [vmem:[#allocation5 + $0x1f8] sm:$0xff] %v9524_v28  ;;  %9592 = vst [vmem:[#allocation5 + $0x200] sm:$0xff] %v9525_v21 }
 0x7f5   :  { %9593 = vst [vmem:[#allocation5 + $0x208] sm:$0xff] %v9526_v6  ;;  %9594 = vst.msk [vmem:[#allocation5 + $0x210] sm:$0xff] %vm5638_vm2, %v9527_v56 }
 0x7f6   :  { %11703 = shalt.err (!%p11700_p4)
}
 0x7f7   :  { %s11704_s16 = scalar_lea.hbm %s16127_s7, 8576 }
 0x7f8   :  { %p11705_p5 = scmp.ne.s32.totalorder %s16127_s7, %s11704_s16  ;;  %p11708_p6 = scmp.lt.u32.totalorder %s11704_s16, %s16127_s7 }
 0x7fa   :  { %p11710_p7 = pnand %p11708_p6, %p11705_p5 }
 0x7fc   :  { %11713 = shalt.err (!%p11710_p7)
}
 0x7fd   :  { %9604 = dma.vmem_to_hbm [thread:$0]  %s9602_s13, 8576, %s16127_s7, [#allocation6]  }
 0x7fe   :  { %11718 = dma.done.wait [#allocation6], 8576  }
 0x7ff   :  { %11719 = vsyncadd [#allocation6], 4294958720 }
 0x800   :  { %9608 = vsyncpa [#allocation6], 1 }
 0x801   :  { %9609 = vsyncmov [#allocation4] }
 0x804   :  { %s9610_s23 = vpop.sfrf %9609 }
 0x805   :  { %p10225_p8 = scmp.ne.s32.totalorder %s9610_s23, 0 }
 0x807   :  { %9614 = shalt.err (%p10225_p8)  }
 0x808   :  { %9616 = vsyncmov [#allocation4 + $0x1] }
 0x80b   :  { %s9617_s24 = vpop.sfrf %9616 }
 0x80c   :  { %p10226_p9 = scmp.ne.s32.totalorder %s9617_s24, 0 }
 0x80e   :  { %9621 = shalt.err (%p10226_p9)  }

</bundles_post_ra>
